<compile_context>
chip_gen: v5e
topology: v5e:2x2
jax: 0.10.0
libtpu: 0.0.40
codegen_flags: <defaults>
</compile_context>

<pallas_src>
import math

import jax
import jax.numpy as jnp
from jax.experimental import pallas as pl
from jax.experimental.pallas import tpu as pltpu  # noqa: F401  (kept for parity)

# ---------------- small synthetic config (GIT "single_view") -----------------
B = 2            # batch
C = 3            # image channels (single_view => 3)
IMG = 16         # image size
PATCH = 8        # patch size
NPATCH = (IMG // PATCH) ** 2      # 4 patches
SV_REAL = NPATCH + 1              # real visual tokens (CLS + patches) = 5
SV = 8                            # visual tokens padded to a sublane tile
DV = 32          # vision hidden size
VHEADS = 2
VINTER = 64
VLAYERS = 2
D = 32           # text hidden size
THEADS = 2
TINTER = 64
TLAYERS = 2
VOCAB = 64
VOCAB_PAD = 128  # lane-dense LM head (zero-padded)
TSEQ = 8         # text sequence length
MAXPOS = 32
S = SV + TSEQ    # 16 -> exactly two sublane tiles
K = C * PATCH * PATCH
LN_EPS_VIS = 1e-5
LN_EPS_TXT = 1e-12
NEG = -1e9


# ----------------------- in-kernel building blocks ---------------------------
def _ln(x, g, b, eps):
    """LayerNorm over the last axis; g, b are (1, H)."""
    mu = jnp.mean(x, axis=-1, keepdims=True)
    var = jnp.mean(jnp.square(x - mu), axis=-1, keepdims=True)
    return (x - mu) * jax.lax.rsqrt(var + eps) * g + b


def _mha(x, qkv_w, qkv_b, wo, bo, layer, nheads, nbatch, seq, mask):
    """Multi-head self-attention on batch-flattened rows.

    x:     (nbatch*seq, Dm)
    qkv_w: Ref (L, Dm, 3*Dm)   (Q columns pre-scaled by 1/sqrt(dh))
    qkv_b: Ref (L, 1, 3*Dm)
    wo:    Ref (L, Dm, Dm) ; bo: Ref (L, 1, Dm)
    mask:  (seq, seq) additive mask (same for every batch element) or None.

    One fused QKV matmul per layer; heads are static lane slices; per-head
    context vectors are lane-concatenated and projected with one matmul.
    """
    dm = wo.shape[-1]
    dh = dm // nheads
    qkv = jnp.dot(x, qkv_w[layer], preferred_element_type=jnp.float32) + qkv_b[layer]

    ctx_rows = []
    for b in range(nbatch):                      # static python loops (B=2, H=2)
        r0 = b * seq
        heads = []
        for h in range(nheads):
            q = qkv[r0:r0 + seq, h * dh:(h + 1) * dh]
            k = qkv[r0:r0 + seq, dm + h * dh:dm + (h + 1) * dh]
            v = qkv[r0:r0 + seq, 2 * dm + h * dh:2 * dm + (h + 1) * dh]
            s = jax.lax.dot_general(q, k, (((1,), (1,)), ((), ())),
                                    preferred_element_type=jnp.float32)
            if mask is not None:
                s = s + mask
            m = jnp.max(s, axis=-1, keepdims=True)
            p = jnp.exp(s - m)                                        # EUP
            inv = pl.reciprocal(jnp.sum(p, axis=-1, keepdims=True), approx=True)
            heads.append(jnp.dot(p * inv, v, preferred_element_type=jnp.float32))
        ctx_rows.append(jnp.concatenate(heads, axis=-1))              # (seq, Dm)
    ctx = jnp.concatenate(ctx_rows, axis=0)                           # (nbatch*seq, Dm)
    return jnp.dot(ctx, wo[layer], preferred_element_type=jnp.float32) + bo[layer]


def _mlp(x, w1, b1, w2, b2, layer, act):
    h = jnp.dot(x, w1[layer], preferred_element_type=jnp.float32) + b1[layer]
    if act == "quick_gelu":                       # CLIP vision MLP activation
        h = h * jax.nn.sigmoid(1.702 * h)
    else:
        # TODO(synk): HF GIT text MLP uses exact erf-GELU; tanh approximation
        # kept for robust Mosaic lowering (difference ~1e-3).
        h = jax.nn.gelu(h, approximate=True)
    return jnp.dot(h, w2[layer], preferred_element_type=jnp.float32) + b2[layer]


def _make_kernel(treedef, n_w):
    """Fused whole-model kernel; entire batch processed in one invocation."""

    def kernel(*refs):
        patch_ref, vpos_ref, tok_ref, vmask_ref, tmask_ref = refs[:5]
        w = jax.tree_util.tree_unflatten(treedef, refs[5:5 + n_w])
        o_ref = refs[5 + n_w]

        # ---- vision embeddings: patch matmul (rows are batch-flattened); the
        #      CLS embedding is folded into row 0 of the (padded) pos table.
        x = (jnp.dot(patch_ref[...], w["v_patch_w"][...],
                     preferred_element_type=jnp.float32) + vpos_ref[...])
        x = _ln(x, w["v_pre_g"][...], w["v_pre_b"][...], LN_EPS_VIS)

        # ---- CLIP-style pre-norm encoder layers; padded visual key columns
        #      are NEG-masked so real-token results match the unpadded model.
        vmask = vmask_ref[...]
        for l in range(VLAYERS):
            h = _ln(x, w["v_ln1_g"][l], w["v_ln1_b"][l], LN_EPS_VIS)
            x = x + _mha(h, w["v_qkv_w"], w["v_qkv_b"], w["v_wo"], w["v_bo"],
                         l, VHEADS, B, SV, vmask)
            h = _ln(x, w["v_ln2_g"][l], w["v_ln2_b"][l], LN_EPS_VIS)
            x = x + _mlp(h, w["v_fc1_w"], w["v_fc1_b"], w["v_fc2_w"],
                         w["v_fc2_b"], l, "quick_gelu")
        x = _ln(x, w["v_post_g"][...], w["v_post_b"][...], LN_EPS_VIS)

        # ---- GitProjection: Linear + LayerNorm
        v = (jnp.dot(x, w["t_proj_w"][...], preferred_element_type=jnp.float32)
             + w["t_proj_b"][...])
        v = _ln(v, w["t_proj_ln_g"][...], w["t_proj_ln_b"][...], LN_EPS_TXT)

        # ---- text embedding LayerNorm (word+pos gathered outside, once)
        t = _ln(tok_ref[...], w["t_emb_g"][...], w["t_emb_b"][...], LN_EPS_TXT)

        # ---- [visual ; text] per-batch concat: all 8-row, sublane-aligned
        parts = []
        for b in range(B):
            parts.append(v[b * SV:(b + 1) * SV])
            parts.append(t[b * TSEQ:(b + 1) * TSEQ])
        hseq = jnp.concatenate(parts, axis=0)                  # (B*S, D)

        # ---- GIT decoder (BERT-style post-norm) with GIT block mask
        tmask = tmask_ref[...]
        for l in range(TLAYERS):
            a = _mha(hseq, w["t_qkv_w"], w["t_qkv_b"], w["t_wo"], w["t_bo"],
                     l, THEADS, B, S, tmask)
            hseq = _ln(hseq + a, w["t_attn_ln_g"][l], w["t_attn_ln_b"][l],
                       LN_EPS_TXT)
            m = _mlp(hseq, w["t_inter_w"], w["t_inter_b"], w["t_out_w"],
                     w["t_out_b"], l, "gelu")
            hseq = _ln(hseq + m, w["t_out_ln_g"][l], w["t_out_ln_b"][l],
                       LN_EPS_TXT)

        # ---- LM head: 128-lane (zero-padded) output -> unmasked full stores
        o_ref[...] = (jnp.dot(hseq, w["t_lm_w"][...],
                              preferred_element_type=jnp.float32)
                      + w["t_lm_b"][...])

    return kernel


# ------------------------------ host-side glue -------------------------------
def build_masks(sv_real, sv_pad, st):
    """Additive masks.

    vmask (sv_pad, sv_pad): vision encoder, padded visual keys blocked.
    tmask (S, S): GIT mask - every query attends to *real* visual keys;
    text queries additionally attend causally to text keys; padded visual
    keys and image->text attention are blocked.
    """
    key_is_pad = jnp.arange(sv_pad) >= sv_real
    vmask = jnp.where(key_is_pad[None, :], NEG, 0.0).astype(jnp.float32)

    s = sv_pad + st
    col = jnp.arange(s)
    row = jnp.arange(s)
    col_is_real_vis = col < sv_real
    col_is_txt = col >= sv_pad
    row_is_txt = row >= sv_pad
    attend_vis = jnp.broadcast_to(col_is_real_vis[None, :], (s, s))
    causal_txt = (row_is_txt[:, None] & col_is_txt[None, :]
                  & ((col[None, :] - sv_pad) <= (row[:, None] - sv_pad)))
    tmask = jnp.where(attend_vis | causal_txt, 0.0, NEG).astype(jnp.float32)
    return vmask, tmask


def git_forward(packed, pixel_values, input_ids):
    Bb = pixel_values.shape[0]
    T = input_ids.shape[1]
    assert Bb == B and T == TSEQ

    # Patch "unfold" (Conv2d stride==kernel, bias=False) + zero CLS row + zero
    # padding rows so the visual sequence length is 8 (sublane-aligned).
    patches = (pixel_values
               .reshape(Bb, C, IMG // PATCH, PATCH, IMG // PATCH, PATCH)
               .transpose(0, 2, 4, 1, 3, 5)
               .reshape(Bb, NPATCH, K))
    patches = jnp.concatenate(
        [jnp.zeros((Bb, 1, K), jnp.float32), patches,
         jnp.zeros((Bb, SV - SV_REAL, K), jnp.float32)], axis=1)
    patches = patches.reshape(Bb * SV, K)

    # Position table (CLS folded in, padded) tiled over batch: (B*SV, DV).
    vpos = jnp.tile(packed["v_pos"], (Bb, 1))

    # Token embeddings: gather stays in XLA (one-time), LN is in-kernel.
    tok = (jnp.take(packed["word_emb"], input_ids, axis=0)
           + packed["pos_emb"][:T][None, :, :]).reshape(Bb * T, D)

    vmask, tmask = build_masks(SV_REAL, SV, T)

    w_leaves, treedef = jax.tree_util.tree_flatten(packed["kern"])
    kernel = _make_kernel(treedef, len(w_leaves))

    # Single invocation (no grid): every array is tiny and whole-array
    # VMEM-resident; the batch is folded into the row dimension so all
    # position-wise matmuls run once at double sublane fill.
    out = pl.pallas_call(
        kernel,
        out_shape=jax.ShapeDtypeStruct((Bb * S, VOCAB_PAD), jnp.float32),
    )(patches, vpos, tok, vmask, tmask, *w_leaves)

    # Drop padded visual rows and padded vocab lanes -> (B, SV_REAL+T, VOCAB).
    out = out.reshape(Bb, S, VOCAB_PAD)
    return jnp.concatenate([out[:, :SV_REAL], out[:, SV:]], axis=1)[:, :, :VOCAB]


# --------------------------- deterministic weights ----------------------------
def init_params(key):
    it = iter(jax.random.split(key, 512))

    def w(*shape):
        return jax.random.normal(next(it), shape, jnp.float32) * 0.02

    def zeros(*shape):
        return jnp.zeros(shape, jnp.float32)

    def ones(*shape):
        return jnp.ones(shape, jnp.float32)

    def attn_params(dm):
        return dict(wq=w(dm, dm), bq=zeros(1, dm),
                    wk=w(dm, dm), bk=zeros(1, dm),
                    wv=w(dm, dm), bv=zeros(1, dm),
                    wo=w(dm, dm), bo=zeros(1, dm))

    vision_layers = []
    for _ in range(VLAYERS):
        vision_layers.append(dict(
            ln1_g=ones(1, DV), ln1_b=zeros(1, DV),
            attn=attn_params(DV),
            ln2_g=ones(1, DV), ln2_b=zeros(1, DV),
            fc1_w=w(DV, VINTER), fc1_b=zeros(1, VINTER),
            fc2_w=w(VINTER, DV), fc2_b=zeros(1, DV)))
    vision = dict(
        patch_w=w(K, DV),                         # Conv2d bias=False
        cls=w(DV),
        pos=w(SV_REAL, DV),
        pre_ln_g=ones(1, DV), pre_ln_b=zeros(1, DV),
        post_ln_g=ones(1, DV), post_ln_b=zeros(1, DV),
        layers=vision_layers)

    text_layers = []
    for _ in range(TLAYERS):
        text_layers.append(dict(
            attn=attn_params(D),
            attn_ln_g=ones(1, D), attn_ln_b=zeros(1, D),
            inter_w=w(D, TINTER), inter_b=zeros(1, TINTER),
            out_w=w(TINTER, D), out_b=zeros(1, D),
            out_ln_g=ones(1, D), out_ln_b=zeros(1, D)))
    text = dict(
        proj_w=w(DV, D), proj_b=zeros(1, D),
        proj_ln_g=ones(1, D), proj_ln_b=zeros(1, D),
        word_emb=w(VOCAB, D), pos_emb=w(MAXPOS, D),
        emb_ln_g=ones(1, D), emb_ln_b=zeros(1, D),
        layers=text_layers,
        lm_w=w(D, VOCAB), lm_b=zeros(1, VOCAB))

    return dict(vision=vision, text=text)


def pack_params(p):
    """Pack weights into a small set of lane-dense, VMEM-resident arrays:
    fused QKV (L, Dm, 3*Dm) with the attention scale folded into Q, full
    output projections (L, Dm, Dm), stacked LN params, 128-lane LM head."""
    vp, tp = p["vision"], p["text"]

    def pack_qkv(layers, nheads, dm):
        dh = dm // nheads
        scale = 1.0 / math.sqrt(dh)
        ws, bs = [], []
        for lp in layers:
            a = lp["attn"]
            ws.append(jnp.concatenate([a["wq"] * scale, a["wk"], a["wv"]], axis=1))
            bs.append(jnp.concatenate([a["bq"] * scale, a["bk"], a["bv"]], axis=1))
        return jnp.stack(ws), jnp.stack(bs)

    def stack(layers, name):
        return jnp.stack([lp[name] for lp in layers])

    def stack_attn(layers, name):
        return jnp.stack([lp["attn"][name] for lp in layers])

    v_qkv_w, v_qkv_b = pack_qkv(vp["layers"], VHEADS, DV)
    t_qkv_w, t_qkv_b = pack_qkv(tp["layers"], THEADS, D)

    # CLS embedding folded into row 0 of the position table (the CLS patch row
    # is zero and the patch conv has no bias, so this is exact); pad to SV rows.
    v_pos = vp["pos"].at[0].add(vp["cls"])
    v_pos = jnp.concatenate(
        [v_pos, jnp.zeros((SV - SV_REAL, DV), jnp.float32)], axis=0)

    # LM head zero-padded to a 128-lane output (sliced back to VOCAB outside).
    lm_w = jnp.concatenate(
        [tp["lm_w"], jnp.zeros((D, VOCAB_PAD - VOCAB), jnp.float32)], axis=1)
    lm_b = jnp.concatenate(
        [tp["lm_b"], jnp.zeros((1, VOCAB_PAD - VOCAB), jnp.float32)], axis=1)

    kern = dict(
        v_patch_w=vp["patch_w"],
        v_pre_g=vp["pre_ln_g"], v_pre_b=vp["pre_ln_b"],
        v_post_g=vp["post_ln_g"], v_post_b=vp["post_ln_b"],
        v_ln1_g=stack(vp["layers"], "ln1_g"), v_ln1_b=stack(vp["layers"], "ln1_b"),
        v_ln2_g=stack(vp["layers"], "ln2_g"), v_ln2_b=stack(vp["layers"], "ln2_b"),
        v_qkv_w=v_qkv_w, v_qkv_b=v_qkv_b,
        v_wo=stack_attn(vp["layers"], "wo"), v_bo=stack_attn(vp["layers"], "bo"),
        v_fc1_w=stack(vp["layers"], "fc1_w"), v_fc1_b=stack(vp["layers"], "fc1_b"),
        v_fc2_w=stack(vp["layers"], "fc2_w"), v_fc2_b=stack(vp["layers"], "fc2_b"),
        t_proj_w=tp["proj_w"], t_proj_b=tp["proj_b"],
        t_proj_ln_g=tp["proj_ln_g"], t_proj_ln_b=tp["proj_ln_b"],
        t_emb_g=tp["emb_ln_g"], t_emb_b=tp["emb_ln_b"],
        t_qkv_w=t_qkv_w, t_qkv_b=t_qkv_b,
        t_wo=stack_attn(tp["layers"], "wo"), t_bo=stack_attn(tp["layers"], "bo"),
        t_attn_ln_g=stack(tp["layers"], "attn_ln_g"),
        t_attn_ln_b=stack(tp["layers"], "attn_ln_b"),
        t_inter_w=stack(tp["layers"], "inter_w"),
        t_inter_b=stack(tp["layers"], "inter_b"),
        t_out_w=stack(tp["layers"], "out_w"), t_out_b=stack(tp["layers"], "out_b"),
        t_out_ln_g=stack(tp["layers"], "out_ln_g"),
        t_out_ln_b=stack(tp["layers"], "out_ln_b"),
        t_lm_w=lm_w, t_lm_b=lm_b,
    )
    return dict(word_emb=tp["word_emb"], pos_emb=tp["pos_emb"],
                v_pos=v_pos, kern=kern)


# ------------------------------------ main ------------------------------------
if __name__ == "__main__":
    key = jax.random.PRNGKey(0)
    kp, kx, ki = jax.random.split(key, 3)
    params = init_params(kp)
    packed = pack_params(params)

    pixel_values = jax.random.normal(kx, (B, C, IMG, IMG), jnp.float32)  # NCHW
    input_ids = jax.random.randint(ki, (B, TSEQ), 0, VOCAB)

    logits = jax.jit(git_forward)(packed, pixel_values, input_ids)
    jax.block_until_ready(logits)
    assert logits.shape == (B, SV_REAL + TSEQ, VOCAB)
    assert bool(jnp.all(jnp.isfinite(logits)))
    print("KERNEL_OK")
</pallas_src>

<mosaic_0001>
module attributes {stable_mosaic.version = 11 : i64} {
  func.func @kernel(%arg0: memref<16x192xf32, #tpu.memory_space<vmem>>, %arg1: memref<16x32xf32, #tpu.memory_space<vmem>>, %arg2: memref<16x32xf32, #tpu.memory_space<vmem>>, %arg3: memref<1x8xf32, #tpu.memory_space<vmem>>, %arg4: memref<16x16xf32, #tpu.memory_space<vmem>>, %arg5: memref<2x1x32xf32, #tpu.memory_space<vmem>>, %arg6: memref<2x1x32xf32, #tpu.memory_space<vmem>>, %arg7: memref<2x1x32xf32, #tpu.memory_space<vmem>>, %arg8: memref<1x32xf32, #tpu.memory_space<vmem>>, %arg9: memref<1x32xf32, #tpu.memory_space<vmem>>, %arg10: memref<2x1x64xf32, #tpu.memory_space<vmem>>, %arg11: memref<2x32x64xf32, #tpu.memory_space<vmem>>, %arg12: memref<1x128xf32, #tpu.memory_space<vmem>>, %arg13: memref<32x128xf32, #tpu.memory_space<vmem>>, %arg14: memref<2x1x32xf32, #tpu.memory_space<vmem>>, %arg15: memref<2x1x32xf32, #tpu.memory_space<vmem>>, %arg16: memref<2x1x32xf32, #tpu.memory_space<vmem>>, %arg17: memref<2x64x32xf32, #tpu.memory_space<vmem>>, %arg18: memref<1x32xf32, #tpu.memory_space<vmem>>, %arg19: memref<1x32xf32, #tpu.memory_space<vmem>>, %arg20: memref<1x32xf32, #tpu.memory_space<vmem>>, %arg21: memref<32x32xf32, #tpu.memory_space<vmem>>, %arg22: memref<2x1x96xf32, #tpu.memory_space<vmem>>, %arg23: memref<2x32x96xf32, #tpu.memory_space<vmem>>, %arg24: memref<2x32x32xf32, #tpu.memory_space<vmem>>, %arg25: memref<2x1x32xf32, #tpu.memory_space<vmem>>, %arg26: memref<2x1x64xf32, #tpu.memory_space<vmem>>, %arg27: memref<2x32x64xf32, #tpu.memory_space<vmem>>, %arg28: memref<2x1x32xf32, #tpu.memory_space<vmem>>, %arg29: memref<2x64x32xf32, #tpu.memory_space<vmem>>, %arg30: memref<2x1x32xf32, #tpu.memory_space<vmem>>, %arg31: memref<2x1x32xf32, #tpu.memory_space<vmem>>, %arg32: memref<2x1x32xf32, #tpu.memory_space<vmem>>, %arg33: memref<2x1x32xf32, #tpu.memory_space<vmem>>, %arg34: memref<192x32xf32, #tpu.memory_space<vmem>>, %arg35: memref<1x32xf32, #tpu.memory_space<vmem>>, %arg36: memref<1x32xf32, #tpu.memory_space<vmem>>, %arg37: memref<1x32xf32, #tpu.memory_space<vmem>>, %arg38: memref<1x32xf32, #tpu.memory_space<vmem>>, %arg39: memref<2x1x96xf32, #tpu.memory_space<vmem>>, %arg40: memref<2x32x96xf32, #tpu.memory_space<vmem>>, %arg41: memref<2x32x32xf32, #tpu.memory_space<vmem>>, %arg42: memref<32x128xf32, #tpu.memory_space<vmem>>) attributes {dimension_semantics = [], scalar_prefetch = 0 : i64, scratch_operands = 0 : i64, tpu.core_type = #tpu.core_type<tc>} {
    %c0 = arith.constant 0 : index
    %c0_0 = arith.constant 0 : index
    %0 = vector.load %arg0[%c0, %c0_0] : memref<16x192xf32, #tpu.memory_space<vmem>>, vector<16x192xf32>
    %c0_1 = arith.constant 0 : index
    %c0_2 = arith.constant 0 : index
    %1 = vector.load %arg34[%c0_1, %c0_2] : memref<192x32xf32, #tpu.memory_space<vmem>>, vector<192x32xf32>
    %cst = arith.constant dense<0.000000e+00> : vector<16x32xf32>
    %2 = tpu.matmul %0, %1, %cst {dimension_numbers = #tpu.dot_dimension_numbers<[1], [0], [0], [1], [0, 0, 1, 1], [], []>} : vector<16x192xf32>, vector<192x32xf32>, vector<16x32xf32> -> vector<16x32xf32>
    %c0_3 = arith.constant 0 : index
    %c0_4 = arith.constant 0 : index
    %3 = vector.load %arg1[%c0_3, %c0_4] : memref<16x32xf32, #tpu.memory_space<vmem>>, vector<16x32xf32>
    %4 = arith.addf %2, %3 : vector<16x32xf32>
    %c0_5 = arith.constant 0 : index
    %c0_6 = arith.constant 0 : index
    %5 = vector.load %arg38[%c0_5, %c0_6] : memref<1x32xf32, #tpu.memory_space<vmem>>, vector<1x32xf32>
    %c0_7 = arith.constant 0 : index
    %c0_8 = arith.constant 0 : index
    %6 = vector.load %arg37[%c0_7, %c0_8] : memref<1x32xf32, #tpu.memory_space<vmem>>, vector<1x32xf32>
    %cst_9 = arith.constant dense<0.000000e+00> : vector<16xf32>
    %7 = vector.multi_reduction <add>, %4, %cst_9 [1] : vector<16x32xf32> to vector<16xf32>
    %8 = vector.shape_cast %7 : vector<16xf32> to vector<16x1xf32>
    %cst_10 = arith.constant 3.200000e+01 : f32
    %9 = vector.broadcast %cst_10 : f32 to vector<16x1xf32>
    %10 = arith.divf %8, %9 : vector<16x1xf32>
    %11 = vector.broadcast %10 : vector<16x1xf32> to vector<16x32xf32>
    %12 = arith.subf %4, %11 : vector<16x32xf32>
    %13 = arith.mulf %12, %12 : vector<16x32xf32>
    %cst_11 = arith.constant dense<0.000000e+00> : vector<16xf32>
    %14 = vector.multi_reduction <add>, %13, %cst_11 [1] : vector<16x32xf32> to vector<16xf32>
    %15 = vector.shape_cast %14 : vector<16xf32> to vector<16x1xf32>
    %cst_12 = arith.constant 3.200000e+01 : f32
    %16 = vector.broadcast %cst_12 : f32 to vector<16x1xf32>
    %17 = arith.divf %15, %16 : vector<16x1xf32>
    %18 = vector.broadcast %10 : vector<16x1xf32> to vector<16x32xf32>
    %19 = arith.subf %4, %18 : vector<16x32xf32>
    %cst_13 = arith.constant 9.99999974E-6 : f32
    %20 = vector.broadcast %cst_13 : f32 to vector<16x1xf32>
    %21 = arith.addf %17, %20 : vector<16x1xf32>
    %22 = math.rsqrt %21 : vector<16x1xf32>
    %23 = vector.broadcast %22 : vector<16x1xf32> to vector<16x32xf32>
    %24 = arith.mulf %19, %23 : vector<16x32xf32>
    %25 = vector.broadcast %5 : vector<1x32xf32> to vector<16x32xf32>
    %26 = arith.mulf %24, %25 : vector<16x32xf32>
    %27 = vector.broadcast %6 : vector<1x32xf32> to vector<16x32xf32>
    %28 = arith.addf %26, %27 : vector<16x32xf32>
    %c0_14 = arith.constant 0 : index
    %c0_15 = arith.constant 0 : index
    %29 = vector.load %arg3[%c0_14, %c0_15] : memref<1x8xf32, #tpu.memory_space<vmem>>, vector<1x8xf32>
    %c0_16 = arith.constant 0 : index
    %c0_17 = arith.constant 0 : index
    %c0_18 = arith.constant 0 : index
    %30 = vector.load %arg31[%c0_16, %c0_17, %c0_18] : memref<2x1x32xf32, #tpu.memory_space<vmem>>, vector<1x1x32xf32>
    %31 = vector.shape_cast %30 : vector<1x1x32xf32> to vector<1x32xf32>
    %c0_19 = arith.constant 0 : index
    %c0_20 = arith.constant 0 : index
    %c0_21 = arith.constant 0 : index
    %32 = vector.load %arg30[%c0_19, %c0_20, %c0_21] : memref<2x1x32xf32, #tpu.memory_space<vmem>>, vector<1x1x32xf32>
    %33 = vector.shape_cast %32 : vector<1x1x32xf32> to vector<1x32xf32>
    %cst_22 = arith.constant dense<0.000000e+00> : vector<16xf32>
    %34 = vector.multi_reduction <add>, %28, %cst_22 [1] : vector<16x32xf32> to vector<16xf32>
    %35 = vector.shape_cast %34 : vector<16xf32> to vector<16x1xf32>
    %cst_23 = arith.constant 3.200000e+01 : f32
    %36 = vector.broadcast %cst_23 : f32 to vector<16x1xf32>
    %37 = arith.divf %35, %36 : vector<16x1xf32>
    %38 = vector.broadcast %37 : vector<16x1xf32> to vector<16x32xf32>
    %39 = arith.subf %28, %38 : vector<16x32xf32>
    %40 = arith.mulf %39, %39 : vector<16x32xf32>
    %cst_24 = arith.constant dense<0.000000e+00> : vector<16xf32>
    %41 = vector.multi_reduction <add>, %40, %cst_24 [1] : vector<16x32xf32> to vector<16xf32>
    %42 = vector.shape_cast %41 : vector<16xf32> to vector<16x1xf32>
    %cst_25 = arith.constant 3.200000e+01 : f32
    %43 = vector.broadcast %cst_25 : f32 to vector<16x1xf32>
    %44 = arith.divf %42, %43 : vector<16x1xf32>
    %45 = vector.broadcast %37 : vector<16x1xf32> to vector<16x32xf32>
    %46 = arith.subf %28, %45 : vector<16x32xf32>
    %cst_26 = arith.constant 9.99999974E-6 : f32
    %47 = vector.broadcast %cst_26 : f32 to vector<16x1xf32>
    %48 = arith.addf %44, %47 : vector<16x1xf32>
    %49 = math.rsqrt %48 : vector<16x1xf32>
    %50 = vector.broadcast %49 : vector<16x1xf32> to vector<16x32xf32>
    %51 = arith.mulf %46, %50 : vector<16x32xf32>
    %52 = vector.broadcast %31 : vector<1x32xf32> to vector<16x32xf32>
    %53 = arith.mulf %51, %52 : vector<16x32xf32>
    %54 = vector.broadcast %33 : vector<1x32xf32> to vector<16x32xf32>
    %55 = arith.addf %53, %54 : vector<16x32xf32>
    %c0_27 = arith.constant 0 : index
    %c0_28 = arith.constant 0 : index
    %c0_29 = arith.constant 0 : index
    %56 = vector.load %arg40[%c0_27, %c0_28, %c0_29] : memref<2x32x96xf32, #tpu.memory_space<vmem>>, vector<1x32x96xf32>
    %57 = vector.shape_cast %56 : vector<1x32x96xf32> to vector<32x96xf32>
    %cst_30 = arith.constant dense<0.000000e+00> : vector<16x96xf32>
    %58 = tpu.matmul %55, %57, %cst_30 {dimension_numbers = #tpu.dot_dimension_numbers<[1], [0], [0], [1], [0, 0, 1, 1], [], []>} : vector<16x32xf32>, vector<32x96xf32>, vector<16x96xf32> -> vector<16x96xf32>
    %c0_31 = arith.constant 0 : index
    %c0_32 = arith.constant 0 : index
    %c0_33 = arith.constant 0 : index
    %59 = vector.load %arg39[%c0_31, %c0_32, %c0_33] : memref<2x1x96xf32, #tpu.memory_space<vmem>>, vector<1x1x96xf32>
    %60 = vector.shape_cast %59 : vector<1x1x96xf32> to vector<1x96xf32>
    %61 = vector.broadcast %60 : vector<1x96xf32> to vector<16x96xf32>
    %62 = arith.addf %58, %61 : vector<16x96xf32>
    %63 = vector.extract_strided_slice %62 {offsets = [0, 0], sizes = [8, 16], strides = [1, 1]} : vector<16x96xf32> to vector<8x16xf32>
    %64 = vector.extract_strided_slice %62 {offsets = [0, 32], sizes = [8, 16], strides = [1, 1]} : vector<16x96xf32> to vector<8x16xf32>
    %65 = vector.extract_strided_slice %62 {offsets = [0, 64], sizes = [8, 16], strides = [1, 1]} : vector<16x96xf32> to vector<8x16xf32>
    %cst_34 = arith.constant dense<0.000000e+00> : vector<8x8xf32>
    %66 = tpu.matmul %63, %64, %cst_34 {dimension_numbers = #tpu.dot_dimension_numbers<[1], [1], [0], [0], [0, 0, 1, 0], [], []>} : vector<8x16xf32>, vector<8x16xf32>, vector<8x8xf32> -> vector<8x8xf32>
    %67 = vector.broadcast %29 : vector<1x8xf32> to vector<8x8xf32>
    %68 = arith.addf %66, %67 : vector<8x8xf32>
    %cst_35 = arith.constant dense<0xFF800000> : vector<8xf32>
    %69 = vector.multi_reduction <maximumf>, %68, %cst_35 [1] : vector<8x8xf32> to vector<8xf32>
    %70 = vector.shape_cast %69 : vector<8xf32> to vector<8x1xf32>
    %71 = vector.broadcast %70 : vector<8x1xf32> to vector<8x8xf32>
    %72 = arith.subf %68, %71 : vector<8x8xf32>
    %73 = math.exp %72 : vector<8x8xf32>
    %cst_36 = arith.constant dense<0.000000e+00> : vector<8xf32>
    %74 = vector.multi_reduction <add>, %73, %cst_36 [1] : vector<8x8xf32> to vector<8xf32>
    %75 = vector.shape_cast %74 : vector<8xf32> to vector<8x1xf32>
    %76 = tpu.reciprocal %75 {approx = true} : vector<8x1xf32> -> vector<8x1xf32>
    %77 = vector.broadcast %76 : vector<8x1xf32> to vector<8x8xf32>
    %78 = arith.mulf %73, %77 : vector<8x8xf32>
    %cst_37 = arith.constant dense<0.000000e+00> : vector<8x16xf32>
    %79 = tpu.matmul %78, %65, %cst_37 {dimension_numbers = #tpu.dot_dimension_numbers<[1], [0], [0], [1], [0, 0, 1, 1], [], []>} : vector<8x8xf32>, vector<8x16xf32>, vector<8x16xf32> -> vector<8x16xf32>
    %80 = vector.extract_strided_slice %62 {offsets = [0, 16], sizes = [8, 16], strides = [1, 1]} : vector<16x96xf32> to vector<8x16xf32>
    %81 = vector.extract_strided_slice %62 {offsets = [0, 48], sizes = [8, 16], strides = [1, 1]} : vector<16x96xf32> to vector<8x16xf32>
    %82 = vector.extract_strided_slice %62 {offsets = [0, 80], sizes = [8, 16], strides = [1, 1]} : vector<16x96xf32> to vector<8x16xf32>
    %cst_38 = arith.constant dense<0.000000e+00> : vector<8x8xf32>
    %83 = tpu.matmul %80, %81, %cst_38 {dimension_numbers = #tpu.dot_dimension_numbers<[1], [1], [0], [0], [0, 0, 1, 0], [], []>} : vector<8x16xf32>, vector<8x16xf32>, vector<8x8xf32> -> vector<8x8xf32>
    %84 = vector.broadcast %29 : vector<1x8xf32> to vector<8x8xf32>
    %85 = arith.addf %83, %84 : vector<8x8xf32>
    %cst_39 = arith.constant dense<0xFF800000> : vector<8xf32>
    %86 = vector.multi_reduction <maximumf>, %85, %cst_39 [1] : vector<8x8xf32> to vector<8xf32>
    %87 = vector.shape_cast %86 : vector<8xf32> to vector<8x1xf32>
    %88 = vector.broadcast %87 : vector<8x1xf32> to vector<8x8xf32>
    %89 = arith.subf %85, %88 : vector<8x8xf32>
    %90 = math.exp %89 : vector<8x8xf32>
    %cst_40 = arith.constant dense<0.000000e+00> : vector<8xf32>
    %91 = vector.multi_reduction <add>, %90, %cst_40 [1] : vector<8x8xf32> to vector<8xf32>
    %92 = vector.shape_cast %91 : vector<8xf32> to vector<8x1xf32>
    %93 = tpu.reciprocal %92 {approx = true} : vector<8x1xf32> -> vector<8x1xf32>
    %94 = vector.broadcast %93 : vector<8x1xf32> to vector<8x8xf32>
    %95 = arith.mulf %90, %94 : vector<8x8xf32>
    %cst_41 = arith.constant dense<0.000000e+00> : vector<8x16xf32>
    %96 = tpu.matmul %95, %82, %cst_41 {dimension_numbers = #tpu.dot_dimension_numbers<[1], [0], [0], [1], [0, 0, 1, 1], [], []>} : vector<8x8xf32>, vector<8x16xf32>, vector<8x16xf32> -> vector<8x16xf32>
    %97 = tpu.concatenate %79, %96 in 1 : vector<8x16xf32>, vector<8x16xf32> -> vector<8x32xf32>
    %98 = vector.extract_strided_slice %62 {offsets = [8, 0], sizes = [8, 16], strides = [1, 1]} : vector<16x96xf32> to vector<8x16xf32>
    %99 = vector.extract_strided_slice %62 {offsets = [8, 32], sizes = [8, 16], strides = [1, 1]} : vector<16x96xf32> to vector<8x16xf32>
    %100 = vector.extract_strided_slice %62 {offsets = [8, 64], sizes = [8, 16], strides = [1, 1]} : vector<16x96xf32> to vector<8x16xf32>
    %cst_42 = arith.constant dense<0.000000e+00> : vector<8x8xf32>
    %101 = tpu.matmul %98, %99, %cst_42 {dimension_numbers = #tpu.dot_dimension_numbers<[1], [1], [0], [0], [0, 0, 1, 0], [], []>} : vector<8x16xf32>, vector<8x16xf32>, vector<8x8xf32> -> vector<8x8xf32>
    %102 = vector.broadcast %29 : vector<1x8xf32> to vector<8x8xf32>
    %103 = arith.addf %101, %102 : vector<8x8xf32>
    %cst_43 = arith.constant dense<0xFF800000> : vector<8xf32>
    %104 = vector.multi_reduction <maximumf>, %103, %cst_43 [1] : vector<8x8xf32> to vector<8xf32>
    %105 = vector.shape_cast %104 : vector<8xf32> to vector<8x1xf32>
    %106 = vector.broadcast %105 : vector<8x1xf32> to vector<8x8xf32>
    %107 = arith.subf %103, %106 : vector<8x8xf32>
    %108 = math.exp %107 : vector<8x8xf32>
    %cst_44 = arith.constant dense<0.000000e+00> : vector<8xf32>
    %109 = vector.multi_reduction <add>, %108, %cst_44 [1] : vector<8x8xf32> to vector<8xf32>
    %110 = vector.shape_cast %109 : vector<8xf32> to vector<8x1xf32>
    %111 = tpu.reciprocal %110 {approx = true} : vector<8x1xf32> -> vector<8x1xf32>
    %112 = vector.broadcast %111 : vector<8x1xf32> to vector<8x8xf32>
    %113 = arith.mulf %108, %112 : vector<8x8xf32>
    %cst_45 = arith.constant dense<0.000000e+00> : vector<8x16xf32>
    %114 = tpu.matmul %113, %100, %cst_45 {dimension_numbers = #tpu.dot_dimension_numbers<[1], [0], [0], [1], [0, 0, 1, 1], [], []>} : vector<8x8xf32>, vector<8x16xf32>, vector<8x16xf32> -> vector<8x16xf32>
    %115 = vector.extract_strided_slice %62 {offsets = [8, 16], sizes = [8, 16], strides = [1, 1]} : vector<16x96xf32> to vector<8x16xf32>
    %116 = vector.extract_strided_slice %62 {offsets = [8, 48], sizes = [8, 16], strides = [1, 1]} : vector<16x96xf32> to vector<8x16xf32>
    %117 = vector.extract_strided_slice %62 {offsets = [8, 80], sizes = [8, 16], strides = [1, 1]} : vector<16x96xf32> to vector<8x16xf32>
    %cst_46 = arith.constant dense<0.000000e+00> : vector<8x8xf32>
    %118 = tpu.matmul %115, %116, %cst_46 {dimension_numbers = #tpu.dot_dimension_numbers<[1], [1], [0], [0], [0, 0, 1, 0], [], []>} : vector<8x16xf32>, vector<8x16xf32>, vector<8x8xf32> -> vector<8x8xf32>
    %119 = vector.broadcast %29 : vector<1x8xf32> to vector<8x8xf32>
    %120 = arith.addf %118, %119 : vector<8x8xf32>
    %cst_47 = arith.constant dense<0xFF800000> : vector<8xf32>
    %121 = vector.multi_reduction <maximumf>, %120, %cst_47 [1] : vector<8x8xf32> to vector<8xf32>
    %122 = vector.shape_cast %121 : vector<8xf32> to vector<8x1xf32>
    %123 = vector.broadcast %122 : vector<8x1xf32> to vector<8x8xf32>
    %124 = arith.subf %120, %123 : vector<8x8xf32>
    %125 = math.exp %124 : vector<8x8xf32>
    %cst_48 = arith.constant dense<0.000000e+00> : vector<8xf32>
    %126 = vector.multi_reduction <add>, %125, %cst_48 [1] : vector<8x8xf32> to vector<8xf32>
    %127 = vector.shape_cast %126 : vector<8xf32> to vector<8x1xf32>
    %128 = tpu.reciprocal %127 {approx = true} : vector<8x1xf32> -> vector<8x1xf32>
    %129 = vector.broadcast %128 : vector<8x1xf32> to vector<8x8xf32>
    %130 = arith.mulf %125, %129 : vector<8x8xf32>
    %cst_49 = arith.constant dense<0.000000e+00> : vector<8x16xf32>
    %131 = tpu.matmul %130, %117, %cst_49 {dimension_numbers = #tpu.dot_dimension_numbers<[1], [0], [0], [1], [0, 0, 1, 1], [], []>} : vector<8x8xf32>, vector<8x16xf32>, vector<8x16xf32> -> vector<8x16xf32>
    %132 = tpu.concatenate %114, %131 in 1 : vector<8x16xf32>, vector<8x16xf32> -> vector<8x32xf32>
    %133 = tpu.concatenate %97, %132 in 0 : vector<8x32xf32>, vector<8x32xf32> -> vector<16x32xf32>
    %c0_50 = arith.constant 0 : index
    %c0_51 = arith.constant 0 : index
    %c0_52 = arith.constant 0 : index
    %134 = vector.load %arg41[%c0_50, %c0_51, %c0_52] : memref<2x32x32xf32, #tpu.memory_space<vmem>>, vector<1x32x32xf32>
    %135 = vector.shape_cast %134 : vector<1x32x32xf32> to vector<32x32xf32>
    %cst_53 = arith.constant dense<0.000000e+00> : vector<16x32xf32>
    %136 = tpu.matmul %133, %135, %cst_53 {dimension_numbers = #tpu.dot_dimension_numbers<[1], [0], [0], [1], [0, 0, 1, 1], [], []>} : vector<16x32xf32>, vector<32x32xf32>, vector<16x32xf32> -> vector<16x32xf32>
    %c0_54 = arith.constant 0 : index
    %c0_55 = arith.constant 0 : index
    %c0_56 = arith.constant 0 : index
    %137 = vector.load %arg25[%c0_54, %c0_55, %c0_56] : memref<2x1x32xf32, #tpu.memory_space<vmem>>, vector<1x1x32xf32>
    %138 = vector.shape_cast %137 : vector<1x1x32xf32> to vector<1x32xf32>
    %139 = vector.broadcast %138 : vector<1x32xf32> to vector<16x32xf32>
    %140 = arith.addf %136, %139 : vector<16x32xf32>
    %141 = arith.addf %28, %140 : vector<16x32xf32>
    %c0_57 = arith.constant 0 : index
    %c0_58 = arith.constant 0 : index
    %c0_59 = arith.constant 0 : index
    %142 = vector.load %arg33[%c0_57, %c0_58, %c0_59] : memref<2x1x32xf32, #tpu.memory_space<vmem>>, vector<1x1x32xf32>
    %143 = vector.shape_cast %142 : vector<1x1x32xf32> to vector<1x32xf32>
    %c0_60 = arith.constant 0 : index
    %c0_61 = arith.constant 0 : index
    %c0_62 = arith.constant 0 : index
    %144 = vector.load %arg32[%c0_60, %c0_61, %c0_62] : memref<2x1x32xf32, #tpu.memory_space<vmem>>, vector<1x1x32xf32>
    %145 = vector.shape_cast %144 : vector<1x1x32xf32> to vector<1x32xf32>
    %cst_63 = arith.constant dense<0.000000e+00> : vector<16xf32>
    %146 = vector.multi_reduction <add>, %141, %cst_63 [1] : vector<16x32xf32> to vector<16xf32>
    %147 = vector.shape_cast %146 : vector<16xf32> to vector<16x1xf32>
    %cst_64 = arith.constant 3.200000e+01 : f32
    %148 = vector.broadcast %cst_64 : f32 to vector<16x1xf32>
    %149 = arith.divf %147, %148 : vector<16x1xf32>
    %150 = vector.broadcast %149 : vector<16x1xf32> to vector<16x32xf32>
    %151 = arith.subf %141, %150 : vector<16x32xf32>
    %152 = arith.mulf %151, %151 : vector<16x32xf32>
    %cst_65 = arith.constant dense<0.000000e+00> : vector<16xf32>
    %153 = vector.multi_reduction <add>, %152, %cst_65 [1] : vector<16x32xf32> to vector<16xf32>
    %154 = vector.shape_cast %153 : vector<16xf32> to vector<16x1xf32>
    %cst_66 = arith.constant 3.200000e+01 : f32
    %155 = vector.broadcast %cst_66 : f32 to vector<16x1xf32>
    %156 = arith.divf %154, %155 : vector<16x1xf32>
    %157 = vector.broadcast %149 : vector<16x1xf32> to vector<16x32xf32>
    %158 = arith.subf %141, %157 : vector<16x32xf32>
    %cst_67 = arith.constant 9.99999974E-6 : f32
    %159 = vector.broadcast %cst_67 : f32 to vector<16x1xf32>
    %160 = arith.addf %156, %159 : vector<16x1xf32>
    %161 = math.rsqrt %160 : vector<16x1xf32>
    %162 = vector.broadcast %161 : vector<16x1xf32> to vector<16x32xf32>
    %163 = arith.mulf %158, %162 : vector<16x32xf32>
    %164 = vector.broadcast %143 : vector<1x32xf32> to vector<16x32xf32>
    %165 = arith.mulf %163, %164 : vector<16x32xf32>
    %166 = vector.broadcast %145 : vector<1x32xf32> to vector<16x32xf32>
    %167 = arith.addf %165, %166 : vector<16x32xf32>
    %c0_68 = arith.constant 0 : index
    %c0_69 = arith.constant 0 : index
    %c0_70 = arith.constant 0 : index
    %168 = vector.load %arg27[%c0_68, %c0_69, %c0_70] : memref<2x32x64xf32, #tpu.memory_space<vmem>>, vector<1x32x64xf32>
    %169 = vector.shape_cast %168 : vector<1x32x64xf32> to vector<32x64xf32>
    %cst_71 = arith.constant dense<0.000000e+00> : vector<16x64xf32>
    %170 = tpu.matmul %167, %169, %cst_71 {dimension_numbers = #tpu.dot_dimension_numbers<[1], [0], [0], [1], [0, 0, 1, 1], [], []>} : vector<16x32xf32>, vector<32x64xf32>, vector<16x64xf32> -> vector<16x64xf32>
    %c0_72 = arith.constant 0 : index
    %c0_73 = arith.constant 0 : index
    %c0_74 = arith.constant 0 : index
    %171 = vector.load %arg26[%c0_72, %c0_73, %c0_74] : memref<2x1x64xf32, #tpu.memory_space<vmem>>, vector<1x1x64xf32>
    %172 = vector.shape_cast %171 : vector<1x1x64xf32> to vector<1x64xf32>
    %173 = vector.broadcast %172 : vector<1x64xf32> to vector<16x64xf32>
    %174 = arith.addf %170, %173 : vector<16x64xf32>
    %cst_75 = arith.constant 1.702000e+00 : f32
    %175 = vector.broadcast %cst_75 : f32 to vector<16x64xf32>
    %176 = arith.mulf %175, %174 : vector<16x64xf32>
    %177 = arith.negf %176 : vector<16x64xf32>
    %178 = math.exp %177 : vector<16x64xf32>
    %cst_76 = arith.constant 1.000000e+00 : f32
    %179 = vector.broadcast %cst_76 : f32 to vector<16x64xf32>
    %180 = arith.addf %179, %178 : vector<16x64xf32>
    %181 = arith.divf %179, %180 : vector<16x64xf32>
    %182 = arith.mulf %174, %181 : vector<16x64xf32>
    %c0_77 = arith.constant 0 : index
    %c0_78 = arith.constant 0 : index
    %c0_79 = arith.constant 0 : index
    %183 = vector.load %arg29[%c0_77, %c0_78, %c0_79] : memref<2x64x32xf32, #tpu.memory_space<vmem>>, vector<1x64x32xf32>
    %184 = vector.shape_cast %183 : vector<1x64x32xf32> to vector<64x32xf32>
    %cst_80 = arith.constant dense<0.000000e+00> : vector<16x32xf32>
    %185 = tpu.matmul %182, %184, %cst_80 {dimension_numbers = #tpu.dot_dimension_numbers<[1], [0], [0], [1], [0, 0, 1, 1], [], []>} : vector<16x64xf32>, vector<64x32xf32>, vector<16x32xf32> -> vector<16x32xf32>
    %c0_81 = arith.constant 0 : index
    %c0_82 = arith.constant 0 : index
    %c0_83 = arith.constant 0 : index
    %186 = vector.load %arg28[%c0_81, %c0_82, %c0_83] : memref<2x1x32xf32, #tpu.memory_space<vmem>>, vector<1x1x32xf32>
    %187 = vector.shape_cast %186 : vector<1x1x32xf32> to vector<1x32xf32>
    %188 = vector.broadcast %187 : vector<1x32xf32> to vector<16x32xf32>
    %189 = arith.addf %185, %188 : vector<16x32xf32>
    %190 = arith.addf %141, %189 : vector<16x32xf32>
    %c1 = arith.constant 1 : index
    %c0_84 = arith.constant 0 : index
    %c0_85 = arith.constant 0 : index
    %191 = vector.load %arg31[%c1, %c0_84, %c0_85] : memref<2x1x32xf32, #tpu.memory_space<vmem>>, vector<1x1x32xf32>
    %192 = vector.shape_cast %191 : vector<1x1x32xf32> to vector<1x32xf32>
    %c1_86 = arith.constant 1 : index
    %c0_87 = arith.constant 0 : index
    %c0_88 = arith.constant 0 : index
    %193 = vector.load %arg30[%c1_86, %c0_87, %c0_88] : memref<2x1x32xf32, #tpu.memory_space<vmem>>, vector<1x1x32xf32>
    %194 = vector.shape_cast %193 : vector<1x1x32xf32> to vector<1x32xf32>
    %cst_89 = arith.constant dense<0.000000e+00> : vector<16xf32>
    %195 = vector.multi_reduction <add>, %190, %cst_89 [1] : vector<16x32xf32> to vector<16xf32>
    %196 = vector.shape_cast %195 : vector<16xf32> to vector<16x1xf32>
    %cst_90 = arith.constant 3.200000e+01 : f32
    %197 = vector.broadcast %cst_90 : f32 to vector<16x1xf32>
    %198 = arith.divf %196, %197 : vector<16x1xf32>
    %199 = vector.broadcast %198 : vector<16x1xf32> to vector<16x32xf32>
    %200 = arith.subf %190, %199 : vector<16x32xf32>
    %201 = arith.mulf %200, %200 : vector<16x32xf32>
    %cst_91 = arith.constant dense<0.000000e+00> : vector<16xf32>
    %202 = vector.multi_reduction <add>, %201, %cst_91 [1] : vector<16x32xf32> to vector<16xf32>
    %203 = vector.shape_cast %202 : vector<16xf32> to vector<16x1xf32>
    %cst_92 = arith.constant 3.200000e+01 : f32
    %204 = vector.broadcast %cst_92 : f32 to vector<16x1xf32>
    %205 = arith.divf %203, %204 : vector<16x1xf32>
    %206 = vector.broadcast %198 : vector<16x1xf32> to vector<16x32xf32>
    %207 = arith.subf %190, %206 : vector<16x32xf32>
    %cst_93 = arith.constant 9.99999974E-6 : f32
    %208 = vector.broadcast %cst_93 : f32 to vector<16x1xf32>
    %209 = arith.addf %205, %208 : vector<16x1xf32>
    %210 = math.rsqrt %209 : vector<16x1xf32>
    %211 = vector.broadcast %210 : vector<16x1xf32> to vector<16x32xf32>
    %212 = arith.mulf %207, %211 : vector<16x32xf32>
    %213 = vector.broadcast %192 : vector<1x32xf32> to vector<16x32xf32>
    %214 = arith.mulf %212, %213 : vector<16x32xf32>
    %215 = vector.broadcast %194 : vector<1x32xf32> to vector<16x32xf32>
    %216 = arith.addf %214, %215 : vector<16x32xf32>
    %c1_94 = arith.constant 1 : index
    %c0_95 = arith.constant 0 : index
    %c0_96 = arith.constant 0 : index
    %217 = vector.load %arg40[%c1_94, %c0_95, %c0_96] : memref<2x32x96xf32, #tpu.memory_space<vmem>>, vector<1x32x96xf32>
    %218 = vector.shape_cast %217 : vector<1x32x96xf32> to vector<32x96xf32>
    %cst_97 = arith.constant dense<0.000000e+00> : vector<16x96xf32>
    %219 = tpu.matmul %216, %218, %cst_97 {dimension_numbers = #tpu.dot_dimension_numbers<[1], [0], [0], [1], [0, 0, 1, 1], [], []>} : vector<16x32xf32>, vector<32x96xf32>, vector<16x96xf32> -> vector<16x96xf32>
    %c1_98 = arith.constant 1 : index
    %c0_99 = arith.constant 0 : index
    %c0_100 = arith.constant 0 : index
    %220 = vector.load %arg39[%c1_98, %c0_99, %c0_100] : memref<2x1x96xf32, #tpu.memory_space<vmem>>, vector<1x1x96xf32>
    %221 = vector.shape_cast %220 : vector<1x1x96xf32> to vector<1x96xf32>
    %222 = vector.broadcast %221 : vector<1x96xf32> to vector<16x96xf32>
    %223 = arith.addf %219, %222 : vector<16x96xf32>
    %224 = vector.extract_strided_slice %223 {offsets = [0, 0], sizes = [8, 16], strides = [1, 1]} : vector<16x96xf32> to vector<8x16xf32>
    %225 = vector.extract_strided_slice %223 {offsets = [0, 32], sizes = [8, 16], strides = [1, 1]} : vector<16x96xf32> to vector<8x16xf32>
    %226 = vector.extract_strided_slice %223 {offsets = [0, 64], sizes = [8, 16], strides = [1, 1]} : vector<16x96xf32> to vector<8x16xf32>
    %cst_101 = arith.constant dense<0.000000e+00> : vector<8x8xf32>
    %227 = tpu.matmul %224, %225, %cst_101 {dimension_numbers = #tpu.dot_dimension_numbers<[1], [1], [0], [0], [0, 0, 1, 0], [], []>} : vector<8x16xf32>, vector<8x16xf32>, vector<8x8xf32> -> vector<8x8xf32>
    %228 = vector.broadcast %29 : vector<1x8xf32> to vector<8x8xf32>
    %229 = arith.addf %227, %228 : vector<8x8xf32>
    %cst_102 = arith.constant dense<0xFF800000> : vector<8xf32>
    %230 = vector.multi_reduction <maximumf>, %229, %cst_102 [1] : vector<8x8xf32> to vector<8xf32>
    %231 = vector.shape_cast %230 : vector<8xf32> to vector<8x1xf32>
    %232 = vector.broadcast %231 : vector<8x1xf32> to vector<8x8xf32>
    %233 = arith.subf %229, %232 : vector<8x8xf32>
    %234 = math.exp %233 : vector<8x8xf32>
    %cst_103 = arith.constant dense<0.000000e+00> : vector<8xf32>
    %235 = vector.multi_reduction <add>, %234, %cst_103 [1] : vector<8x8xf32> to vector<8xf32>
    %236 = vector.shape_cast %235 : vector<8xf32> to vector<8x1xf32>
    %237 = tpu.reciprocal %236 {approx = true} : vector<8x1xf32> -> vector<8x1xf32>
    %238 = vector.broadcast %237 : vector<8x1xf32> to vector<8x8xf32>
    %239 = arith.mulf %234, %238 : vector<8x8xf32>
    %cst_104 = arith.constant dense<0.000000e+00> : vector<8x16xf32>
    %240 = tpu.matmul %239, %226, %cst_104 {dimension_numbers = #tpu.dot_dimension_numbers<[1], [0], [0], [1], [0, 0, 1, 1], [], []>} : vector<8x8xf32>, vector<8x16xf32>, vector<8x16xf32> -> vector<8x16xf32>
    %241 = vector.extract_strided_slice %223 {offsets = [0, 16], sizes = [8, 16], strides = [1, 1]} : vector<16x96xf32> to vector<8x16xf32>
    %242 = vector.extract_strided_slice %223 {offsets = [0, 48], sizes = [8, 16], strides = [1, 1]} : vector<16x96xf32> to vector<8x16xf32>
    %243 = vector.extract_strided_slice %223 {offsets = [0, 80], sizes = [8, 16], strides = [1, 1]} : vector<16x96xf32> to vector<8x16xf32>
    %cst_105 = arith.constant dense<0.000000e+00> : vector<8x8xf32>
    %244 = tpu.matmul %241, %242, %cst_105 {dimension_numbers = #tpu.dot_dimension_numbers<[1], [1], [0], [0], [0, 0, 1, 0], [], []>} : vector<8x16xf32>, vector<8x16xf32>, vector<8x8xf32> -> vector<8x8xf32>
    %245 = vector.broadcast %29 : vector<1x8xf32> to vector<8x8xf32>
    %246 = arith.addf %244, %245 : vector<8x8xf32>
    %cst_106 = arith.constant dense<0xFF800000> : vector<8xf32>
    %247 = vector.multi_reduction <maximumf>, %246, %cst_106 [1] : vector<8x8xf32> to vector<8xf32>
    %248 = vector.shape_cast %247 : vector<8xf32> to vector<8x1xf32>
    %249 = vector.broadcast %248 : vector<8x1xf32> to vector<8x8xf32>
    %250 = arith.subf %246, %249 : vector<8x8xf32>
    %251 = math.exp %250 : vector<8x8xf32>
    %cst_107 = arith.constant dense<0.000000e+00> : vector<8xf32>
    %252 = vector.multi_reduction <add>, %251, %cst_107 [1] : vector<8x8xf32> to vector<8xf32>
    %253 = vector.shape_cast %252 : vector<8xf32> to vector<8x1xf32>
    %254 = tpu.reciprocal %253 {approx = true} : vector<8x1xf32> -> vector<8x1xf32>
    %255 = vector.broadcast %254 : vector<8x1xf32> to vector<8x8xf32>
    %256 = arith.mulf %251, %255 : vector<8x8xf32>
    %cst_108 = arith.constant dense<0.000000e+00> : vector<8x16xf32>
    %257 = tpu.matmul %256, %243, %cst_108 {dimension_numbers = #tpu.dot_dimension_numbers<[1], [0], [0], [1], [0, 0, 1, 1], [], []>} : vector<8x8xf32>, vector<8x16xf32>, vector<8x16xf32> -> vector<8x16xf32>
    %258 = tpu.concatenate %240, %257 in 1 : vector<8x16xf32>, vector<8x16xf32> -> vector<8x32xf32>
    %259 = vector.extract_strided_slice %223 {offsets = [8, 0], sizes = [8, 16], strides = [1, 1]} : vector<16x96xf32> to vector<8x16xf32>
    %260 = vector.extract_strided_slice %223 {offsets = [8, 32], sizes = [8, 16], strides = [1, 1]} : vector<16x96xf32> to vector<8x16xf32>
    %261 = vector.extract_strided_slice %223 {offsets = [8, 64], sizes = [8, 16], strides = [1, 1]} : vector<16x96xf32> to vector<8x16xf32>
    %cst_109 = arith.constant dense<0.000000e+00> : vector<8x8xf32>
    %262 = tpu.matmul %259, %260, %cst_109 {dimension_numbers = #tpu.dot_dimension_numbers<[1], [1], [0], [0], [0, 0, 1, 0], [], []>} : vector<8x16xf32>, vector<8x16xf32>, vector<8x8xf32> -> vector<8x8xf32>
    %263 = vector.broadcast %29 : vector<1x8xf32> to vector<8x8xf32>
    %264 = arith.addf %262, %263 : vector<8x8xf32>
    %cst_110 = arith.constant dense<0xFF800000> : vector<8xf32>
    %265 = vector.multi_reduction <maximumf>, %264, %cst_110 [1] : vector<8x8xf32> to vector<8xf32>
    %266 = vector.shape_cast %265 : vector<8xf32> to vector<8x1xf32>
    %267 = vector.broadcast %266 : vector<8x1xf32> to vector<8x8xf32>
    %268 = arith.subf %264, %267 : vector<8x8xf32>
    %269 = math.exp %268 : vector<8x8xf32>
    %cst_111 = arith.constant dense<0.000000e+00> : vector<8xf32>
    %270 = vector.multi_reduction <add>, %269, %cst_111 [1] : vector<8x8xf32> to vector<8xf32>
    %271 = vector.shape_cast %270 : vector<8xf32> to vector<8x1xf32>
    %272 = tpu.reciprocal %271 {approx = true} : vector<8x1xf32> -> vector<8x1xf32>
    %273 = vector.broadcast %272 : vector<8x1xf32> to vector<8x8xf32>
    %274 = arith.mulf %269, %273 : vector<8x8xf32>
    %cst_112 = arith.constant dense<0.000000e+00> : vector<8x16xf32>
    %275 = tpu.matmul %274, %261, %cst_112 {dimension_numbers = #tpu.dot_dimension_numbers<[1], [0], [0], [1], [0, 0, 1, 1], [], []>} : vector<8x8xf32>, vector<8x16xf32>, vector<8x16xf32> -> vector<8x16xf32>
    %276 = vector.extract_strided_slice %223 {offsets = [8, 16], sizes = [8, 16], strides = [1, 1]} : vector<16x96xf32> to vector<8x16xf32>
    %277 = vector.extract_strided_slice %223 {offsets = [8, 48], sizes = [8, 16], strides = [1, 1]} : vector<16x96xf32> to vector<8x16xf32>
    %278 = vector.extract_strided_slice %223 {offsets = [8, 80], sizes = [8, 16], strides = [1, 1]} : vector<16x96xf32> to vector<8x16xf32>
    %cst_113 = arith.constant dense<0.000000e+00> : vector<8x8xf32>
    %279 = tpu.matmul %276, %277, %cst_113 {dimension_numbers = #tpu.dot_dimension_numbers<[1], [1], [0], [0], [0, 0, 1, 0], [], []>} : vector<8x16xf32>, vector<8x16xf32>, vector<8x8xf32> -> vector<8x8xf32>
    %280 = vector.broadcast %29 : vector<1x8xf32> to vector<8x8xf32>
    %281 = arith.addf %279, %280 : vector<8x8xf32>
    %cst_114 = arith.constant dense<0xFF800000> : vector<8xf32>
    %282 = vector.multi_reduction <maximumf>, %281, %cst_114 [1] : vector<8x8xf32> to vector<8xf32>
    %283 = vector.shape_cast %282 : vector<8xf32> to vector<8x1xf32>
    %284 = vector.broadcast %283 : vector<8x1xf32> to vector<8x8xf32>
    %285 = arith.subf %281, %284 : vector<8x8xf32>
    %286 = math.exp %285 : vector<8x8xf32>
    %cst_115 = arith.constant dense<0.000000e+00> : vector<8xf32>
    %287 = vector.multi_reduction <add>, %286, %cst_115 [1] : vector<8x8xf32> to vector<8xf32>
    %288 = vector.shape_cast %287 : vector<8xf32> to vector<8x1xf32>
    %289 = tpu.reciprocal %288 {approx = true} : vector<8x1xf32> -> vector<8x1xf32>
    %290 = vector.broadcast %289 : vector<8x1xf32> to vector<8x8xf32>
    %291 = arith.mulf %286, %290 : vector<8x8xf32>
    %cst_116 = arith.constant dense<0.000000e+00> : vector<8x16xf32>
    %292 = tpu.matmul %291, %278, %cst_116 {dimension_numbers = #tpu.dot_dimension_numbers<[1], [0], [0], [1], [0, 0, 1, 1], [], []>} : vector<8x8xf32>, vector<8x16xf32>, vector<8x16xf32> -> vector<8x16xf32>
    %293 = tpu.concatenate %275, %292 in 1 : vector<8x16xf32>, vector<8x16xf32> -> vector<8x32xf32>
    %294 = tpu.concatenate %258, %293 in 0 : vector<8x32xf32>, vector<8x32xf32> -> vector<16x32xf32>
    %c1_117 = arith.constant 1 : index
    %c0_118 = arith.constant 0 : index
    %c0_119 = arith.constant 0 : index
    %295 = vector.load %arg41[%c1_117, %c0_118, %c0_119] : memref<2x32x32xf32, #tpu.memory_space<vmem>>, vector<1x32x32xf32>
    %296 = vector.shape_cast %295 : vector<1x32x32xf32> to vector<32x32xf32>
    %cst_120 = arith.constant dense<0.000000e+00> : vector<16x32xf32>
    %297 = tpu.matmul %294, %296, %cst_120 {dimension_numbers = #tpu.dot_dimension_numbers<[1], [0], [0], [1], [0, 0, 1, 1], [], []>} : vector<16x32xf32>, vector<32x32xf32>, vector<16x32xf32> -> vector<16x32xf32>
    %c1_121 = arith.constant 1 : index
    %c0_122 = arith.constant 0 : index
    %c0_123 = arith.constant 0 : index
    %298 = vector.load %arg25[%c1_121, %c0_122, %c0_123] : memref<2x1x32xf32, #tpu.memory_space<vmem>>, vector<1x1x32xf32>
    %299 = vector.shape_cast %298 : vector<1x1x32xf32> to vector<1x32xf32>
    %300 = vector.broadcast %299 : vector<1x32xf32> to vector<16x32xf32>
    %301 = arith.addf %297, %300 : vector<16x32xf32>
    %302 = arith.addf %190, %301 : vector<16x32xf32>
    %c1_124 = arith.constant 1 : index
    %c0_125 = arith.constant 0 : index
    %c0_126 = arith.constant 0 : index
    %303 = vector.load %arg33[%c1_124, %c0_125, %c0_126] : memref<2x1x32xf32, #tpu.memory_space<vmem>>, vector<1x1x32xf32>
    %304 = vector.shape_cast %303 : vector<1x1x32xf32> to vector<1x32xf32>
    %c1_127 = arith.constant 1 : index
    %c0_128 = arith.constant 0 : index
    %c0_129 = arith.constant 0 : index
    %305 = vector.load %arg32[%c1_127, %c0_128, %c0_129] : memref<2x1x32xf32, #tpu.memory_space<vmem>>, vector<1x1x32xf32>
    %306 = vector.shape_cast %305 : vector<1x1x32xf32> to vector<1x32xf32>
    %cst_130 = arith.constant dense<0.000000e+00> : vector<16xf32>
    %307 = vector.multi_reduction <add>, %302, %cst_130 [1] : vector<16x32xf32> to vector<16xf32>
    %308 = vector.shape_cast %307 : vector<16xf32> to vector<16x1xf32>
    %cst_131 = arith.constant 3.200000e+01 : f32
    %309 = vector.broadcast %cst_131 : f32 to vector<16x1xf32>
    %310 = arith.divf %308, %309 : vector<16x1xf32>
    %311 = vector.broadcast %310 : vector<16x1xf32> to vector<16x32xf32>
    %312 = arith.subf %302, %311 : vector<16x32xf32>
    %313 = arith.mulf %312, %312 : vector<16x32xf32>
    %cst_132 = arith.constant dense<0.000000e+00> : vector<16xf32>
    %314 = vector.multi_reduction <add>, %313, %cst_132 [1] : vector<16x32xf32> to vector<16xf32>
    %315 = vector.shape_cast %314 : vector<16xf32> to vector<16x1xf32>
    %cst_133 = arith.constant 3.200000e+01 : f32
    %316 = vector.broadcast %cst_133 : f32 to vector<16x1xf32>
    %317 = arith.divf %315, %316 : vector<16x1xf32>
    %318 = vector.broadcast %310 : vector<16x1xf32> to vector<16x32xf32>
    %319 = arith.subf %302, %318 : vector<16x32xf32>
    %cst_134 = arith.constant 9.99999974E-6 : f32
    %320 = vector.broadcast %cst_134 : f32 to vector<16x1xf32>
    %321 = arith.addf %317, %320 : vector<16x1xf32>
    %322 = math.rsqrt %321 : vector<16x1xf32>
    %323 = vector.broadcast %322 : vector<16x1xf32> to vector<16x32xf32>
    %324 = arith.mulf %319, %323 : vector<16x32xf32>
    %325 = vector.broadcast %304 : vector<1x32xf32> to vector<16x32xf32>
    %326 = arith.mulf %324, %325 : vector<16x32xf32>
    %327 = vector.broadcast %306 : vector<1x32xf32> to vector<16x32xf32>
    %328 = arith.addf %326, %327 : vector<16x32xf32>
    %c1_135 = arith.constant 1 : index
    %c0_136 = arith.constant 0 : index
    %c0_137 = arith.constant 0 : index
    %329 = vector.load %arg27[%c1_135, %c0_136, %c0_137] : memref<2x32x64xf32, #tpu.memory_space<vmem>>, vector<1x32x64xf32>
    %330 = vector.shape_cast %329 : vector<1x32x64xf32> to vector<32x64xf32>
    %cst_138 = arith.constant dense<0.000000e+00> : vector<16x64xf32>
    %331 = tpu.matmul %328, %330, %cst_138 {dimension_numbers = #tpu.dot_dimension_numbers<[1], [0], [0], [1], [0, 0, 1, 1], [], []>} : vector<16x32xf32>, vector<32x64xf32>, vector<16x64xf32> -> vector<16x64xf32>
    %c1_139 = arith.constant 1 : index
    %c0_140 = arith.constant 0 : index
    %c0_141 = arith.constant 0 : index
    %332 = vector.load %arg26[%c1_139, %c0_140, %c0_141] : memref<2x1x64xf32, #tpu.memory_space<vmem>>, vector<1x1x64xf32>
    %333 = vector.shape_cast %332 : vector<1x1x64xf32> to vector<1x64xf32>
    %334 = vector.broadcast %333 : vector<1x64xf32> to vector<16x64xf32>
    %335 = arith.addf %331, %334 : vector<16x64xf32>
    %cst_142 = arith.constant 1.702000e+00 : f32
    %336 = vector.broadcast %cst_142 : f32 to vector<16x64xf32>
    %337 = arith.mulf %336, %335 : vector<16x64xf32>
    %338 = arith.negf %337 : vector<16x64xf32>
    %339 = math.exp %338 : vector<16x64xf32>
    %cst_143 = arith.constant 1.000000e+00 : f32
    %340 = vector.broadcast %cst_143 : f32 to vector<16x64xf32>
    %341 = arith.addf %340, %339 : vector<16x64xf32>
    %342 = arith.divf %340, %341 : vector<16x64xf32>
    %343 = arith.mulf %335, %342 : vector<16x64xf32>
    %c1_144 = arith.constant 1 : index
    %c0_145 = arith.constant 0 : index
    %c0_146 = arith.constant 0 : index
    %344 = vector.load %arg29[%c1_144, %c0_145, %c0_146] : memref<2x64x32xf32, #tpu.memory_space<vmem>>, vector<1x64x32xf32>
    %345 = vector.shape_cast %344 : vector<1x64x32xf32> to vector<64x32xf32>
    %cst_147 = arith.constant dense<0.000000e+00> : vector<16x32xf32>
    %346 = tpu.matmul %343, %345, %cst_147 {dimension_numbers = #tpu.dot_dimension_numbers<[1], [0], [0], [1], [0, 0, 1, 1], [], []>} : vector<16x64xf32>, vector<64x32xf32>, vector<16x32xf32> -> vector<16x32xf32>
    %c1_148 = arith.constant 1 : index
    %c0_149 = arith.constant 0 : index
    %c0_150 = arith.constant 0 : index
    %347 = vector.load %arg28[%c1_148, %c0_149, %c0_150] : memref<2x1x32xf32, #tpu.memory_space<vmem>>, vector<1x1x32xf32>
    %348 = vector.shape_cast %347 : vector<1x1x32xf32> to vector<1x32xf32>
    %349 = vector.broadcast %348 : vector<1x32xf32> to vector<16x32xf32>
    %350 = arith.addf %346, %349 : vector<16x32xf32>
    %351 = arith.addf %302, %350 : vector<16x32xf32>
    %c0_151 = arith.constant 0 : index
    %c0_152 = arith.constant 0 : index
    %352 = vector.load %arg36[%c0_151, %c0_152] : memref<1x32xf32, #tpu.memory_space<vmem>>, vector<1x32xf32>
    %c0_153 = arith.constant 0 : index
    %c0_154 = arith.constant 0 : index
    %353 = vector.load %arg35[%c0_153, %c0_154] : memref<1x32xf32, #tpu.memory_space<vmem>>, vector<1x32xf32>
    %cst_155 = arith.constant dense<0.000000e+00> : vector<16xf32>
    %354 = vector.multi_reduction <add>, %351, %cst_155 [1] : vector<16x32xf32> to vector<16xf32>
    %355 = vector.shape_cast %354 : vector<16xf32> to vector<16x1xf32>
    %cst_156 = arith.constant 3.200000e+01 : f32
    %356 = vector.broadcast %cst_156 : f32 to vector<16x1xf32>
    %357 = arith.divf %355, %356 : vector<16x1xf32>
    %358 = vector.broadcast %357 : vector<16x1xf32> to vector<16x32xf32>
    %359 = arith.subf %351, %358 : vector<16x32xf32>
    %360 = arith.mulf %359, %359 : vector<16x32xf32>
    %cst_157 = arith.constant dense<0.000000e+00> : vector<16xf32>
    %361 = vector.multi_reduction <add>, %360, %cst_157 [1] : vector<16x32xf32> to vector<16xf32>
    %362 = vector.shape_cast %361 : vector<16xf32> to vector<16x1xf32>
    %cst_158 = arith.constant 3.200000e+01 : f32
    %363 = vector.broadcast %cst_158 : f32 to vector<16x1xf32>
    %364 = arith.divf %362, %363 : vector<16x1xf32>
    %365 = vector.broadcast %357 : vector<16x1xf32> to vector<16x32xf32>
    %366 = arith.subf %351, %365 : vector<16x32xf32>
    %cst_159 = arith.constant 9.99999974E-6 : f32
    %367 = vector.broadcast %cst_159 : f32 to vector<16x1xf32>
    %368 = arith.addf %364, %367 : vector<16x1xf32>
    %369 = math.rsqrt %368 : vector<16x1xf32>
    %370 = vector.broadcast %369 : vector<16x1xf32> to vector<16x32xf32>
    %371 = arith.mulf %366, %370 : vector<16x32xf32>
    %372 = vector.broadcast %352 : vector<1x32xf32> to vector<16x32xf32>
    %373 = arith.mulf %371, %372 : vector<16x32xf32>
    %374 = vector.broadcast %353 : vector<1x32xf32> to vector<16x32xf32>
    %375 = arith.addf %373, %374 : vector<16x32xf32>
    %c0_160 = arith.constant 0 : index
    %c0_161 = arith.constant 0 : index
    %376 = vector.load %arg21[%c0_160, %c0_161] : memref<32x32xf32, #tpu.memory_space<vmem>>, vector<32x32xf32>
    %cst_162 = arith.constant dense<0.000000e+00> : vector<16x32xf32>
    %377 = tpu.matmul %375, %376, %cst_162 {dimension_numbers = #tpu.dot_dimension_numbers<[1], [0], [0], [1], [0, 0, 1, 1], [], []>} : vector<16x32xf32>, vector<32x32xf32>, vector<16x32xf32> -> vector<16x32xf32>
    %c0_163 = arith.constant 0 : index
    %c0_164 = arith.constant 0 : index
    %378 = vector.load %arg18[%c0_163, %c0_164] : memref<1x32xf32, #tpu.memory_space<vmem>>, vector<1x32xf32>
    %379 = vector.broadcast %378 : vector<1x32xf32> to vector<16x32xf32>
    %380 = arith.addf %377, %379 : vector<16x32xf32>
    %c0_165 = arith.constant 0 : index
    %c0_166 = arith.constant 0 : index
    %381 = vector.load %arg20[%c0_165, %c0_166] : memref<1x32xf32, #tpu.memory_space<vmem>>, vector<1x32xf32>
    %c0_167 = arith.constant 0 : index
    %c0_168 = arith.constant 0 : index
    %382 = vector.load %arg19[%c0_167, %c0_168] : memref<1x32xf32, #tpu.memory_space<vmem>>, vector<1x32xf32>
    %cst_169 = arith.constant dense<0.000000e+00> : vector<16xf32>
    %383 = vector.multi_reduction <add>, %380, %cst_169 [1] : vector<16x32xf32> to vector<16xf32>
    %384 = vector.shape_cast %383 : vector<16xf32> to vector<16x1xf32>
    %cst_170 = arith.constant 3.200000e+01 : f32
    %385 = vector.broadcast %cst_170 : f32 to vector<16x1xf32>
    %386 = arith.divf %384, %385 : vector<16x1xf32>
    %387 = vector.broadcast %386 : vector<16x1xf32> to vector<16x32xf32>
    %388 = arith.subf %380, %387 : vector<16x32xf32>
    %389 = arith.mulf %388, %388 : vector<16x32xf32>
    %cst_171 = arith.constant dense<0.000000e+00> : vector<16xf32>
    %390 = vector.multi_reduction <add>, %389, %cst_171 [1] : vector<16x32xf32> to vector<16xf32>
    %391 = vector.shape_cast %390 : vector<16xf32> to vector<16x1xf32>
    %cst_172 = arith.constant 3.200000e+01 : f32
    %392 = vector.broadcast %cst_172 : f32 to vector<16x1xf32>
    %393 = arith.divf %391, %392 : vector<16x1xf32>
    %394 = vector.broadcast %386 : vector<16x1xf32> to vector<16x32xf32>
    %395 = arith.subf %380, %394 : vector<16x32xf32>
    %cst_173 = arith.constant 9.99999996E-13 : f32
    %396 = vector.broadcast %cst_173 : f32 to vector<16x1xf32>
    %397 = arith.addf %393, %396 : vector<16x1xf32>
    %398 = math.rsqrt %397 : vector<16x1xf32>
    %399 = vector.broadcast %398 : vector<16x1xf32> to vector<16x32xf32>
    %400 = arith.mulf %395, %399 : vector<16x32xf32>
    %401 = vector.broadcast %381 : vector<1x32xf32> to vector<16x32xf32>
    %402 = arith.mulf %400, %401 : vector<16x32xf32>
    %403 = vector.broadcast %382 : vector<1x32xf32> to vector<16x32xf32>
    %404 = arith.addf %402, %403 : vector<16x32xf32>
    %c0_174 = arith.constant 0 : index
    %c0_175 = arith.constant 0 : index
    %405 = vector.load %arg2[%c0_174, %c0_175] : memref<16x32xf32, #tpu.memory_space<vmem>>, vector<16x32xf32>
    %c0_176 = arith.constant 0 : index
    %c0_177 = arith.constant 0 : index
    %406 = vector.load %arg9[%c0_176, %c0_177] : memref<1x32xf32, #tpu.memory_space<vmem>>, vector<1x32xf32>
    %c0_178 = arith.constant 0 : index
    %c0_179 = arith.constant 0 : index
    %407 = vector.load %arg8[%c0_178, %c0_179] : memref<1x32xf32, #tpu.memory_space<vmem>>, vector<1x32xf32>
    %cst_180 = arith.constant dense<0.000000e+00> : vector<16xf32>
    %408 = vector.multi_reduction <add>, %405, %cst_180 [1] : vector<16x32xf32> to vector<16xf32>
    %409 = vector.shape_cast %408 : vector<16xf32> to vector<16x1xf32>
    %cst_181 = arith.constant 3.200000e+01 : f32
    %410 = vector.broadcast %cst_181 : f32 to vector<16x1xf32>
    %411 = arith.divf %409, %410 : vector<16x1xf32>
    %412 = vector.broadcast %411 : vector<16x1xf32> to vector<16x32xf32>
    %413 = arith.subf %405, %412 : vector<16x32xf32>
    %414 = arith.mulf %413, %413 : vector<16x32xf32>
    %cst_182 = arith.constant dense<0.000000e+00> : vector<16xf32>
    %415 = vector.multi_reduction <add>, %414, %cst_182 [1] : vector<16x32xf32> to vector<16xf32>
    %416 = vector.shape_cast %415 : vector<16xf32> to vector<16x1xf32>
    %cst_183 = arith.constant 3.200000e+01 : f32
    %417 = vector.broadcast %cst_183 : f32 to vector<16x1xf32>
    %418 = arith.divf %416, %417 : vector<16x1xf32>
    %419 = vector.broadcast %411 : vector<16x1xf32> to vector<16x32xf32>
    %420 = arith.subf %405, %419 : vector<16x32xf32>
    %cst_184 = arith.constant 9.99999996E-13 : f32
    %421 = vector.broadcast %cst_184 : f32 to vector<16x1xf32>
    %422 = arith.addf %418, %421 : vector<16x1xf32>
    %423 = math.rsqrt %422 : vector<16x1xf32>
    %424 = vector.broadcast %423 : vector<16x1xf32> to vector<16x32xf32>
    %425 = arith.mulf %420, %424 : vector<16x32xf32>
    %426 = vector.broadcast %406 : vector<1x32xf32> to vector<16x32xf32>
    %427 = arith.mulf %425, %426 : vector<16x32xf32>
    %428 = vector.broadcast %407 : vector<1x32xf32> to vector<16x32xf32>
    %429 = arith.addf %427, %428 : vector<16x32xf32>
    %430 = vector.extract_strided_slice %404 {offsets = [0, 0], sizes = [8, 32], strides = [1, 1]} : vector<16x32xf32> to vector<8x32xf32>
    %431 = vector.extract_strided_slice %429 {offsets = [0, 0], sizes = [8, 32], strides = [1, 1]} : vector<16x32xf32> to vector<8x32xf32>
    %432 = vector.extract_strided_slice %404 {offsets = [8, 0], sizes = [8, 32], strides = [1, 1]} : vector<16x32xf32> to vector<8x32xf32>
    %433 = vector.extract_strided_slice %429 {offsets = [8, 0], sizes = [8, 32], strides = [1, 1]} : vector<16x32xf32> to vector<8x32xf32>
    %434 = tpu.concatenate %430, %431, %432, %433 in 0 : vector<8x32xf32>, vector<8x32xf32>, vector<8x32xf32>, vector<8x32xf32> -> vector<32x32xf32>
    %c0_185 = arith.constant 0 : index
    %c0_186 = arith.constant 0 : index
    %435 = vector.load %arg4[%c0_185, %c0_186] : memref<16x16xf32, #tpu.memory_space<vmem>>, vector<16x16xf32>
    %c0_187 = arith.constant 0 : index
    %c0_188 = arith.constant 0 : index
    %c0_189 = arith.constant 0 : index
    %436 = vector.load %arg23[%c0_187, %c0_188, %c0_189] : memref<2x32x96xf32, #tpu.memory_space<vmem>>, vector<1x32x96xf32>
    %437 = vector.shape_cast %436 : vector<1x32x96xf32> to vector<32x96xf32>
    %cst_190 = arith.constant dense<0.000000e+00> : vector<32x96xf32>
    %438 = tpu.matmul %434, %437, %cst_190 {dimension_numbers = #tpu.dot_dimension_numbers<[1], [0], [0], [1], [0, 0, 1, 1], [], []>} : vector<32x32xf32>, vector<32x96xf32>, vector<32x96xf32> -> vector<32x96xf32>
    %c0_191 = arith.constant 0 : index
    %c0_192 = arith.constant 0 : index
    %c0_193 = arith.constant 0 : index
    %439 = vector.load %arg22[%c0_191, %c0_192, %c0_193] : memref<2x1x96xf32, #tpu.memory_space<vmem>>, vector<1x1x96xf32>
    %440 = vector.shape_cast %439 : vector<1x1x96xf32> to vector<1x96xf32>
    %441 = vector.broadcast %440 : vector<1x96xf32> to vector<32x96xf32>
    %442 = arith.addf %438, %441 : vector<32x96xf32>
    %443 = vector.extract_strided_slice %442 {offsets = [0, 0], sizes = [16, 16], strides = [1, 1]} : vector<32x96xf32> to vector<16x16xf32>
    %444 = vector.extract_strided_slice %442 {offsets = [0, 32], sizes = [16, 16], strides = [1, 1]} : vector<32x96xf32> to vector<16x16xf32>
    %445 = vector.extract_strided_slice %442 {offsets = [0, 64], sizes = [16, 16], strides = [1, 1]} : vector<32x96xf32> to vector<16x16xf32>
    %cst_194 = arith.constant dense<0.000000e+00> : vector<16x16xf32>
    %446 = tpu.matmul %443, %444, %cst_194 {dimension_numbers = #tpu.dot_dimension_numbers<[1], [1], [0], [0], [0, 0, 1, 0], [], []>} : vector<16x16xf32>, vector<16x16xf32>, vector<16x16xf32> -> vector<16x16xf32>
    %447 = arith.addf %446, %435 : vector<16x16xf32>
    %cst_195 = arith.constant dense<0xFF800000> : vector<16xf32>
    %448 = vector.multi_reduction <maximumf>, %447, %cst_195 [1] : vector<16x16xf32> to vector<16xf32>
    %449 = vector.shape_cast %448 : vector<16xf32> to vector<16x1xf32>
    %450 = vector.broadcast %449 : vector<16x1xf32> to vector<16x16xf32>
    %451 = arith.subf %447, %450 : vector<16x16xf32>
    %452 = math.exp %451 : vector<16x16xf32>
    %cst_196 = arith.constant dense<0.000000e+00> : vector<16xf32>
    %453 = vector.multi_reduction <add>, %452, %cst_196 [1] : vector<16x16xf32> to vector<16xf32>
    %454 = vector.shape_cast %453 : vector<16xf32> to vector<16x1xf32>
    %455 = tpu.reciprocal %454 {approx = true} : vector<16x1xf32> -> vector<16x1xf32>
    %456 = vector.broadcast %455 : vector<16x1xf32> to vector<16x16xf32>
    %457 = arith.mulf %452, %456 : vector<16x16xf32>
    %cst_197 = arith.constant dense<0.000000e+00> : vector<16x16xf32>
    %458 = tpu.matmul %457, %445, %cst_197 {dimension_numbers = #tpu.dot_dimension_numbers<[1], [0], [0], [1], [0, 0, 1, 1], [], []>} : vector<16x16xf32>, vector<16x16xf32>, vector<16x16xf32> -> vector<16x16xf32>
    %459 = vector.extract_strided_slice %442 {offsets = [0, 16], sizes = [16, 16], strides = [1, 1]} : vector<32x96xf32> to vector<16x16xf32>
    %460 = vector.extract_strided_slice %442 {offsets = [0, 48], sizes = [16, 16], strides = [1, 1]} : vector<32x96xf32> to vector<16x16xf32>
    %461 = vector.extract_strided_slice %442 {offsets = [0, 80], sizes = [16, 16], strides = [1, 1]} : vector<32x96xf32> to vector<16x16xf32>
    %cst_198 = arith.constant dense<0.000000e+00> : vector<16x16xf32>
    %462 = tpu.matmul %459, %460, %cst_198 {dimension_numbers = #tpu.dot_dimension_numbers<[1], [1], [0], [0], [0, 0, 1, 0], [], []>} : vector<16x16xf32>, vector<16x16xf32>, vector<16x16xf32> -> vector<16x16xf32>
    %463 = arith.addf %462, %435 : vector<16x16xf32>
    %cst_199 = arith.constant dense<0xFF800000> : vector<16xf32>
    %464 = vector.multi_reduction <maximumf>, %463, %cst_199 [1] : vector<16x16xf32> to vector<16xf32>
    %465 = vector.shape_cast %464 : vector<16xf32> to vector<16x1xf32>
    %466 = vector.broadcast %465 : vector<16x1xf32> to vector<16x16xf32>
    %467 = arith.subf %463, %466 : vector<16x16xf32>
    %468 = math.exp %467 : vector<16x16xf32>
    %cst_200 = arith.constant dense<0.000000e+00> : vector<16xf32>
    %469 = vector.multi_reduction <add>, %468, %cst_200 [1] : vector<16x16xf32> to vector<16xf32>
    %470 = vector.shape_cast %469 : vector<16xf32> to vector<16x1xf32>
    %471 = tpu.reciprocal %470 {approx = true} : vector<16x1xf32> -> vector<16x1xf32>
    %472 = vector.broadcast %471 : vector<16x1xf32> to vector<16x16xf32>
    %473 = arith.mulf %468, %472 : vector<16x16xf32>
    %cst_201 = arith.constant dense<0.000000e+00> : vector<16x16xf32>
    %474 = tpu.matmul %473, %461, %cst_201 {dimension_numbers = #tpu.dot_dimension_numbers<[1], [0], [0], [1], [0, 0, 1, 1], [], []>} : vector<16x16xf32>, vector<16x16xf32>, vector<16x16xf32> -> vector<16x16xf32>
    %475 = tpu.concatenate %458, %474 in 1 : vector<16x16xf32>, vector<16x16xf32> -> vector<16x32xf32>
    %476 = vector.extract_strided_slice %442 {offsets = [16, 0], sizes = [16, 16], strides = [1, 1]} : vector<32x96xf32> to vector<16x16xf32>
    %477 = vector.extract_strided_slice %442 {offsets = [16, 32], sizes = [16, 16], strides = [1, 1]} : vector<32x96xf32> to vector<16x16xf32>
    %478 = vector.extract_strided_slice %442 {offsets = [16, 64], sizes = [16, 16], strides = [1, 1]} : vector<32x96xf32> to vector<16x16xf32>
    %cst_202 = arith.constant dense<0.000000e+00> : vector<16x16xf32>
    %479 = tpu.matmul %476, %477, %cst_202 {dimension_numbers = #tpu.dot_dimension_numbers<[1], [1], [0], [0], [0, 0, 1, 0], [], []>} : vector<16x16xf32>, vector<16x16xf32>, vector<16x16xf32> -> vector<16x16xf32>
    %480 = arith.addf %479, %435 : vector<16x16xf32>
    %cst_203 = arith.constant dense<0xFF800000> : vector<16xf32>
    %481 = vector.multi_reduction <maximumf>, %480, %cst_203 [1] : vector<16x16xf32> to vector<16xf32>
    %482 = vector.shape_cast %481 : vector<16xf32> to vector<16x1xf32>
    %483 = vector.broadcast %482 : vector<16x1xf32> to vector<16x16xf32>
    %484 = arith.subf %480, %483 : vector<16x16xf32>
    %485 = math.exp %484 : vector<16x16xf32>
    %cst_204 = arith.constant dense<0.000000e+00> : vector<16xf32>
    %486 = vector.multi_reduction <add>, %485, %cst_204 [1] : vector<16x16xf32> to vector<16xf32>
    %487 = vector.shape_cast %486 : vector<16xf32> to vector<16x1xf32>
    %488 = tpu.reciprocal %487 {approx = true} : vector<16x1xf32> -> vector<16x1xf32>
    %489 = vector.broadcast %488 : vector<16x1xf32> to vector<16x16xf32>
    %490 = arith.mulf %485, %489 : vector<16x16xf32>
    %cst_205 = arith.constant dense<0.000000e+00> : vector<16x16xf32>
    %491 = tpu.matmul %490, %478, %cst_205 {dimension_numbers = #tpu.dot_dimension_numbers<[1], [0], [0], [1], [0, 0, 1, 1], [], []>} : vector<16x16xf32>, vector<16x16xf32>, vector<16x16xf32> -> vector<16x16xf32>
    %492 = vector.extract_strided_slice %442 {offsets = [16, 16], sizes = [16, 16], strides = [1, 1]} : vector<32x96xf32> to vector<16x16xf32>
    %493 = vector.extract_strided_slice %442 {offsets = [16, 48], sizes = [16, 16], strides = [1, 1]} : vector<32x96xf32> to vector<16x16xf32>
    %494 = vector.extract_strided_slice %442 {offsets = [16, 80], sizes = [16, 16], strides = [1, 1]} : vector<32x96xf32> to vector<16x16xf32>
    %cst_206 = arith.constant dense<0.000000e+00> : vector<16x16xf32>
    %495 = tpu.matmul %492, %493, %cst_206 {dimension_numbers = #tpu.dot_dimension_numbers<[1], [1], [0], [0], [0, 0, 1, 0], [], []>} : vector<16x16xf32>, vector<16x16xf32>, vector<16x16xf32> -> vector<16x16xf32>
    %496 = arith.addf %495, %435 : vector<16x16xf32>
    %cst_207 = arith.constant dense<0xFF800000> : vector<16xf32>
    %497 = vector.multi_reduction <maximumf>, %496, %cst_207 [1] : vector<16x16xf32> to vector<16xf32>
    %498 = vector.shape_cast %497 : vector<16xf32> to vector<16x1xf32>
    %499 = vector.broadcast %498 : vector<16x1xf32> to vector<16x16xf32>
    %500 = arith.subf %496, %499 : vector<16x16xf32>
    %501 = math.exp %500 : vector<16x16xf32>
    %cst_208 = arith.constant dense<0.000000e+00> : vector<16xf32>
    %502 = vector.multi_reduction <add>, %501, %cst_208 [1] : vector<16x16xf32> to vector<16xf32>
    %503 = vector.shape_cast %502 : vector<16xf32> to vector<16x1xf32>
    %504 = tpu.reciprocal %503 {approx = true} : vector<16x1xf32> -> vector<16x1xf32>
    %505 = vector.broadcast %504 : vector<16x1xf32> to vector<16x16xf32>
    %506 = arith.mulf %501, %505 : vector<16x16xf32>
    %cst_209 = arith.constant dense<0.000000e+00> : vector<16x16xf32>
    %507 = tpu.matmul %506, %494, %cst_209 {dimension_numbers = #tpu.dot_dimension_numbers<[1], [0], [0], [1], [0, 0, 1, 1], [], []>} : vector<16x16xf32>, vector<16x16xf32>, vector<16x16xf32> -> vector<16x16xf32>
    %508 = tpu.concatenate %491, %507 in 1 : vector<16x16xf32>, vector<16x16xf32> -> vector<16x32xf32>
    %509 = tpu.concatenate %475, %508 in 0 : vector<16x32xf32>, vector<16x32xf32> -> vector<32x32xf32>
    %c0_210 = arith.constant 0 : index
    %c0_211 = arith.constant 0 : index
    %c0_212 = arith.constant 0 : index
    %510 = vector.load %arg24[%c0_210, %c0_211, %c0_212] : memref<2x32x32xf32, #tpu.memory_space<vmem>>, vector<1x32x32xf32>
    %511 = vector.shape_cast %510 : vector<1x32x32xf32> to vector<32x32xf32>
    %cst_213 = arith.constant dense<0.000000e+00> : vector<32x32xf32>
    %512 = tpu.matmul %509, %511, %cst_213 {dimension_numbers = #tpu.dot_dimension_numbers<[1], [0], [0], [1], [0, 0, 1, 1], [], []>} : vector<32x32xf32>, vector<32x32xf32>, vector<32x32xf32> -> vector<32x32xf32>
    %c0_214 = arith.constant 0 : index
    %c0_215 = arith.constant 0 : index
    %c0_216 = arith.constant 0 : index
    %513 = vector.load %arg7[%c0_214, %c0_215, %c0_216] : memref<2x1x32xf32, #tpu.memory_space<vmem>>, vector<1x1x32xf32>
    %514 = vector.shape_cast %513 : vector<1x1x32xf32> to vector<1x32xf32>
    %515 = vector.broadcast %514 : vector<1x32xf32> to vector<32x32xf32>
    %516 = arith.addf %512, %515 : vector<32x32xf32>
    %517 = arith.addf %434, %516 : vector<32x32xf32>
    %c0_217 = arith.constant 0 : index
    %c0_218 = arith.constant 0 : index
    %c0_219 = arith.constant 0 : index
    %518 = vector.load %arg6[%c0_217, %c0_218, %c0_219] : memref<2x1x32xf32, #tpu.memory_space<vmem>>, vector<1x1x32xf32>
    %519 = vector.shape_cast %518 : vector<1x1x32xf32> to vector<1x32xf32>
    %c0_220 = arith.constant 0 : index
    %c0_221 = arith.constant 0 : index
    %c0_222 = arith.constant 0 : index
    %520 = vector.load %arg5[%c0_220, %c0_221, %c0_222] : memref<2x1x32xf32, #tpu.memory_space<vmem>>, vector<1x1x32xf32>
    %521 = vector.shape_cast %520 : vector<1x1x32xf32> to vector<1x32xf32>
    %cst_223 = arith.constant dense<0.000000e+00> : vector<32xf32>
    %522 = vector.multi_reduction <add>, %517, %cst_223 [1] : vector<32x32xf32> to vector<32xf32>
    %523 = vector.shape_cast %522 : vector<32xf32> to vector<32x1xf32>
    %cst_224 = arith.constant 3.200000e+01 : f32
    %524 = vector.broadcast %cst_224 : f32 to vector<32x1xf32>
    %525 = arith.divf %523, %524 : vector<32x1xf32>
    %526 = vector.broadcast %525 : vector<32x1xf32> to vector<32x32xf32>
    %527 = arith.subf %517, %526 : vector<32x32xf32>
    %528 = arith.mulf %527, %527 : vector<32x32xf32>
    %cst_225 = arith.constant dense<0.000000e+00> : vector<32xf32>
    %529 = vector.multi_reduction <add>, %528, %cst_225 [1] : vector<32x32xf32> to vector<32xf32>
    %530 = vector.shape_cast %529 : vector<32xf32> to vector<32x1xf32>
    %cst_226 = arith.constant 3.200000e+01 : f32
    %531 = vector.broadcast %cst_226 : f32 to vector<32x1xf32>
    %532 = arith.divf %530, %531 : vector<32x1xf32>
    %533 = vector.broadcast %525 : vector<32x1xf32> to vector<32x32xf32>
    %534 = arith.subf %517, %533 : vector<32x32xf32>
    %cst_227 = arith.constant 9.99999996E-13 : f32
    %535 = vector.broadcast %cst_227 : f32 to vector<32x1xf32>
    %536 = arith.addf %532, %535 : vector<32x1xf32>
    %537 = math.rsqrt %536 : vector<32x1xf32>
    %538 = vector.broadcast %537 : vector<32x1xf32> to vector<32x32xf32>
    %539 = arith.mulf %534, %538 : vector<32x32xf32>
    %540 = vector.broadcast %519 : vector<1x32xf32> to vector<32x32xf32>
    %541 = arith.mulf %539, %540 : vector<32x32xf32>
    %542 = vector.broadcast %521 : vector<1x32xf32> to vector<32x32xf32>
    %543 = arith.addf %541, %542 : vector<32x32xf32>
    %c0_228 = arith.constant 0 : index
    %c0_229 = arith.constant 0 : index
    %c0_230 = arith.constant 0 : index
    %544 = vector.load %arg11[%c0_228, %c0_229, %c0_230] : memref<2x32x64xf32, #tpu.memory_space<vmem>>, vector<1x32x64xf32>
    %545 = vector.shape_cast %544 : vector<1x32x64xf32> to vector<32x64xf32>
    %cst_231 = arith.constant dense<0.000000e+00> : vector<32x64xf32>
    %546 = tpu.matmul %543, %545, %cst_231 {dimension_numbers = #tpu.dot_dimension_numbers<[1], [0], [0], [1], [0, 0, 1, 1], [], []>} : vector<32x32xf32>, vector<32x64xf32>, vector<32x64xf32> -> vector<32x64xf32>
    %c0_232 = arith.constant 0 : index
    %c0_233 = arith.constant 0 : index
    %c0_234 = arith.constant 0 : index
    %547 = vector.load %arg10[%c0_232, %c0_233, %c0_234] : memref<2x1x64xf32, #tpu.memory_space<vmem>>, vector<1x1x64xf32>
    %548 = vector.shape_cast %547 : vector<1x1x64xf32> to vector<1x64xf32>
    %549 = vector.broadcast %548 : vector<1x64xf32> to vector<32x64xf32>
    %550 = arith.addf %546, %549 : vector<32x64xf32>
    %551 = arith.mulf %550, %550 : vector<32x64xf32>
    %552 = arith.mulf %550, %551 : vector<32x64xf32>
    %cst_235 = arith.constant 4.471500e-02 : f32
    %553 = vector.broadcast %cst_235 : f32 to vector<32x64xf32>
    %554 = arith.mulf %553, %552 : vector<32x64xf32>
    %555 = arith.addf %550, %554 : vector<32x64xf32>
    %cst_236 = arith.constant 0.797884583 : f32
    %556 = vector.broadcast %cst_236 : f32 to vector<32x64xf32>
    %557 = arith.mulf %556, %555 : vector<32x64xf32>
    %558 = math.tanh %557 : vector<32x64xf32>
    %cst_237 = arith.constant 1.000000e+00 : f32
    %559 = vector.broadcast %cst_237 : f32 to vector<32x64xf32>
    %560 = arith.addf %559, %558 : vector<32x64xf32>
    %cst_238 = arith.constant 5.000000e-01 : f32
    %561 = vector.broadcast %cst_238 : f32 to vector<32x64xf32>
    %562 = arith.mulf %561, %560 : vector<32x64xf32>
    %563 = arith.mulf %550, %562 : vector<32x64xf32>
    %c0_239 = arith.constant 0 : index
    %c0_240 = arith.constant 0 : index
    %c0_241 = arith.constant 0 : index
    %564 = vector.load %arg17[%c0_239, %c0_240, %c0_241] : memref<2x64x32xf32, #tpu.memory_space<vmem>>, vector<1x64x32xf32>
    %565 = vector.shape_cast %564 : vector<1x64x32xf32> to vector<64x32xf32>
    %cst_242 = arith.constant dense<0.000000e+00> : vector<32x32xf32>
    %566 = tpu.matmul %563, %565, %cst_242 {dimension_numbers = #tpu.dot_dimension_numbers<[1], [0], [0], [1], [0, 0, 1, 1], [], []>} : vector<32x64xf32>, vector<64x32xf32>, vector<32x32xf32> -> vector<32x32xf32>
    %c0_243 = arith.constant 0 : index
    %c0_244 = arith.constant 0 : index
    %c0_245 = arith.constant 0 : index
    %567 = vector.load %arg14[%c0_243, %c0_244, %c0_245] : memref<2x1x32xf32, #tpu.memory_space<vmem>>, vector<1x1x32xf32>
    %568 = vector.shape_cast %567 : vector<1x1x32xf32> to vector<1x32xf32>
    %569 = vector.broadcast %568 : vector<1x32xf32> to vector<32x32xf32>
    %570 = arith.addf %566, %569 : vector<32x32xf32>
    %571 = arith.addf %543, %570 : vector<32x32xf32>
    %c0_246 = arith.constant 0 : index
    %c0_247 = arith.constant 0 : index
    %c0_248 = arith.constant 0 : index
    %572 = vector.load %arg16[%c0_246, %c0_247, %c0_248] : memref<2x1x32xf32, #tpu.memory_space<vmem>>, vector<1x1x32xf32>
    %573 = vector.shape_cast %572 : vector<1x1x32xf32> to vector<1x32xf32>
    %c0_249 = arith.constant 0 : index
    %c0_250 = arith.constant 0 : index
    %c0_251 = arith.constant 0 : index
    %574 = vector.load %arg15[%c0_249, %c0_250, %c0_251] : memref<2x1x32xf32, #tpu.memory_space<vmem>>, vector<1x1x32xf32>
    %575 = vector.shape_cast %574 : vector<1x1x32xf32> to vector<1x32xf32>
    %cst_252 = arith.constant dense<0.000000e+00> : vector<32xf32>
    %576 = vector.multi_reduction <add>, %571, %cst_252 [1] : vector<32x32xf32> to vector<32xf32>
    %577 = vector.shape_cast %576 : vector<32xf32> to vector<32x1xf32>
    %cst_253 = arith.constant 3.200000e+01 : f32
    %578 = vector.broadcast %cst_253 : f32 to vector<32x1xf32>
    %579 = arith.divf %577, %578 : vector<32x1xf32>
    %580 = vector.broadcast %579 : vector<32x1xf32> to vector<32x32xf32>
    %581 = arith.subf %571, %580 : vector<32x32xf32>
    %582 = arith.mulf %581, %581 : vector<32x32xf32>
    %cst_254 = arith.constant dense<0.000000e+00> : vector<32xf32>
    %583 = vector.multi_reduction <add>, %582, %cst_254 [1] : vector<32x32xf32> to vector<32xf32>
    %584 = vector.shape_cast %583 : vector<32xf32> to vector<32x1xf32>
    %cst_255 = arith.constant 3.200000e+01 : f32
    %585 = vector.broadcast %cst_255 : f32 to vector<32x1xf32>
    %586 = arith.divf %584, %585 : vector<32x1xf32>
    %587 = vector.broadcast %579 : vector<32x1xf32> to vector<32x32xf32>
    %588 = arith.subf %571, %587 : vector<32x32xf32>
    %cst_256 = arith.constant 9.99999996E-13 : f32
    %589 = vector.broadcast %cst_256 : f32 to vector<32x1xf32>
    %590 = arith.addf %586, %589 : vector<32x1xf32>
    %591 = math.rsqrt %590 : vector<32x1xf32>
    %592 = vector.broadcast %591 : vector<32x1xf32> to vector<32x32xf32>
    %593 = arith.mulf %588, %592 : vector<32x32xf32>
    %594 = vector.broadcast %573 : vector<1x32xf32> to vector<32x32xf32>
    %595 = arith.mulf %593, %594 : vector<32x32xf32>
    %596 = vector.broadcast %575 : vector<1x32xf32> to vector<32x32xf32>
    %597 = arith.addf %595, %596 : vector<32x32xf32>
    %c1_257 = arith.constant 1 : index
    %c0_258 = arith.constant 0 : index
    %c0_259 = arith.constant 0 : index
    %598 = vector.load %arg23[%c1_257, %c0_258, %c0_259] : memref<2x32x96xf32, #tpu.memory_space<vmem>>, vector<1x32x96xf32>
    %599 = vector.shape_cast %598 : vector<1x32x96xf32> to vector<32x96xf32>
    %cst_260 = arith.constant dense<0.000000e+00> : vector<32x96xf32>
    %600 = tpu.matmul %597, %599, %cst_260 {dimension_numbers = #tpu.dot_dimension_numbers<[1], [0], [0], [1], [0, 0, 1, 1], [], []>} : vector<32x32xf32>, vector<32x96xf32>, vector<32x96xf32> -> vector<32x96xf32>
    %c1_261 = arith.constant 1 : index
    %c0_262 = arith.constant 0 : index
    %c0_263 = arith.constant 0 : index
    %601 = vector.load %arg22[%c1_261, %c0_262, %c0_263] : memref<2x1x96xf32, #tpu.memory_space<vmem>>, vector<1x1x96xf32>
    %602 = vector.shape_cast %601 : vector<1x1x96xf32> to vector<1x96xf32>
    %603 = vector.broadcast %602 : vector<1x96xf32> to vector<32x96xf32>
    %604 = arith.addf %600, %603 : vector<32x96xf32>
    %605 = vector.extract_strided_slice %604 {offsets = [0, 0], sizes = [16, 16], strides = [1, 1]} : vector<32x96xf32> to vector<16x16xf32>
    %606 = vector.extract_strided_slice %604 {offsets = [0, 32], sizes = [16, 16], strides = [1, 1]} : vector<32x96xf32> to vector<16x16xf32>
    %607 = vector.extract_strided_slice %604 {offsets = [0, 64], sizes = [16, 16], strides = [1, 1]} : vector<32x96xf32> to vector<16x16xf32>
    %cst_264 = arith.constant dense<0.000000e+00> : vector<16x16xf32>
    %608 = tpu.matmul %605, %606, %cst_264 {dimension_numbers = #tpu.dot_dimension_numbers<[1], [1], [0], [0], [0, 0, 1, 0], [], []>} : vector<16x16xf32>, vector<16x16xf32>, vector<16x16xf32> -> vector<16x16xf32>
    %609 = arith.addf %608, %435 : vector<16x16xf32>
    %cst_265 = arith.constant dense<0xFF800000> : vector<16xf32>
    %610 = vector.multi_reduction <maximumf>, %609, %cst_265 [1] : vector<16x16xf32> to vector<16xf32>
    %611 = vector.shape_cast %610 : vector<16xf32> to vector<16x1xf32>
    %612 = vector.broadcast %611 : vector<16x1xf32> to vector<16x16xf32>
    %613 = arith.subf %609, %612 : vector<16x16xf32>
    %614 = math.exp %613 : vector<16x16xf32>
    %cst_266 = arith.constant dense<0.000000e+00> : vector<16xf32>
    %615 = vector.multi_reduction <add>, %614, %cst_266 [1] : vector<16x16xf32> to vector<16xf32>
    %616 = vector.shape_cast %615 : vector<16xf32> to vector<16x1xf32>
    %617 = tpu.reciprocal %616 {approx = true} : vector<16x1xf32> -> vector<16x1xf32>
    %618 = vector.broadcast %617 : vector<16x1xf32> to vector<16x16xf32>
    %619 = arith.mulf %614, %618 : vector<16x16xf32>
    %cst_267 = arith.constant dense<0.000000e+00> : vector<16x16xf32>
    %620 = tpu.matmul %619, %607, %cst_267 {dimension_numbers = #tpu.dot_dimension_numbers<[1], [0], [0], [1], [0, 0, 1, 1], [], []>} : vector<16x16xf32>, vector<16x16xf32>, vector<16x16xf32> -> vector<16x16xf32>
    %621 = vector.extract_strided_slice %604 {offsets = [0, 16], sizes = [16, 16], strides = [1, 1]} : vector<32x96xf32> to vector<16x16xf32>
    %622 = vector.extract_strided_slice %604 {offsets = [0, 48], sizes = [16, 16], strides = [1, 1]} : vector<32x96xf32> to vector<16x16xf32>
    %623 = vector.extract_strided_slice %604 {offsets = [0, 80], sizes = [16, 16], strides = [1, 1]} : vector<32x96xf32> to vector<16x16xf32>
    %cst_268 = arith.constant dense<0.000000e+00> : vector<16x16xf32>
    %624 = tpu.matmul %621, %622, %cst_268 {dimension_numbers = #tpu.dot_dimension_numbers<[1], [1], [0], [0], [0, 0, 1, 0], [], []>} : vector<16x16xf32>, vector<16x16xf32>, vector<16x16xf32> -> vector<16x16xf32>
    %625 = arith.addf %624, %435 : vector<16x16xf32>
    %cst_269 = arith.constant dense<0xFF800000> : vector<16xf32>
    %626 = vector.multi_reduction <maximumf>, %625, %cst_269 [1] : vector<16x16xf32> to vector<16xf32>
    %627 = vector.shape_cast %626 : vector<16xf32> to vector<16x1xf32>
    %628 = vector.broadcast %627 : vector<16x1xf32> to vector<16x16xf32>
    %629 = arith.subf %625, %628 : vector<16x16xf32>
    %630 = math.exp %629 : vector<16x16xf32>
    %cst_270 = arith.constant dense<0.000000e+00> : vector<16xf32>
    %631 = vector.multi_reduction <add>, %630, %cst_270 [1] : vector<16x16xf32> to vector<16xf32>
    %632 = vector.shape_cast %631 : vector<16xf32> to vector<16x1xf32>
    %633 = tpu.reciprocal %632 {approx = true} : vector<16x1xf32> -> vector<16x1xf32>
    %634 = vector.broadcast %633 : vector<16x1xf32> to vector<16x16xf32>
    %635 = arith.mulf %630, %634 : vector<16x16xf32>
    %cst_271 = arith.constant dense<0.000000e+00> : vector<16x16xf32>
    %636 = tpu.matmul %635, %623, %cst_271 {dimension_numbers = #tpu.dot_dimension_numbers<[1], [0], [0], [1], [0, 0, 1, 1], [], []>} : vector<16x16xf32>, vector<16x16xf32>, vector<16x16xf32> -> vector<16x16xf32>
    %637 = tpu.concatenate %620, %636 in 1 : vector<16x16xf32>, vector<16x16xf32> -> vector<16x32xf32>
    %638 = vector.extract_strided_slice %604 {offsets = [16, 0], sizes = [16, 16], strides = [1, 1]} : vector<32x96xf32> to vector<16x16xf32>
    %639 = vector.extract_strided_slice %604 {offsets = [16, 32], sizes = [16, 16], strides = [1, 1]} : vector<32x96xf32> to vector<16x16xf32>
    %640 = vector.extract_strided_slice %604 {offsets = [16, 64], sizes = [16, 16], strides = [1, 1]} : vector<32x96xf32> to vector<16x16xf32>
    %cst_272 = arith.constant dense<0.000000e+00> : vector<16x16xf32>
    %641 = tpu.matmul %638, %639, %cst_272 {dimension_numbers = #tpu.dot_dimension_numbers<[1], [1], [0], [0], [0, 0, 1, 0], [], []>} : vector<16x16xf32>, vector<16x16xf32>, vector<16x16xf32> -> vector<16x16xf32>
    %642 = arith.addf %641, %435 : vector<16x16xf32>
    %cst_273 = arith.constant dense<0xFF800000> : vector<16xf32>
    %643 = vector.multi_reduction <maximumf>, %642, %cst_273 [1] : vector<16x16xf32> to vector<16xf32>
    %644 = vector.shape_cast %643 : vector<16xf32> to vector<16x1xf32>
    %645 = vector.broadcast %644 : vector<16x1xf32> to vector<16x16xf32>
    %646 = arith.subf %642, %645 : vector<16x16xf32>
    %647 = math.exp %646 : vector<16x16xf32>
    %cst_274 = arith.constant dense<0.000000e+00> : vector<16xf32>
    %648 = vector.multi_reduction <add>, %647, %cst_274 [1] : vector<16x16xf32> to vector<16xf32>
    %649 = vector.shape_cast %648 : vector<16xf32> to vector<16x1xf32>
    %650 = tpu.reciprocal %649 {approx = true} : vector<16x1xf32> -> vector<16x1xf32>
    %651 = vector.broadcast %650 : vector<16x1xf32> to vector<16x16xf32>
    %652 = arith.mulf %647, %651 : vector<16x16xf32>
    %cst_275 = arith.constant dense<0.000000e+00> : vector<16x16xf32>
    %653 = tpu.matmul %652, %640, %cst_275 {dimension_numbers = #tpu.dot_dimension_numbers<[1], [0], [0], [1], [0, 0, 1, 1], [], []>} : vector<16x16xf32>, vector<16x16xf32>, vector<16x16xf32> -> vector<16x16xf32>
    %654 = vector.extract_strided_slice %604 {offsets = [16, 16], sizes = [16, 16], strides = [1, 1]} : vector<32x96xf32> to vector<16x16xf32>
    %655 = vector.extract_strided_slice %604 {offsets = [16, 48], sizes = [16, 16], strides = [1, 1]} : vector<32x96xf32> to vector<16x16xf32>
    %656 = vector.extract_strided_slice %604 {offsets = [16, 80], sizes = [16, 16], strides = [1, 1]} : vector<32x96xf32> to vector<16x16xf32>
    %cst_276 = arith.constant dense<0.000000e+00> : vector<16x16xf32>
    %657 = tpu.matmul %654, %655, %cst_276 {dimension_numbers = #tpu.dot_dimension_numbers<[1], [1], [0], [0], [0, 0, 1, 0], [], []>} : vector<16x16xf32>, vector<16x16xf32>, vector<16x16xf32> -> vector<16x16xf32>
    %658 = arith.addf %657, %435 : vector<16x16xf32>
    %cst_277 = arith.constant dense<0xFF800000> : vector<16xf32>
    %659 = vector.multi_reduction <maximumf>, %658, %cst_277 [1] : vector<16x16xf32> to vector<16xf32>
    %660 = vector.shape_cast %659 : vector<16xf32> to vector<16x1xf32>
    %661 = vector.broadcast %660 : vector<16x1xf32> to vector<16x16xf32>
    %662 = arith.subf %658, %661 : vector<16x16xf32>
    %663 = math.exp %662 : vector<16x16xf32>
    %cst_278 = arith.constant dense<0.000000e+00> : vector<16xf32>
    %664 = vector.multi_reduction <add>, %663, %cst_278 [1] : vector<16x16xf32> to vector<16xf32>
    %665 = vector.shape_cast %664 : vector<16xf32> to vector<16x1xf32>
    %666 = tpu.reciprocal %665 {approx = true} : vector<16x1xf32> -> vector<16x1xf32>
    %667 = vector.broadcast %666 : vector<16x1xf32> to vector<16x16xf32>
    %668 = arith.mulf %663, %667 : vector<16x16xf32>
    %cst_279 = arith.constant dense<0.000000e+00> : vector<16x16xf32>
    %669 = tpu.matmul %668, %656, %cst_279 {dimension_numbers = #tpu.dot_dimension_numbers<[1], [0], [0], [1], [0, 0, 1, 1], [], []>} : vector<16x16xf32>, vector<16x16xf32>, vector<16x16xf32> -> vector<16x16xf32>
    %670 = tpu.concatenate %653, %669 in 1 : vector<16x16xf32>, vector<16x16xf32> -> vector<16x32xf32>
    %671 = tpu.concatenate %637, %670 in 0 : vector<16x32xf32>, vector<16x32xf32> -> vector<32x32xf32>
    %c1_280 = arith.constant 1 : index
    %c0_281 = arith.constant 0 : index
    %c0_282 = arith.constant 0 : index
    %672 = vector.load %arg24[%c1_280, %c0_281, %c0_282] : memref<2x32x32xf32, #tpu.memory_space<vmem>>, vector<1x32x32xf32>
    %673 = vector.shape_cast %672 : vector<1x32x32xf32> to vector<32x32xf32>
    %cst_283 = arith.constant dense<0.000000e+00> : vector<32x32xf32>
    %674 = tpu.matmul %671, %673, %cst_283 {dimension_numbers = #tpu.dot_dimension_numbers<[1], [0], [0], [1], [0, 0, 1, 1], [], []>} : vector<32x32xf32>, vector<32x32xf32>, vector<32x32xf32> -> vector<32x32xf32>
    %c1_284 = arith.constant 1 : index
    %c0_285 = arith.constant 0 : index
    %c0_286 = arith.constant 0 : index
    %675 = vector.load %arg7[%c1_284, %c0_285, %c0_286] : memref<2x1x32xf32, #tpu.memory_space<vmem>>, vector<1x1x32xf32>
    %676 = vector.shape_cast %675 : vector<1x1x32xf32> to vector<1x32xf32>
    %677 = vector.broadcast %676 : vector<1x32xf32> to vector<32x32xf32>
    %678 = arith.addf %674, %677 : vector<32x32xf32>
    %679 = arith.addf %597, %678 : vector<32x32xf32>
    %c1_287 = arith.constant 1 : index
    %c0_288 = arith.constant 0 : index
    %c0_289 = arith.constant 0 : index
    %680 = vector.load %arg6[%c1_287, %c0_288, %c0_289] : memref<2x1x32xf32, #tpu.memory_space<vmem>>, vector<1x1x32xf32>
    %681 = vector.shape_cast %680 : vector<1x1x32xf32> to vector<1x32xf32>
    %c1_290 = arith.constant 1 : index
    %c0_291 = arith.constant 0 : index
    %c0_292 = arith.constant 0 : index
    %682 = vector.load %arg5[%c1_290, %c0_291, %c0_292] : memref<2x1x32xf32, #tpu.memory_space<vmem>>, vector<1x1x32xf32>
    %683 = vector.shape_cast %682 : vector<1x1x32xf32> to vector<1x32xf32>
    %cst_293 = arith.constant dense<0.000000e+00> : vector<32xf32>
    %684 = vector.multi_reduction <add>, %679, %cst_293 [1] : vector<32x32xf32> to vector<32xf32>
    %685 = vector.shape_cast %684 : vector<32xf32> to vector<32x1xf32>
    %cst_294 = arith.constant 3.200000e+01 : f32
    %686 = vector.broadcast %cst_294 : f32 to vector<32x1xf32>
    %687 = arith.divf %685, %686 : vector<32x1xf32>
    %688 = vector.broadcast %687 : vector<32x1xf32> to vector<32x32xf32>
    %689 = arith.subf %679, %688 : vector<32x32xf32>
    %690 = arith.mulf %689, %689 : vector<32x32xf32>
    %cst_295 = arith.constant dense<0.000000e+00> : vector<32xf32>
    %691 = vector.multi_reduction <add>, %690, %cst_295 [1] : vector<32x32xf32> to vector<32xf32>
    %692 = vector.shape_cast %691 : vector<32xf32> to vector<32x1xf32>
    %cst_296 = arith.constant 3.200000e+01 : f32
    %693 = vector.broadcast %cst_296 : f32 to vector<32x1xf32>
    %694 = arith.divf %692, %693 : vector<32x1xf32>
    %695 = vector.broadcast %687 : vector<32x1xf32> to vector<32x32xf32>
    %696 = arith.subf %679, %695 : vector<32x32xf32>
    %cst_297 = arith.constant 9.99999996E-13 : f32
    %697 = vector.broadcast %cst_297 : f32 to vector<32x1xf32>
    %698 = arith.addf %694, %697 : vector<32x1xf32>
    %699 = math.rsqrt %698 : vector<32x1xf32>
    %700 = vector.broadcast %699 : vector<32x1xf32> to vector<32x32xf32>
    %701 = arith.mulf %696, %700 : vector<32x32xf32>
    %702 = vector.broadcast %681 : vector<1x32xf32> to vector<32x32xf32>
    %703 = arith.mulf %701, %702 : vector<32x32xf32>
    %704 = vector.broadcast %683 : vector<1x32xf32> to vector<32x32xf32>
    %705 = arith.addf %703, %704 : vector<32x32xf32>
    %c1_298 = arith.constant 1 : index
    %c0_299 = arith.constant 0 : index
    %c0_300 = arith.constant 0 : index
    %706 = vector.load %arg11[%c1_298, %c0_299, %c0_300] : memref<2x32x64xf32, #tpu.memory_space<vmem>>, vector<1x32x64xf32>
    %707 = vector.shape_cast %706 : vector<1x32x64xf32> to vector<32x64xf32>
    %cst_301 = arith.constant dense<0.000000e+00> : vector<32x64xf32>
    %708 = tpu.matmul %705, %707, %cst_301 {dimension_numbers = #tpu.dot_dimension_numbers<[1], [0], [0], [1], [0, 0, 1, 1], [], []>} : vector<32x32xf32>, vector<32x64xf32>, vector<32x64xf32> -> vector<32x64xf32>
    %c1_302 = arith.constant 1 : index
    %c0_303 = arith.constant 0 : index
    %c0_304 = arith.constant 0 : index
    %709 = vector.load %arg10[%c1_302, %c0_303, %c0_304] : memref<2x1x64xf32, #tpu.memory_space<vmem>>, vector<1x1x64xf32>
    %710 = vector.shape_cast %709 : vector<1x1x64xf32> to vector<1x64xf32>
    %711 = vector.broadcast %710 : vector<1x64xf32> to vector<32x64xf32>
    %712 = arith.addf %708, %711 : vector<32x64xf32>
    %713 = arith.mulf %712, %712 : vector<32x64xf32>
    %714 = arith.mulf %712, %713 : vector<32x64xf32>
    %cst_305 = arith.constant 4.471500e-02 : f32
    %715 = vector.broadcast %cst_305 : f32 to vector<32x64xf32>
    %716 = arith.mulf %715, %714 : vector<32x64xf32>
    %717 = arith.addf %712, %716 : vector<32x64xf32>
    %cst_306 = arith.constant 0.797884583 : f32
    %718 = vector.broadcast %cst_306 : f32 to vector<32x64xf32>
    %719 = arith.mulf %718, %717 : vector<32x64xf32>
    %720 = math.tanh %719 : vector<32x64xf32>
    %cst_307 = arith.constant 1.000000e+00 : f32
    %721 = vector.broadcast %cst_307 : f32 to vector<32x64xf32>
    %722 = arith.addf %721, %720 : vector<32x64xf32>
    %cst_308 = arith.constant 5.000000e-01 : f32
    %723 = vector.broadcast %cst_308 : f32 to vector<32x64xf32>
    %724 = arith.mulf %723, %722 : vector<32x64xf32>
    %725 = arith.mulf %712, %724 : vector<32x64xf32>
    %c1_309 = arith.constant 1 : index
    %c0_310 = arith.constant 0 : index
    %c0_311 = arith.constant 0 : index
    %726 = vector.load %arg17[%c1_309, %c0_310, %c0_311] : memref<2x64x32xf32, #tpu.memory_space<vmem>>, vector<1x64x32xf32>
    %727 = vector.shape_cast %726 : vector<1x64x32xf32> to vector<64x32xf32>
    %cst_312 = arith.constant dense<0.000000e+00> : vector<32x32xf32>
    %728 = tpu.matmul %725, %727, %cst_312 {dimension_numbers = #tpu.dot_dimension_numbers<[1], [0], [0], [1], [0, 0, 1, 1], [], []>} : vector<32x64xf32>, vector<64x32xf32>, vector<32x32xf32> -> vector<32x32xf32>
    %c1_313 = arith.constant 1 : index
    %c0_314 = arith.constant 0 : index
    %c0_315 = arith.constant 0 : index
    %729 = vector.load %arg14[%c1_313, %c0_314, %c0_315] : memref<2x1x32xf32, #tpu.memory_space<vmem>>, vector<1x1x32xf32>
    %730 = vector.shape_cast %729 : vector<1x1x32xf32> to vector<1x32xf32>
    %731 = vector.broadcast %730 : vector<1x32xf32> to vector<32x32xf32>
    %732 = arith.addf %728, %731 : vector<32x32xf32>
    %733 = arith.addf %705, %732 : vector<32x32xf32>
    %c1_316 = arith.constant 1 : index
    %c0_317 = arith.constant 0 : index
    %c0_318 = arith.constant 0 : index
    %734 = vector.load %arg16[%c1_316, %c0_317, %c0_318] : memref<2x1x32xf32, #tpu.memory_space<vmem>>, vector<1x1x32xf32>
    %735 = vector.shape_cast %734 : vector<1x1x32xf32> to vector<1x32xf32>
    %c1_319 = arith.constant 1 : index
    %c0_320 = arith.constant 0 : index
    %c0_321 = arith.constant 0 : index
    %736 = vector.load %arg15[%c1_319, %c0_320, %c0_321] : memref<2x1x32xf32, #tpu.memory_space<vmem>>, vector<1x1x32xf32>
    %737 = vector.shape_cast %736 : vector<1x1x32xf32> to vector<1x32xf32>
    %cst_322 = arith.constant dense<0.000000e+00> : vector<32xf32>
    %738 = vector.multi_reduction <add>, %733, %cst_322 [1] : vector<32x32xf32> to vector<32xf32>
    %739 = vector.shape_cast %738 : vector<32xf32> to vector<32x1xf32>
    %cst_323 = arith.constant 3.200000e+01 : f32
    %740 = vector.broadcast %cst_323 : f32 to vector<32x1xf32>
    %741 = arith.divf %739, %740 : vector<32x1xf32>
    %742 = vector.broadcast %741 : vector<32x1xf32> to vector<32x32xf32>
    %743 = arith.subf %733, %742 : vector<32x32xf32>
    %744 = arith.mulf %743, %743 : vector<32x32xf32>
    %cst_324 = arith.constant dense<0.000000e+00> : vector<32xf32>
    %745 = vector.multi_reduction <add>, %744, %cst_324 [1] : vector<32x32xf32> to vector<32xf32>
    %746 = vector.shape_cast %745 : vector<32xf32> to vector<32x1xf32>
    %cst_325 = arith.constant 3.200000e+01 : f32
    %747 = vector.broadcast %cst_325 : f32 to vector<32x1xf32>
    %748 = arith.divf %746, %747 : vector<32x1xf32>
    %749 = vector.broadcast %741 : vector<32x1xf32> to vector<32x32xf32>
    %750 = arith.subf %733, %749 : vector<32x32xf32>
    %cst_326 = arith.constant 9.99999996E-13 : f32
    %751 = vector.broadcast %cst_326 : f32 to vector<32x1xf32>
    %752 = arith.addf %748, %751 : vector<32x1xf32>
    %753 = math.rsqrt %752 : vector<32x1xf32>
    %754 = vector.broadcast %753 : vector<32x1xf32> to vector<32x32xf32>
    %755 = arith.mulf %750, %754 : vector<32x32xf32>
    %756 = vector.broadcast %735 : vector<1x32xf32> to vector<32x32xf32>
    %757 = arith.mulf %755, %756 : vector<32x32xf32>
    %758 = vector.broadcast %737 : vector<1x32xf32> to vector<32x32xf32>
    %759 = arith.addf %757, %758 : vector<32x32xf32>
    %c0_327 = arith.constant 0 : index
    %c0_328 = arith.constant 0 : index
    %760 = vector.load %arg13[%c0_327, %c0_328] : memref<32x128xf32, #tpu.memory_space<vmem>>, vector<32x128xf32>
    %cst_329 = arith.constant dense<0.000000e+00> : vector<32x128xf32>
    %761 = tpu.matmul %759, %760, %cst_329 {dimension_numbers = #tpu.dot_dimension_numbers<[1], [0], [0], [1], [0, 0, 1, 1], [], []>} : vector<32x32xf32>, vector<32x128xf32>, vector<32x128xf32> -> vector<32x128xf32>
    %c0_330 = arith.constant 0 : index
    %c0_331 = arith.constant 0 : index
    %762 = vector.load %arg12[%c0_330, %c0_331] : memref<1x128xf32, #tpu.memory_space<vmem>>, vector<1x128xf32>
    %763 = vector.broadcast %762 : vector<1x128xf32> to vector<32x128xf32>
    %764 = arith.addf %761, %763 : vector<32x128xf32>
    %c0_332 = arith.constant 0 : index
    %c0_333 = arith.constant 0 : index
    %765 = vector.load %arg42[%c0_332, %c0_333] : memref<32x128xf32, #tpu.memory_space<vmem>>, vector<32x128xf32>
    tpu.vector_store %arg42[%c0_332, %c0_333], %764 {strides = array<i32>} : memref<32x128xf32, #tpu.memory_space<vmem>>, vector<32x128xf32>,
    return
  }
}

</mosaic_0001>

<bundles_post_ra>
// kernel: git_forward.1
= control target key start
LH: loop header
LB: loop body
LE: loop exit
PB: predicated region body
PF: predicated region fallthrough
CT: control target
= control target key end

     0   :  { %s4034_s3 = smov 34   ;;  %vm204_vm0 = vcmask 523264   ;;  %s4035_s10 = smov 1   ;;  %vm259_vm1 = vcmask 261120   ;;  %v4036_v32 = vmov 32.0   ;;  %vm421_vm9 = vcmask 130048   ;;  %s5210_s0 = inlined_call_operand.smem [shape: u32[43], index: -1, kind: input, shape index: {}] }
   0x1   :  { %s4090_s6 = sld [smem:[%s5210_s0 + %s4034_s3]]   ;;  %3838 = vrcp.f32 %v4036_v32  ;;  %s4037_s14 = smov 38   ;;  %vm446_vm10 = vcmask 64512  }
   0x2   :  { %s4107_s9 = sld [smem:[%s5210_s0]]   ;;  %s4038_s18 = smov 37  }
   0x3   :  { %s4127_s13 = sld [smem:[%s5210_s0 + %s4035_s10]]   ;;  %s4039_s22 = smov 31  }
   0x4   :  { %s3514_s17 = sld [smem:[%s5210_s0 + %s4037_s14]]   ;;  %s4040_s26 = smov 30  }
   0x5   :  { %s3513_s21 = sld [smem:[%s5210_s0 + %s4038_s18]]   ;;  %s4041_s30 = smov 39  }
   0x6   :  { %s4158_s25 = sld [smem:[%s5210_s0 + %s4039_s22]]   ;;  %s4042_s4 = smov 40  }
   0x7   :  { %v193_v0 = vld [vmem:[%s4090_s6 + $0x78] sm:$0xff]  ;;  %v192_v1 = vld [vmem:[%s4090_s6 + $0x70] sm:$0xff]  ;;  %v191_v2 = vld [vmem:[%s4090_s6 + $0x68] sm:$0xff]  ;;  %v3839_v33 = vpop.eup %3838  ;;  %s4163_s29 = sld [smem:[%s5210_s0 + %s4040_s26]]   ;;  %s4043_s8 = smov 96  }
   0x8   :  { %211 = vmatpush.msra.mxu0 %v193_v0  ;;  %v201_v3 = vld [vmem:[%s4090_s6 + $0xb8] sm:$0xff]  ;;  %v190_v4 = vld [vmem:[%s4090_s6 + $0x60] sm:$0xff]  ;;  %v200_v5 = vld [vmem:[%s4090_s6 + $0xb0] sm:$0xff]  ;;  %v267_v34 = vmul.f32 32.0, %v3839_v33  ;;  %vm271_vm2 = vweird.f32 %v3839_v33  ;;  %s4168_s3 = sld [smem:[%s5210_s0 + %s4041_s30]]   ;;  %s4045_s14 = smov 112  }
   0x9   :  { %242 = vmatpush.msra.mxu1 %v201_v3  ;;  %v199_v6 = vld [vmem:[%s4090_s6 + $0xa8] sm:$0xff]  ;;  %v189_v7 = vld [vmem:[%s4090_s6 + $0x58] sm:$0xff]  ;;  %v198_v8 = vld [vmem:[%s4090_s6 + $0xa0] sm:$0xff]  ;;  %s4173_s7 = sld [smem:[%s5210_s0 + %s4042_s4]]   ;;  %s4047_s15 = smov 64  }
   0xa   :  { %212 = vmatpush.msra.mxu0 %v192_v1  ;;  %v188_v9 = vld [vmem:[%s4090_s6 + $0x50] sm:$0xff]  ;;  %v197_v10 = vld [vmem:[%s4090_s6 + $0x98] sm:$0xff]  ;;  %v187_v11 = vld [vmem:[%s4090_s6 + $0x48] sm:$0xff]  ;;  %v268_v35 = vsub.f32 1.0, %v267_v34  ;;  %s4048_s16 = smov 48   ;;  %s4050_s18 = smov 41  }
   0xb   :  { %243 = vmatpush.msra.mxu1 %v200_v5  ;;  %v196_v12 = vld [vmem:[%s4090_s6 + $0x90] sm:$0xff]  ;;  %v186_v13 = vld [vmem:[%s4090_s6 + $0x40] sm:$0xff]  ;;  %v195_v14 = vld [vmem:[%s4090_s6 + $0x88] sm:$0xff]  ;;  %s4051_s22 = smov 25   ;;  %s4052_s27 = smov 33  }
   0xc   :  { %213 = vmatpush.msra.mxu0 %v191_v2  ;;  %v185_v15 = vld [vmem:[%s4090_s6 + $0x38] sm:$0xff]  ;;  %v194_v16 = vld [vmem:[%s4090_s6 + $0x80] sm:$0xff]  ;;  %v184_v17 = vld [vmem:[%s4090_s6 + $0x30] sm:$0xff]  ;;  %v269_v36 = vmul.f32 %v3839_v33, %v268_v35  ;;  %s4275_s26 = sld [smem:[%s5210_s0 + %s4051_s22]]   ;;  %s4053_s2 = smov 32  }
   0xd   :  { %244 = vmatpush.msra.mxu1 %v199_v6  ;;  %v175_v18 = vld [vmem:[%s4107_s9 + $0x8] sm:$0xff]  ;;  %v182_v20 = vld [vmem:[%s4090_s6 + $0x20] sm:$0xff]  ;;  %v181_v21 = vld [vmem:[%s4090_s6 + $0x18] sm:$0xff]  ;;  %s4291_s1 = sld [smem:[%s5210_s0 + %s4052_s27]]   ;;  %s4056_s23 = smov 29  }
   0xe   :  { %214 = vmatpush.msra.mxu0 %v190_v4  ;;  %v183_v19 = vld [vmem:[%s4090_s6 + $0x28] sm:$0xff]  ;;  %v180_v22 = vld [vmem:[%s4090_s6 + $0x10] sm:$0xff]  ;;  %v178_v24 = vld [vmem:[%s4090_s6] sm:$0xff]  ;;  %v270_v37 = vadd.f32 %v3839_v33, %v269_v36  ;;  %s4336_s28 = sld [smem:[%s5210_s0 + %s4056_s23]]   ;;  %s4057_s30 = smov 28  }
   0xf   :  { %245 = vmatpush.msra.mxu1 %v198_v8  ;;  %v179_v23 = vld [vmem:[%s4090_s6 + $0x8] sm:$0xff]  ;;  %v174_v25 = vld [vmem:[%s4107_s9] sm:$0xff]  ;;  %v381_v1 = vld [vmem:[%s4173_s7 + $0x18] sm:$0xff]  ;;  %s4300_s6 = sld [smem:[%s5210_s0 + %s4053_s2]]   ;;  %s4062_s23 = smov 2  }
  0x10   :  { %215 = vmatpush.msra.mxu0 %v189_v7  ;;  %v202_v26 = vld [vmem:[%s4127_s13] sm:$0xff]  ;;  %v4131_v38 = vsel %vm271_vm2, %v3839_v33, %v270_v37  ;;  %v380_v2 = vld [vmem:[%s4173_s7 + $0x10] sm:$0xff]  ;;  %404 = vmatpush.msra.mxu2 %v381_v1  ;;  %v379_v3 = vld [vmem:[%s4173_s7 + $0x8] sm:$0xff]  ;;  %s4353_s5 = sld [smem:[%s5210_s0 + %s4057_s30]]   ;;  %s4063_s30 = smov 9  }
  0x11   :  { %246 = vmatpush.msra.mxu1 %v197_v10  ;;  %v4142_v53 = vld [vmem:[%s3514_s17] ss:$0 sm:$0xff]  ;;  %v176_v5 = vld [vmem:[%s4107_s9 + $0x10] sm:$0xff]  ;;  %v177_v6 = vld [vmem:[%s4107_s9 + $0x18] sm:$0xff]  ;;  %s4044_s9 = smov 3   ;;  %s4049_s17 = smov 16  }
  0x12   :  { %216 = vmatpush.msra.mxu0 %v188_v9  ;;  %v4144_v56 = vld [vmem:[%s3513_s21] ss:$0 sm:$0xff]  ;;  %405 = vmatpush.msra.mxu2 %v380_v2  ;;  %s3479_s12 = sld [smem:[%s5210_s0 + %s4044_s9]]   ;;  %s4054_s9 = smov 26  }
  0x13   :  { %247 = vmatpush.msra.mxu1 %v196_v12  ;;  %v378_v4 = vld [vmem:[%s4173_s7] sm:$0xff]  ;;  %s4265_s21 = sld [smem:[%s5210_s0 + %s4050_s18]]   ;;  %s4055_s18 = smov 27  }
  0x14   :  { %217 = vmatpush.msra.mxu0 %v187_v11  ;;  %406 = vmatpush.msra.mxu2 %v379_v3  ;;  %s4312_s22 = sld [smem:[%s5210_s0 + %s4055_s18]]   ;;  %s4061_s18 = smov 21  }
  0x15   :  { %248 = vmatpush.msra.mxu1 %v195_v14  ;;  %s4074_s24 = smov 11   ;;  %s4075_s4 = smov 10  }
  0x16   :  { %218 = vmatpush.msra.mxu0 %v186_v13  ;;  %407 = vmatpush.msra.mxu2 %v378_v4  ;;  %s4832_s2 = sld [smem:[%s5210_s0 + %s4074_s24]]   ;;  %s4077_s10 = smov 14  }
  0x17   :  { %249 = vmatpush.msra.mxu1 %v194_v16  ;;  %v4184_v16 = vld [vmem:[%s4158_s25] ss:$0 sm:$0xff]  ;;  %s4897_s19 = sld [smem:[%s5210_s0 + %s4077_s10]]  }
  0x18   :  { %219 = vmatpush.msra.mxu0 %v185_v15  ;;  %3519 = vmatmul.msk.f32.vlgmr.msra.gmra.mxu1 %vm204_vm0, %v175_v18  ;;  %v4212_v37 = vld [vmem:[%s3479_s12] ss:$0 sm:$0xff]  ;;  %s4307_s12 = sld [smem:[%s5210_s0 + %s4054_s9]]   ;;  %s4060_s9 = smov 18  }
  0x19   :  { %s4914_s27 = sld [smem:[%s5210_s0 + %s4049_s17]]  }
  0x1a   :  { %220 = vmatpush.msra.mxu0 %v184_v17 }
  0x1c   :  { %221 = vmatpush.msra.mxu0 %v183_v19  ;;  %v4187_v19 = vld [vmem:[%s4163_s29] ss:$0 sm:$0xff] }
  0x1e   :  { %222 = vmatpush.msra.mxu0 %v182_v20 }
  0x20   :  { %223 = vmatpush.msra.mxu0 %v181_v21  ;;  %3520 = vmatmul.msk.f32.gmra.mxu1 %vm204_vm0, %v177_v6 }
  0x22   :  { %224 = vmatpush.msra.mxu0 %v180_v22  ;;  %v4193_v22 = vld [vmem:[%s4168_s3] ss:$0 sm:$0xff] }
  0x24   :  { %225 = vmatpush.msra.mxu0 %v179_v23 }
  0x26   :  { %226 = vmatpush.msra.mxu0 %v178_v24 }
  0x27   :  { %227 = vmatmul.f32.vlgmr.msra.gmra.mxu0 %v174_v25  ;;  %v203_v25 = vld [vmem:[%s4127_s13 + $0x8] sm:$0xff]  ;;  %s4046_s13 = smov 80  }
  0x2f   :  { %230 = vmatmul.f32.gmra.mxu0 %v176_v5 }
  0x95   :  { %v251_v28 = vpop.f32.mrf.mxu1 }
  0xa4   :  { %v228_v27 = vpop.f32.mrf.mxu0 }
  0xa5   :  { %v229_v29 = vadd.f32 %v228_v27, %v202_v26 }
  0xa7   :  { %v252_v30 = vadd.f32 %v251_v28, %v229_v29  ;;  %v254_v28 = vpop.f32.mrf.mxu1 }
  0xa9   :  { %v260_v31 = vsel %vm259_vm1, %v252_v30, 0.0 }
  0xaa   :  { %261 = vadd.xlane.f32.xlu0 %v260_v31 }
  0xac   :  { %v231_v26 = vpop.f32.mrf.mxu0 }
  0xad   :  { %v232_v27 = vadd.f32 %v231_v26, %v203_v25 }
  0xaf   :  { %v255_v29 = vadd.f32 %v254_v28, %v232_v27 }
 0x11d   :  { %v262_v39 = vpop.xlane.xlu0 %261 }
 0x11e   :  { %v273_v40 = vmul.f32 %v4131_v38, %v262_v39 }
 0x120   :  { %v275_v41 = vsub.f32 %v252_v30, %v273_v40  ;;  %v263_v30 = vsel %vm259_vm1, %v255_v29, 0.0 }
 0x122   :  { %v277_v42 = vmul.f32 %v275_v41, %v275_v41 }
 0x124   :  { %v279_v43 = vsel %vm259_vm1, %v277_v42, 0.0 }
 0x125   :  { %280 = vadd.xlane.f32.xlu0 %v279_v43 }
 0x198   :  { %v281_v44 = vpop.xlane.xlu0 %280 }
 0x199   :  { %v285_v45 = vmul.f32 %v281_v44, %v4131_v38 }
 0x19b   :  { %v287_v46 = vadd.f32 1e-05, %v285_v45 }
 0x19d   :  { %3840 = vrsqrt.f32 %v287_v46  ;;  %vm295_vm4 = vweird.f32 %v287_v46 }
 0x1a3   :  { %v3841_v47 = vpop.eup %3840 }
 0x1a4   :  { %v290_v48 = vmul.f32 %v3841_v47, %v287_v46  ;;  %vm296_vm3 = vweird.f32 %v3841_v47 }
 0x1a5   :  { %vm297_vm5 = vmor %vm295_vm4, %vm296_vm3 }
 0x1a6   :  { %v291_v49 = vmul.f32 %v3841_v47, %v290_v48 }
 0x1a8   :  { %v292_v50 = vmul.f32 0.5, %v291_v49 }
 0x1aa   :  { %v293_v51 = vsub.f32 1.5, %v292_v50 }
 0x1ac   :  { %v294_v52 = vmul.f32 %v3841_v47, %v293_v51 }
 0x1ae   :  { %v298_v54 = vsel %vm297_vm5, %v3841_v47, %v294_v52 }
 0x1af   :  { %v309_v55 = vmul.f32 %v298_v54, %v275_v41 }
 0x1b1   :  { %v314_v57 = vmul.f32 %v4142_v53, %v309_v55 }
 0x1b3   :  { %v4148_v58 = vadd.f32 %v4144_v56, %v314_v57 }
 0x1b5   :  { %v324_v59 = vsel %vm259_vm1, %v4148_v58, 0.0 }
 0x1b6   :  { %325 = vadd.xlane.f32.xlu1 %v324_v59 }
 0x229   :  { %v326_v60 = vpop.xlane.xlu1 %325 }
 0x22a   :  { %v330_v61 = vmul.f32 %v326_v60, %v4131_v38 }
 0x22c   :  { %v332_v62 = vsub.f32 %v4148_v58, %v330_v61 }
 0x22e   :  { %v334_v63 = vmul.f32 %v332_v62, %v332_v62 }
 0x230   :  { %v336_v0 = vsel %vm259_vm1, %v334_v63, 0.0 }
 0x231   :  { %337 = vadd.xlane.f32.xlu1 %v336_v0 }
 0x2a4   :  { %v338_v7 = vpop.xlane.xlu1 %337 }
 0x2a5   :  { %v342_v8 = vmul.f32 %v338_v7, %v4131_v38 }
 0x2a7   :  { %v344_v9 = vadd.f32 1e-05, %v342_v8 }
 0x2a9   :  { %3842 = vrsqrt.f32 %v344_v9  ;;  %vm352_vm7 = vweird.f32 %v344_v9 }
 0x2af   :  { %v3843_v10 = vpop.eup %3842 }
 0x2b0   :  { %v347_v11 = vmul.f32 %v3843_v10, %v344_v9  ;;  %vm353_vm6 = vweird.f32 %v3843_v10 }
 0x2b1   :  { %vm354_vm8 = vmor %vm352_vm7, %vm353_vm6 }
 0x2b2   :  { %v348_v12 = vmul.f32 %v3843_v10, %v347_v11 }
 0x2b4   :  { %v349_v13 = vmul.f32 0.5, %v348_v12 }
 0x2b6   :  { %v350_v14 = vsub.f32 1.5, %v349_v13 }
 0x2b8   :  { %v351_v15 = vmul.f32 %v3843_v10, %v350_v14 }
 0x2ba   :  { %v355_v17 = vsel %vm354_vm8, %v3843_v10, %v351_v15 }
 0x2bb   :  { %v366_v18 = vmul.f32 %v355_v17, %v332_v62 }
 0x2bd   :  { %v371_v20 = vmul.f32 %v4184_v16, %v366_v18 }
 0x2bf   :  { %v376_v21 = vadd.f32 %v4187_v19, %v371_v20 }
 0x2c1   :  { %3521 = vmatmul.msk.f32.vlgmr.msra.gmra.mxu2 %vm259_vm1, %v376_v21 }
 0x344   :  { %v409_v23 = vpop.f32.mrf.mxu2 }
 0x345   :  { %v4196_v24 = vadd.f32 %v4193_v22, %v409_v23 }
 0x347   :  { %419 = vrot.lane.b32.xlu2 %v4196_v24, %s4043_s8 }
 0x370   :  { %264 = vadd.xlane.f32.xlu2 %v263_v30 }
 0x388   :  { %484 = vrot.lane.b32.xlu2 %v4196_v24, %s4045_s14 }
 0x3a1   :  { %v420_v31 = vpop.permute.xlu2 %419 }
 0x3a2   :  { %3523 = vmatpush.xpose.msk.msra.mxu3 %vm421_vm9, %v420_v31 }
 0x3a5   :  { %3524 = vmatmul.msk.f32.vlgmr.msra.gmra.mxu3 %vm421_vm9, %v4196_v24 }
 0x3e3   :  { %v265_v32 = vpop.xlane.xlu2 %264 }
 0x3e4   :  { %v274_v33 = vmul.f32 %v4131_v38, %v265_v32 }
 0x3e6   :  { %v276_v34 = vsub.f32 %v255_v29, %v274_v33 }
 0x3e8   :  { %v278_v35 = vmul.f32 %v276_v34, %v276_v34 }
 0x3ea   :  { %v282_v36 = vsel %vm259_vm1, %v278_v35, 0.0 }
 0x3eb   :  { %283 = vadd.xlane.f32.xlu0 %v282_v36  ;;  %v485_v8 = vpop.permute.xlu2 %484 }
 0x428   :  { %v443_v39 = vpop.f32.mrf.mxu3 }
 0x429   :  { %v444_v40 = vadd.f32 %v4212_v37, %v443_v39 }
 0x42b   :  { %v447_v41 = vsel %vm446_vm10, %v444_v40, -inf }
 0x42c   :  { %448 = vmax.xlane.f32.xlu1 %v447_v41 }
 0x45e   :  { %v284_v42 = vpop.xlane.xlu0 %283 }
 0x45f   :  { %v286_v43 = vmul.f32 %v284_v42, %v4131_v38 }
 0x461   :  { %v288_v44 = vadd.f32 1e-05, %v286_v43 }
 0x463   :  { %3844 = vrsqrt.f32 %v288_v44  ;;  %vm305_vm12 = vweird.f32 %v288_v44 }
 0x469   :  { %v3845_v45 = vpop.eup %3844 }
 0x46a   :  { %v300_v46 = vmul.f32 %v3845_v45, %v288_v44  ;;  %vm306_vm11 = vweird.f32 %v3845_v45 }
 0x46b   :  { %vm307_vm13 = vmor %vm305_vm12, %vm306_vm11 }
 0x46c   :  { %v301_v47 = vmul.f32 %v3845_v45, %v300_v46 }
 0x46e   :  { %v302_v48 = vmul.f32 0.5, %v301_v47 }
 0x470   :  { %v303_v49 = vsub.f32 1.5, %v302_v48 }
 0x472   :  { %v304_v50 = vmul.f32 %v3845_v45, %v303_v49 }
 0x474   :  { %v308_v51 = vsel %vm307_vm13, %v3845_v45, %v304_v50 }
 0x475   :  { %v310_v52 = vmul.f32 %v308_v51, %v276_v34 }
 0x477   :  { %v315_v54 = vmul.f32 %v4142_v53, %v310_v52 }
 0x479   :  { %v4219_v55 = vadd.f32 %v4144_v56, %v315_v54 }
 0x47b   :  { %v327_v57 = vsel %vm259_vm1, %v4219_v55, 0.0 }
 0x47c   :  { %328 = vadd.xlane.f32.xlu1 %v327_v57 }
 0x495   :  { %486 = vrot.lane.b32.xlu1 %v4196_v24, %s4046_s13 }
 0x49f   :  { %v449_v59 = vpop.xlane.xlu1 %448 }
 0x4a0   :  { %v450_v60 = vsub.f32 %v444_v40, %v449_v59 }
 0x4a2   :  { %v451_v61 = vmul.f32 1.442695, %v450_v60 }
 0x4a4   :  { %3846 = vpow2.f32 %v451_v61 }
 0x4aa   :  { %v3847_v62 = vpop.eup %3846 }
 0x4ab   :  { %v453_v63 = vsel %vm446_vm10, %v3847_v62, 0.0 }
 0x4ac   :  { %454 = vadd.xlane.f32.xlu0 %v453_v63 }
 0x4c0   :  { %458 = vrot.lane.b32.xlu0 %v4196_v24, %s4047_s15 }
 0x4ef   :  { %v329_v53 = vpop.xlane.xlu1 %328 }
 0x4f0   :  { %v331_v56 = vmul.f32 %v329_v53, %v4131_v38  ;;  %v691_v53 = vld [vmem:[%s4265_s21 + $0x18] sm:$0xff] }
 0x4f2   :  { %v333_v0 = vsub.f32 %v4219_v55, %v331_v56  ;;  %v690_v56 = vld [vmem:[%s4265_s21 + $0x10] sm:$0xff] }
 0x4f4   :  { %v335_v1 = vmul.f32 %v333_v0, %v333_v0 }
 0x4f6   :  { %v339_v2 = vsel %vm259_vm1, %v335_v1, 0.0  ;;  %v688_v1 = vld [vmem:[%s4265_s21] sm:$0xff] }
 0x4f7   :  { %340 = vadd.xlane.f32.xlu0 %v339_v2 }
 0x507   :  { %v487_v7 = vpop.permute.xlu1 %486 }
 0x50b   :  { %523 = vrot.lane.b32.xlu0 %v4196_v24, %s4048_s16 }
 0x51f   :  { %v455_v3 = vpop.xlane.xlu0 %454 }
 0x520   :  { %3848 = vrcp.f32 %v455_v3 }
 0x526   :  { %v3849_v4 = vpop.eup %3848 }
 0x527   :  { %v457_v6 = vmul.f32 %v3849_v4, %v3847_v62 }
 0x532   :  { %v459_v5 = vpop.permute.xlu0 %458 }
 0x533   :  { %479 = vmatpush.msrb.mxu3 %v459_v5 }
 0x534   :  { %3525 = vmatmul.msk.f32.vlgmr.msrb.gmra.mxu3 %vm446_vm10, %v457_v6 }
 0x535   :  { %3526 = vmatpush.xpose.msk.msra.mxu3 %vm421_vm9, %v487_v7 }
 0x53c   :  { %3527 = vmatmul.msk.f32.vlgmr.msra.gmra.mxu3 %vm421_vm9, %v485_v8 }
 0x56a   :  { %v341_v9 = vpop.xlane.xlu0 %340 }
 0x56b   :  { %v343_v10 = vmul.f32 %v341_v9, %v4131_v38 }
 0x56d   :  { %v345_v11 = vadd.f32 1e-05, %v343_v10 }
 0x56f   :  { %3850 = vrsqrt.f32 %v345_v11  ;;  %vm362_vm15 = vweird.f32 %v345_v11 }
 0x575   :  { %v3851_v12 = vpop.eup %3850 }
 0x576   :  { %v357_v13 = vmul.f32 %v3851_v12, %v345_v11  ;;  %vm363_vm14 = vweird.f32 %v3851_v12 }
 0x577   :  { %vm364_vm2 = vmor %vm362_vm15, %vm363_vm14 }
 0x578   :  { %v358_v14 = vmul.f32 %v3851_v12, %v357_v13 }
 0x57a   :  { %v359_v15 = vmul.f32 0.5, %v358_v14 }
 0x57c   :  { %v360_v17 = vsub.f32 1.5, %v359_v15 }
 0x57d   :  { %v524_v18 = vpop.permute.xlu0 %523 }
 0x57e   :  { %v361_v20 = vmul.f32 %v3851_v12, %v360_v17  ;;  %544 = vmatpush.msrb.mxu2 %v524_v18 }
 0x580   :  { %v365_v21 = vsel %vm364_vm2, %v3851_v12, %v361_v20  ;;  %v3801_v12 = vld [vmem:[%s4275_s26] ss:$0 sm:$0xff] }
 0x581   :  { %v367_v23 = vmul.f32 %v365_v21, %v333_v0  ;;  %v689_v0 = vld [vmem:[%s4265_s21 + $0x8] sm:$0xff] }
 0x583   :  { %v372_v24 = vmul.f32 %v4184_v16, %v367_v23 }
 0x585   :  { %v377_v25 = vadd.f32 %v4187_v19, %v372_v24 }
 0x587   :  { %3522 = vmatmul.msk.f32.gmra.mxu2 %vm259_vm1, %v377_v25 }
 0x5b7   :  { %v4240_v26 = vpop.f32.mrf.mxu3 }
 0x5bf   :  { %v509_v27 = vpop.f32.mrf.mxu3 }
 0x5c0   :  { %v510_v28 = vadd.f32 %v4212_v37, %v509_v27  ;;  %v786_v27 = vld [vmem:[%s4312_s22 + $0x18] sm:$0xff] }
 0x5c2   :  { %v512_v29 = vsel %vm446_vm10, %v510_v28, -inf }
 0x5c3   :  { %513 = vmax.xlane.f32.xlu1 %v512_v29  ;;  %v784_v29 = vld [vmem:[%s4312_s22 + $0x8] sm:$0xff] }
 0x60a   :  { %v412_v30 = vpop.f32.mrf.mxu2 }
 0x60b   :  { %v413_v31 = vadd.f32 %v4193_v22, %v412_v30  ;;  %v783_v30 = vld [vmem:[%s4312_s22] sm:$0xff] }
 0x60d   :  { %620 = vrot.lane.b32.xlu0 %v413_v31, %s4046_s13  ;;  %555 = vrot.lane.b32.xlu1 %v413_v31, %s4043_s8 }
 0x636   :  { %v514_v16 = vpop.xlane.xlu1 %513 }
 0x637   :  { %v515_v32 = vsub.f32 %v510_v28, %v514_v16  ;;  %v785_v28 = vld [vmem:[%s4312_s22 + $0x10] sm:$0xff] }
 0x639   :  { %v516_v19 = vmul.f32 1.442695, %v515_v32 }
 0x63b   :  { %3852 = vpow2.f32 %v516_v19 }
 0x641   :  { %v3853_v33 = vpop.eup %3852 }
 0x642   :  { %v518_v34 = vsel %vm446_vm10, %v3853_v33, 0.0 }
 0x643   :  { %519 = vadd.xlane.f32.xlu2 %v518_v34 }
 0x65b   :  { %618 = vrot.lane.b32.xlu2 %v413_v31, %s4045_s14 }
 0x67f   :  { %v621_v35 = vpop.permute.xlu0 %620  ;;  %v556_v36 = vpop.permute.xlu1 %555 }
 0x680   :  { %3529 = vmatpush.xpose.msk.msrb.mxu3 %vm421_vm9, %v556_v36  ;;  %3532 = vmatpush.xpose.msk.msra.mxu2 %vm421_vm9, %v621_v35 }
 0x683   :  { %3530 = vmatmul.msk.f32.vlgmr.msrb.gmra.mxu3 %vm421_vm9, %v413_v31 }
 0x6b6   :  { %v520_v22 = vpop.xlane.xlu2 %519 }
 0x6b7   :  { %3854 = vrcp.f32 %v520_v22 }
 0x6bd   :  { %v3855_v39 = vpop.eup %3854 }
 0x6be   :  { %v522_v40 = vmul.f32 %v3855_v39, %v3853_v33  ;;  %v619_v41 = vpop.permute.xlu2 %618  ;;  %v4320_v39 = vld [vmem:[%s4291_s1] ss:$0 sm:$0xff] }
 0x6c0   :  { %3528 = vmatmul.msk.f32.vlgmr.msrb.gmra.mxu2 %vm446_vm10, %v522_v40 }
 0x6c1   :  { %809 = vmatpush.msrb.mxu2 %v786_v27 }
 0x6c3   :  { %810 = vmatpush.msrb.mxu2 %v785_v28 }
 0x6c5   :  { %811 = vmatpush.msrb.mxu2 %v784_v29 }
 0x6c7   :  { %812 = vmatpush.msrb.mxu2 %v783_v30 }
 0x6c8   :  { %3533 = vmatmul.msk.f32.vlgmr.msra.gmra.mxu2 %vm421_vm9, %v619_v41 }
 0x706   :  { %v578_v42 = vpop.f32.mrf.mxu3 }
 0x707   :  { %v579_v43 = vadd.f32 %v4212_v37, %v578_v42  ;;  %v4323_v42 = vld [vmem:[%s4300_s6] ss:$0 sm:$0xff] }
 0x709   :  { %v581_v44 = vsel %vm446_vm10, %v579_v43, -inf }
 0x70a   :  { %582 = vmax.xlane.f32.xlu0 %v581_v44 }
 0x743   :  { %v546_v45 = vpop.f32.mrf.mxu2 }
 0x74b   :  { %v643_v46 = vpop.f32.mrf.mxu2 }
 0x74c   :  { %v644_v47 = vadd.f32 %v4212_v37, %v643_v46 }
 0x74e   :  { %v646_v48 = vsel %vm446_vm10, %v644_v47, -inf }
 0x74f   :  { %647 = vmax.xlane.f32.xlu1 %v646_v48 }
 0x768   :  { %592 = vrot.lane.b32.xlu1 %v413_v31, %s4047_s15 }
 0x77d   :  { %v583_v49 = vpop.xlane.xlu0 %582 }
 0x77e   :  { %v584_v50 = vsub.f32 %v579_v43, %v583_v49  ;;  %v869_v49 = vld [vmem:[%s4336_s28 + $0x38] sm:$0xff] }
 0x77f   :  { %888 = vmatpush.msrb.mxu0 %v869_v49 }
 0x780   :  { %v585_v51 = vmul.f32 1.442695, %v584_v50  ;;  %v867_v50 = vld [vmem:[%s4336_s28 + $0x28] sm:$0xff] }
 0x782   :  { %3856 = vpow2.f32 %v585_v51  ;;  %v866_v51 = vld [vmem:[%s4336_s28 + $0x20] sm:$0xff] }
 0x788   :  { %v3857_v52 = vpop.eup %3856 }
 0x789   :  { %v587_v54 = vsel %vm446_vm10, %v3857_v52, 0.0 }
 0x78a   :  { %588 = vadd.xlane.f32.xlu2 %v587_v54  ;;  %v4344_v54 = vld [vmem:[%s4307_s12] ss:$0 sm:$0xff] }
 0x7a2   :  { %550 = vrot.lane.b32.xlu2 %v546_v45, %s4049_s17 }
 0x7c2   :  { %v648_v57 = vpop.xlane.xlu1 %647 }
 0x7c3   :  { %v649_v59 = vsub.f32 %v644_v47, %v648_v57  ;;  %v864_v57 = vld [vmem:[%s4336_s28 + $0x10] sm:$0xff] }
 0x7c5   :  { %v650_v60 = vmul.f32 1.442695, %v649_v59 }
 0x7c7   :  { %3858 = vpow2.f32 %v650_v60  ;;  %v863_v60 = vld [vmem:[%s4336_s28 + $0x8] sm:$0xff] }
 0x7cd   :  { %v3859_v61 = vpop.eup %3858 }
 0x7ce   :  { %v652_v62 = vsel %vm446_vm10, %v3859_v61, 0.0 }
 0x7cf   :  { %653 = vadd.xlane.f32.xlu0 %v652_v62  ;;  %v862_v62 = vld [vmem:[%s4336_s28] sm:$0xff] }
 0x7da   :  { %v593_v63 = vpop.permute.xlu1 %592 }
 0x7db   :  { %613 = vmatpush.msrb.mxu1 %v593_v63 }
 0x7dd   :  { %714 = vmatpush.msra.mxu1 %v691_v53 }
 0x7df   :  { %715 = vmatpush.msra.mxu1 %v690_v56 }
 0x7e1   :  { %716 = vmatpush.msra.mxu1 %v689_v0 }
 0x7e3   :  { %657 = vrot.lane.b32.xlu0 %v413_v31, %s4048_s16  ;;  %717 = vmatpush.msra.mxu1 %v688_v1 }
 0x7fd   :  { %v589_v2 = vpop.xlane.xlu2 %588 }
 0x7fe   :  { %3860 = vrcp.f32 %v589_v2 }
 0x804   :  { %v3861_v3 = vpop.eup %3860 }
 0x805   :  { %v591_v4 = vmul.f32 %v3861_v3, %v3857_v52  ;;  %v551_v5 = vpop.permute.xlu2 %550  ;;  %v865_v52 = vld [vmem:[%s4336_s28 + $0x18] sm:$0xff] }
 0x806   :  { %v553_v6 = vsel %vm421_vm9, %v4240_v26, %v551_v5 }
 0x807   :  { %3531 = vmatmul.msk.f32.vlgmr.msrb.gmra.mxu1 %vm446_vm10, %v591_v4 }
 0x80f   :  { %3535 = vmatmul.msk.f32.vlgmr.msra.gmra.mxu1 %vm259_vm1, %v553_v6 }
 0x842   :  { %v654_v7 = vpop.xlane.xlu0 %653 }
 0x843   :  { %3862 = vrcp.f32 %v654_v7 }
 0x849   :  { %v3863_v8 = vpop.eup %3862 }
 0x84a   :  { %v656_v9 = vmul.f32 %v3863_v8, %v3859_v61 }
 0x855   :  { %v658_v10 = vpop.permute.xlu0 %657 }
 0x856   :  { %678 = vmatpush.msra.mxu3 %v658_v10 }
 0x857   :  { %3534 = vmatmul.msk.f32.vlgmr.msra.gmra.mxu3 %vm446_vm10, %v656_v9 }
 0x884   :  { %v615_v11 = vpop.f32.mrf.mxu1 }
 0x88c   :  { %v719_v13 = vpop.f32.mrf.mxu1 }
 0x88d   :  { %v720_v14 = vadd.f32 %v3801_v12, %v719_v13 }
 0x88f   :  { %v4284_v15 = vadd.f32 %v720_v14, %v4148_v58 }
 0x891   :  { %v729_v17 = vsel %vm259_vm1, %v4284_v15, 0.0 }
 0x892   :  { %730 = vadd.xlane.f32.xlu0 %v729_v17 }
 0x8da   :  { %v680_v18 = vpop.f32.mrf.mxu3 }
 0x8db   :  { %684 = vrot.lane.b32.xlu1 %v680_v18, %s4049_s17 }
 0x905   :  { %v731_v20 = vpop.xlane.xlu0 %730 }
 0x906   :  { %v735_v21 = vmul.f32 %v731_v20, %v4131_v38  ;;  %v4360_v20 = vld [vmem:[%s4353_s5] ss:$0 sm:$0xff] }
 0x908   :  { %v737_v23 = vsub.f32 %v4284_v15, %v735_v21 }
 0x90a   :  { %v739_v58 = vmul.f32 %v737_v23, %v737_v23 }
 0x90c   :  { %v741_v24 = vsel %vm259_vm1, %v739_v58, 0.0 }
 0x90d   :  { %742 = vadd.xlane.f32.xlu1 %v741_v24 }
 0x94d   :  { %v685_v25 = vpop.permute.xlu1 %684 }
 0x94e   :  { %v687_v26 = vsel %vm421_vm9, %v615_v11, %v685_v25 }
 0x94f   :  { %3536 = vmatmul.msk.f32.gmra.mxu1 %vm259_vm1, %v687_v26 }
 0x980   :  { %v743_v31 = vpop.xlane.xlu1 %742 }
 0x981   :  { %v747_v16 = vmul.f32 %v743_v31, %v4131_v38 }
 0x983   :  { %v749_v32 = vadd.f32 1e-05, %v747_v16 }
 0x985   :  { %3864 = vrsqrt.f32 %v749_v32  ;;  %vm757_vm4 = vweird.f32 %v749_v32 }
 0x98b   :  { %v3865_v19 = vpop.eup %3864 }
 0x98c   :  { %v752_v33 = vmul.f32 %v3865_v19, %v749_v32  ;;  %vm758_vm3 = vweird.f32 %v3865_v19 }
 0x98d   :  { %vm759_vm5 = vmor %vm757_vm4, %vm758_vm3 }
 0x98e   :  { %v753_v34 = vmul.f32 %v3865_v19, %v752_v33 }
 0x990   :  { %v754_v35 = vmul.f32 0.5, %v753_v34 }
 0x992   :  { %v755_v36 = vsub.f32 1.5, %v754_v35 }
 0x994   :  { %v756_v22 = vmul.f32 %v3865_v19, %v755_v36 }
 0x996   :  { %v760_v40 = vsel %vm759_vm5, %v3865_v19, %v756_v22 }
 0x997   :  { %v771_v41 = vmul.f32 %v760_v40, %v737_v23 }
 0x999   :  { %v776_v43 = vmul.f32 %v4320_v39, %v771_v41 }
 0x99b   :  { %v781_v44 = vadd.f32 %v4323_v42, %v776_v43 }
 0x99d   :  { %3537 = vmatmul.msk.f32.vlgmr.msrb.gmra.mxu2 %vm259_vm1, %v781_v44 }
 0x9cc   :  { %v722_v45 = vpop.f32.mrf.mxu1 }
 0x9cd   :  { %v723_v46 = vadd.f32 %v3801_v12, %v722_v45 }
 0x9cf   :  { %v4329_v47 = vadd.f32 %v723_v46, %v4219_v55  ;;  %v868_v55 = vld [vmem:[%s4336_s28 + $0x30] sm:$0xff] }
 0x9d0   :  { %889 = vmatpush.msrb.mxu0 %v868_v55 }
 0x9d1   :  { %v732_v48 = vsel %vm259_vm1, %v4329_v47, 0.0 }
 0x9d2   :  { %733 = vadd.xlane.f32.xlu2 %v732_v48  ;;  %890 = vmatpush.msrb.mxu0 %v867_v50 }
 0x9d4   :  { %891 = vmatpush.msrb.mxu0 %v866_v51 }
 0x9d6   :  { %892 = vmatpush.msrb.mxu0 %v865_v52 }
 0x9d8   :  { %893 = vmatpush.msrb.mxu0 %v864_v57 }
 0x9da   :  { %894 = vmatpush.msrb.mxu0 %v863_v60 }
 0x9dc   :  { %895 = vmatpush.msrb.mxu0 %v862_v62  ;;  %v3548_v62 = vld [vmem:[%s4173_s7 + $0x38] sm:$0xff] }
 0x9dd   :  { %991 = vmatpush.msrb.mxu3 %v3548_v62 }
 0xa20   :  { %v814_v59 = vpop.f32.mrf.mxu2 }
 0xa21   :  { %v815_v61 = vadd.f32 %v4344_v54, %v814_v59 }
 0xa23   :  { %v3539_v63 = vmul.f32 -1.702, %v815_v61 }
 0xa25   :  { %v824_v53 = vmul.f32 1.442695, %v3539_v63  ;;  %v3547_v63 = vld [vmem:[%s4173_s7 + $0x30] sm:$0xff] }
 0xa26   :  { %992 = vmatpush.msrb.mxu3 %v3547_v63 }
 0xa27   :  { %3866 = vpow2.f32 %v824_v53  ;;  %v3546_v53 = vld [vmem:[%s4173_s7 + $0x28] sm:$0xff] }
 0xa28   :  { %993 = vmatpush.msrb.mxu3 %v3546_v53 }
 0xa2d   :  { %v3867_v56 = vpop.eup %3866 }
 0xa2e   :  { %v828_v0 = vadd.f32 1.0, %v3867_v56  ;;  %v3545_v56 = vld [vmem:[%s4173_s7 + $0x20] sm:$0xff] }
 0xa2f   :  { %994 = vmatpush.msrb.mxu3 %v3545_v56 }
 0xa30   :  { %3868 = vrcp.f32 %v828_v0  ;;  %v841_v4 = vand.u32 2147483648, %v828_v0  ;;  %v839_v6 = vand.u32 2147483647, %v828_v0  ;;  %vm835_vm7 = vweird.f32 %v828_v0 }
 0xa32   :  { %v842_v8 = vor.u32 1.1754944e-38, %v841_v4  ;;  %vm840_vm11 = vcmp.eq.f32.partialorder %v839_v6, 8.507059e+37 }
 0xa36   :  { %v3869_v1 = vpop.eup %3868 }
 0xa37   :  { %v831_v2 = vmul.f32 %v3869_v1, %v828_v0  ;;  %vm836_vm6 = vweird.f32 %v3869_v1 }
 0xa38   :  { %vm837_vm8 = vmor %vm835_vm7, %vm836_vm6 }
 0xa39   :  { %v832_v3 = vsub.f32 1.0, %v831_v2 }
 0xa3b   :  { %v833_v5 = vmul.f32 %v3869_v1, %v832_v3 }
 0xa3d   :  { %v834_v7 = vadd.f32 %v3869_v1, %v833_v5 }
 0xa3f   :  { %v838_v9 = vsel %vm837_vm8, %v3869_v1, %v834_v7 }
 0xa40   :  { %v843_v10 = vsel %vm840_vm11, %v842_v8, %v838_v9  ;;  %v3806_v9 = vld [vmem:[%s4158_s25 + $0x1] ss:$0 sm:$0xff]  ;;  %s4058_s25 = smov 36  }
 0xa41   :  { %v860_v11 = vmul.f32 %v843_v10, %v815_v61  ;;  %s4514_s7 = sld [smem:[%s5210_s0 + %s4058_s25]]   ;;  %s4064_s25 = smov 8  }
 0xa43   :  { %3541 = vmatmul.msk.f32.vlgmr.msrb.gmra.mxu0 %vm204_vm0, %v860_v11 }
 0xa45   :  { %v734_v12 = vpop.xlane.xlu2 %733 }
 0xa46   :  { %v736_v13 = vmul.f32 %v734_v12, %v4131_v38  ;;  %v3807_v12 = vld [vmem:[%s4163_s29 + $0x1] ss:$0 sm:$0xff] }
 0xa48   :  { %v738_v14 = vsub.f32 %v4329_v47, %v736_v13 }
 0xa4a   :  { %v740_v17 = vmul.f32 %v738_v14, %v738_v14 }
 0xa4c   :  { %v744_v18 = vsel %vm259_vm1, %v740_v17, 0.0 }
 0xa4d   :  { %745 = vadd.xlane.f32.xlu0 %v744_v18 }
 0xac0   :  { %v746_v21 = vpop.xlane.xlu0 %745  ;;  %v897_v23 = vpop.f32.mrf.mxu0 }
 0xac1   :  { %v748_v58 = vmul.f32 %v746_v21, %v4131_v38  ;;  %v898_v24 = vadd.f32 %v4360_v20, %v897_v23 }
 0xac3   :  { %v750_v25 = vadd.f32 1e-05, %v748_v58  ;;  %v4365_v26 = vadd.f32 %v898_v24, %v4284_v15  ;;  %v3808_v58 = vld [vmem:[%s4168_s3 + $0x1] ss:$0 sm:$0xff]  ;;  %s4855_s3 = sld [smem:[%s5210_s0 + %s4075_s4]]  }
 0xac5   :  { %3870 = vrsqrt.f32 %v750_v25  ;;  %v909_v27 = vsel %vm259_vm1, %v4365_v26, 0.0  ;;  %vm767_vm13 = vweird.f32 %v750_v25 }
 0xac6   :  { %910 = vadd.xlane.f32.xlu1 %v909_v27 }
 0xacb   :  { %v3871_v28 = vpop.eup %3870 }
 0xacc   :  { %v762_v29 = vmul.f32 %v3871_v28, %v750_v25  ;;  %vm768_vm12 = vweird.f32 %v3871_v28 }
 0xacd   :  { %vm769_vm14 = vmor %vm767_vm13, %vm768_vm12 }
 0xace   :  { %v763_v30 = vmul.f32 %v3871_v28, %v762_v29 }
 0xad0   :  { %v764_v31 = vmul.f32 0.5, %v763_v30 }
 0xad2   :  { %v765_v16 = vsub.f32 1.5, %v764_v31 }
 0xad4   :  { %v766_v32 = vmul.f32 %v3871_v28, %v765_v16 }
 0xad6   :  { %v770_v19 = vsel %vm769_vm14, %v3871_v28, %v766_v32 }
 0xad7   :  { %v772_v33 = vmul.f32 %v770_v19, %v738_v14 }
 0xad9   :  { %v777_v34 = vmul.f32 %v4320_v39, %v772_v33 }
 0xadb   :  { %v782_v15 = vadd.f32 %v4323_v42, %v777_v34 }
 0xadd   :  { %3538 = vmatmul.msk.f32.gmra.mxu2 %vm259_vm1, %v782_v15 }
 0xb39   :  { %v911_v35 = vpop.xlane.xlu1 %910 }
 0xb3a   :  { %v915_v36 = vmul.f32 %v911_v35, %v4131_v38 }
 0xb3c   :  { %v917_v22 = vsub.f32 %v4365_v26, %v915_v36 }
 0xb3e   :  { %v919_v40 = vmul.f32 %v917_v22, %v917_v22 }
 0xb40   :  { %v921_v41 = vsel %vm259_vm1, %v919_v40, 0.0 }
 0xb41   :  { %922 = vadd.xlane.f32.xlu0 %v921_v41 }
 0xb60   :  { %v817_v43 = vpop.f32.mrf.mxu2 }
 0xb61   :  { %v818_v44 = vadd.f32 %v4344_v54, %v817_v43 }
 0xb63   :  { %v3540_v45 = vmul.f32 -1.702, %v818_v44 }
 0xb65   :  { %v826_v46 = vmul.f32 1.442695, %v3540_v45 }
 0xb67   :  { %3872 = vpow2.f32 %v826_v46 }
 0xb6d   :  { %v3873_v39 = vpop.eup %3872 }
 0xb6e   :  { %v829_v48 = vadd.f32 1.0, %v3873_v39 }
 0xb70   :  { %3874 = vrcp.f32 %v829_v48  ;;  %v856_v50 = vand.u32 2147483648, %v829_v48  ;;  %v854_v52 = vand.u32 2147483647, %v829_v48  ;;  %vm850_vm2 = vweird.f32 %v829_v48 }
 0xb72   :  { %v857_v54 = vor.u32 1.1754944e-38, %v856_v50  ;;  %vm855_vm4 = vcmp.eq.f32.partialorder %v854_v52, 8.507059e+37 }
 0xb76   :  { %v3875_v42 = vpop.eup %3874 }
 0xb77   :  { %v846_v49 = vmul.f32 %v3875_v42, %v829_v48  ;;  %vm851_vm15 = vweird.f32 %v3875_v42 }
 0xb78   :  { %vm852_vm3 = vmor %vm850_vm2, %vm851_vm15 }
 0xb79   :  { %v847_v55 = vsub.f32 1.0, %v846_v49 }
 0xb7b   :  { %v848_v51 = vmul.f32 %v3875_v42, %v847_v55 }
 0xb7d   :  { %v849_v57 = vadd.f32 %v3875_v42, %v848_v51 }
 0xb7f   :  { %v853_v59 = vsel %vm852_vm3, %v3875_v42, %v849_v57 }
 0xb80   :  { %v858_v60 = vsel %vm855_vm4, %v857_v54, %v853_v59 }
 0xb81   :  { %v861_v61 = vmul.f32 %v858_v60, %v818_v44 }
 0xb83   :  { %3542 = vmatmul.msk.f32.gmra.mxu0 %vm204_vm0, %v861_v61 }
 0xbb4   :  { %v923_v0 = vpop.xlane.xlu0 %922 }
 0xbb5   :  { %v927_v1 = vmul.f32 %v923_v0, %v4131_v38 }
 0xbb7   :  { %v929_v2 = vadd.f32 1e-05, %v927_v1 }
 0xbb9   :  { %3876 = vrsqrt.f32 %v929_v2  ;;  %vm937_vm6 = vweird.f32 %v929_v2 }
 0xbbf   :  { %v3877_v3 = vpop.eup %3876 }
 0xbc0   :  { %v932_v4 = vmul.f32 %v3877_v3, %v929_v2  ;;  %vm938_vm5 = vweird.f32 %v3877_v3 }
 0xbc1   :  { %vm939_vm7 = vmor %vm937_vm6, %vm938_vm5 }
 0xbc2   :  { %v933_v5 = vmul.f32 %v3877_v3, %v932_v4 }
 0xbc4   :  { %v934_v6 = vmul.f32 0.5, %v933_v5 }
 0xbc6   :  { %v935_v7 = vsub.f32 1.5, %v934_v6 }
 0xbc8   :  { %v936_v8 = vmul.f32 %v3877_v3, %v935_v7 }
 0xbca   :  { %v940_v10 = vsel %vm939_vm7, %v3877_v3, %v936_v8 }
 0xbcb   :  { %v951_v11 = vmul.f32 %v940_v10, %v917_v22 }
 0xbcd   :  { %v956_v13 = vmul.f32 %v3806_v9, %v951_v11 }
 0xbcf   :  { %v961_v14 = vadd.f32 %v3807_v12, %v956_v13 }
 0xbd1   :  { %3550 = vmatmul.msk.f32.vlgmr.msrb.gmra.mxu3 %vm259_vm1, %v961_v14 }
 0xc00   :  { %v900_v17 = vpop.f32.mrf.mxu0 }
 0xc01   :  { %v901_v18 = vadd.f32 %v4360_v20, %v900_v17 }
 0xc03   :  { %v4387_v21 = vadd.f32 %v901_v18, %v4329_v47 }
 0xc05   :  { %v912_v23 = vsel %vm259_vm1, %v4387_v21, 0.0 }
 0xc06   :  { %913 = vadd.xlane.f32.xlu2 %v912_v23 }
 0xc54   :  { %v996_v24 = vpop.f32.mrf.mxu3 }
 0xc55   :  { %v4392_v25 = vadd.f32 %v3808_v58, %v996_v24 }
 0xc57   :  { %1066 = vrot.lane.b32.xlu2 %v4392_v25, %s4045_s14  ;;  %1068 = vrot.lane.b32.xlu0 %v4392_v25, %s4046_s13 }
 0xc79   :  { %v914_v27 = vpop.xlane.xlu2 %913 }
 0xc7a   :  { %v916_v20 = vmul.f32 %v914_v27, %v4131_v38  ;;  %v3566_v27 = vld [vmem:[%s4265_s21 + $0x30] sm:$0xff] }
 0xc7c   :  { %v918_v47 = vsub.f32 %v4387_v21, %v916_v20  ;;  %v3565_v20 = vld [vmem:[%s4265_s21 + $0x28] sm:$0xff] }
 0xc7e   :  { %v920_v28 = vmul.f32 %v918_v47, %v918_v47 }
 0xc80   :  { %v924_v29 = vsel %vm259_vm1, %v920_v28, 0.0 }
 0xc81   :  { %925 = vadd.xlane.f32.xlu1 %v924_v29 }
 0xc9a   :  { %1003 = vrot.lane.b32.xlu1 %v4392_v25, %s4043_s8 }
 0xcb1   :  { %v1067_v45 = vpop.permute.xlu2 %1066 }
 0xcc9   :  { %v1069_v30 = vpop.permute.xlu0 %1068 }
 0xcca   :  { %3555 = vmatpush.xpose.msk.msra.mxu3 %vm421_vm9, %v1069_v30  ;;  %v3564_v30 = vld [vmem:[%s4265_s21 + $0x20] sm:$0xff] }
 0xcf4   :  { %v926_v31 = vpop.xlane.xlu1 %925 }
 0xcf5   :  { %v928_v16 = vmul.f32 %v926_v31, %v4131_v38 }
 0xcf7   :  { %v930_v32 = vadd.f32 1e-05, %v928_v16 }
 0xcf9   :  { %3878 = vrsqrt.f32 %v930_v32  ;;  %vm947_vm11 = vweird.f32 %v930_v32 }
 0xcff   :  { %v3879_v19 = vpop.eup %3878 }
 0xd00   :  { %v942_v33 = vmul.f32 %v3879_v19, %v930_v32  ;;  %vm948_vm8 = vweird.f32 %v3879_v19 }
 0xd01   :  { %vm949_vm12 = vmor %vm947_vm11, %vm948_vm8 }
 0xd02   :  { %v943_v34 = vmul.f32 %v3879_v19, %v942_v33 }
 0xd04   :  { %v944_v15 = vmul.f32 0.5, %v943_v34 }
 0xd06   :  { %v945_v35 = vsub.f32 1.5, %v944_v15 }
 0xd08   :  { %v946_v36 = vmul.f32 %v3879_v19, %v945_v35 }
 0xd0a   :  { %v950_v22 = vsel %vm949_vm12, %v3879_v19, %v946_v36 }
 0xd0b   :  { %v952_v40 = vmul.f32 %v950_v22, %v918_v47 }
 0xd0c   :  { %v1004_v41 = vpop.permute.xlu1 %1003 }
 0xd0d   :  { %3552 = vmatpush.xpose.msk.msrb.mxu1 %vm421_vm9, %v1004_v41  ;;  %v957_v43 = vmul.f32 %v3806_v9, %v952_v40  ;;  %v3809_v41 = vld [vmem:[%s4275_s26 + $0x1] ss:$0 sm:$0xff] }
 0xd0f   :  { %v962_v44 = vadd.f32 %v3807_v12, %v957_v43 }
 0xd10   :  { %3553 = vmatmul.msk.f32.vlgmr.msrb.gmra.mxu1 %vm421_vm9, %v4392_v25 }
 0xd11   :  { %3551 = vmatmul.msk.f32.gmra.mxu3 %vm259_vm1, %v962_v44 }
 0xd19   :  { %3556 = vmatmul.msk.f32.vlgmr.msra.gmra.mxu3 %vm421_vm9, %v1067_v45 }
 0xd8d   :  { %v1026_v46 = vpop.f32.mrf.mxu1 }
 0xd8e   :  { %v1027_v39 = vadd.f32 %v4212_v37, %v1026_v46 }
 0xd90   :  { %v1029_v48 = vsel %vm446_vm10, %v1027_v39, -inf }
 0xd91   :  { %1030 = vmax.xlane.f32.xlu2 %v1029_v48 }
 0xd94   :  { %v999_v42 = vpop.f32.mrf.mxu3 }
 0xd95   :  { %v4412_v49 = vadd.f32 %v3808_v58, %v999_v42 }
 0xd97   :  { %1202 = vrot.lane.b32.xlu1 %v4412_v49, %s4046_s13 }
 0xd9c   :  { %v1091_v55 = vpop.f32.mrf.mxu3 }
 0xd9d   :  { %v1092_v50 = vadd.f32 %v4212_v37, %v1091_v55 }
 0xd9f   :  { %1200 = vrot.lane.b32.xlu1 %v4412_v49, %s4045_s14  ;;  %v1094_v51 = vsel %vm446_vm10, %v1092_v50, -inf }
 0xda0   :  { %1095 = vmax.xlane.f32.xlu0 %v1094_v51 }
 0xda9   :  { %1137 = vrot.lane.b32.xlu2 %v4412_v49, %s4043_s8 }
 0xdb4   :  { %1105 = vrot.lane.b32.xlu0 %v4392_v25, %s4048_s16 }
 0xe04   :  { %v1031_v52 = vpop.xlane.xlu2 %1030 }
 0xe05   :  { %v1032_v57 = vsub.f32 %v1027_v39, %v1031_v52 }
 0xe07   :  { %v1033_v54 = vmul.f32 1.442695, %v1032_v57 }
 0xe09   :  { %3880 = vpow2.f32 %v1033_v54  ;;  %v1203_v59 = vpop.permute.xlu1 %1202 }
 0xe0a   :  { %3561 = vmatpush.xpose.msk.msrb.mxu3 %vm421_vm9, %v1203_v59 }
 0xe0c   :  { %v1138_v60 = vpop.permute.xlu2 %1137 }
 0xe0d   :  { %3558 = vmatpush.xpose.msk.msra.mxu1 %vm421_vm9, %v1138_v60 }
 0xe0f   :  { %v3881_v61 = vpop.eup %3880 }
 0xe10   :  { %3559 = vmatmul.msk.f32.vlgmr.msra.gmra.mxu1 %vm421_vm9, %v4412_v49  ;;  %v1035_v62 = vsel %vm446_vm10, %v3881_v61, 0.0 }
 0xe11   :  { %1036 = vadd.xlane.f32.xlu0 %v1035_v62  ;;  %v1201_v63 = vpop.permute.xlu1 %1200  ;;  %v3575_v62 = vld [vmem:[%s4312_s22 + $0x30] sm:$0xff] }
 0xe12   :  { %3562 = vmatmul.msk.f32.vlgmr.msrb.gmra.mxu3 %vm421_vm9, %v1201_v63  ;;  %v3574_v63 = vld [vmem:[%s4312_s22 + $0x28] sm:$0xff] }
 0xe13   :  { %v1096_v53 = vpop.xlane.xlu0 %1095 }
 0xe14   :  { %v1097_v56 = vsub.f32 %v1092_v50, %v1096_v53  ;;  %v3573_v53 = vld [vmem:[%s4312_s22 + $0x20] sm:$0xff] }
 0xe16   :  { %v1098_v0 = vmul.f32 1.442695, %v1097_v56 }
 0xe18   :  { %3882 = vpow2.f32 %v1098_v0 }
 0xe1e   :  { %v3883_v1 = vpop.eup %3882 }
 0xe1f   :  { %v1100_v2 = vsel %vm446_vm10, %v3883_v1, 0.0 }
 0xe20   :  { %1101 = vadd.xlane.f32.xlu1 %v1100_v2 }
 0xe26   :  { %v1106_v3 = vpop.permute.xlu0 %1105 }
 0xe27   :  { %1126 = vmatpush.msra.mxu0 %v1106_v3 }
 0xe39   :  { %1040 = vrot.lane.b32.xlu1 %v4392_v25, %s4047_s15  ;;  %v3567_v25 = vld [vmem:[%s4265_s21 + $0x38] sm:$0xff]  ;;  %s4059_s21 = smov 35  }
 0xe3a   :  { %1298 = vmatpush.msrb.mxu1 %v3567_v25  ;;  %v3587_v25 = vld [vmem:[%s4336_s28 + $0x68] sm:$0xff] }
 0xe3c   :  { %1299 = vmatpush.msrb.mxu1 %v3566_v27  ;;  %v3586_v27 = vld [vmem:[%s4336_s28 + $0x60] sm:$0xff] }
 0xe3e   :  { %1300 = vmatpush.msrb.mxu1 %v3565_v20  ;;  %v3585_v20 = vld [vmem:[%s4336_s28 + $0x58] sm:$0xff] }
 0xe40   :  { %1301 = vmatpush.msrb.mxu1 %v3564_v30 }
 0xe84   :  { %v1037_v10 = vpop.xlane.xlu0 %1036 }
 0xe8d   :  { %v1160_v47 = vpop.f32.mrf.mxu1 }
 0xe8e   :  { %v1161_v28 = vadd.f32 %v4212_v37, %v1160_v47  ;;  %v4491_v47 = vld [vmem:[%s4307_s12 + $0x1] ss:$0 sm:$0xff]  ;;  %s4528_s12 = sld [smem:[%s5210_s0 + %s4060_s9]]   ;;  %s4066_s9 = smov 19  }
 0xe90   :  { %v1163_v29 = vsel %vm446_vm10, %v1161_v28, -inf }
 0xe93   :  { %v1102_v4 = vpop.xlane.xlu1 %1101 }
 0xe94   :  { %3884 = vrcp.f32 %v1102_v4 }
 0xe95   :  { %v1225_v5 = vpop.f32.mrf.mxu3  ;;  %3886 = vrcp.f32 %v1037_v10 }
 0xe96   :  { %v1226_v6 = vadd.f32 %v4212_v37, %v1225_v5 }
 0xe98   :  { %v1228_v7 = vsel %vm446_vm10, %v1226_v6, -inf }
 0xe99   :  { %1229 = vmax.xlane.f32.xlu2 %v1228_v7 }
 0xe9a   :  { %v3885_v8 = vpop.eup %3884 }
 0xe9b   :  { %v1104_v9 = vmul.f32 %v3885_v8, %v3883_v1  ;;  %v3887_v11 = vpop.eup %3886  ;;  %v4472_v8 = vld [vmem:[%s4291_s1 + $0x1] ss:$0 sm:$0xff] }
 0xe9c   :  { %v1039_v12 = vmul.f32 %v3887_v11, %v3881_v61  ;;  %v3576_v61 = vld [vmem:[%s4312_s22 + $0x38] sm:$0xff]  ;;  %v4475_v11 = vld [vmem:[%s4300_s6 + $0x1] ss:$0 sm:$0xff]  ;;  %s4521_s6 = sld [smem:[%s5210_s0 + %s4059_s21]]   ;;  %s4065_s21 = smov 20  }
 0xe9d   :  { %3557 = vmatmul.msk.f32.vlgmr.msra.gmra.mxu0 %vm446_vm10, %v1104_v9  ;;  %s3497_s22 = sld [smem:[%s5210_s0 + %s4061_s18]]   ;;  %s4067_s18 = smov 22  }
 0xeab   :  { %v1041_v13 = vpop.permute.xlu1 %1040 }
 0xeac   :  { %1061 = vmatpush.msra.mxu2 %v1041_v13 }
 0xead   :  { %3554 = vmatmul.msk.f32.vlgmr.msra.gmra.mxu2 %vm446_vm10, %v1039_v12 }
 0xf0c   :  { %v1230_v14 = vpop.xlane.xlu2 %1229 }
 0xf0d   :  { %v1231_v17 = vsub.f32 %v1226_v6, %v1230_v14 }
 0xf0f   :  { %v1232_v18 = vmul.f32 1.442695, %v1231_v17 }
 0xf11   :  { %3888 = vpow2.f32 %v1232_v18 }
 0xf17   :  { %v3889_v23 = vpop.eup %3888 }
 0xf18   :  { %v1234_v58 = vsel %vm446_vm10, %v3889_v23, 0.0 }
 0xf19   :  { %1235 = vadd.xlane.f32.xlu0 %v1234_v58  ;;  %v3589_v58 = vld [vmem:[%s4336_s28 + $0x78] sm:$0xff] }
 0xf1a   :  { %v1128_v24 = vpop.f32.mrf.mxu0  ;;  %1478 = vmatpush.msra.mxu3 %v3589_v58 }
 0xf1b   :  { %1132 = vrot.lane.b32.xlu1 %v1128_v24, %s4049_s17  ;;  %v3588_v24 = vld [vmem:[%s4336_s28 + $0x70] sm:$0xff] }
 0xf1c   :  { %1479 = vmatpush.msra.mxu3 %v3588_v24 }
 0xf1e   :  { %1480 = vmatpush.msra.mxu3 %v3587_v25 }
 0xf20   :  { %1481 = vmatpush.msra.mxu3 %v3586_v27 }
 0xf22   :  { %1482 = vmatpush.msra.mxu3 %v3585_v20 }
 0xf2d   :  { %1239 = vrot.lane.b32.xlu0 %v4412_v49, %s4048_s16 }
 0xf30   :  { %v1063_v31 = vpop.f32.mrf.mxu2 }
 0xf45   :  { %1164 = vmax.xlane.f32.xlu1 %v1163_v29  ;;  %v3583_v29 = vld [vmem:[%s4336_s28 + $0x48] sm:$0xff] }
 0xf8c   :  { %v1236_v19 = vpop.xlane.xlu0 %1235 }
 0xf8d   :  { %v1133_v16 = vpop.permute.xlu1 %1132  ;;  %3890 = vrcp.f32 %v1236_v19 }
 0xf8e   :  { %v1135_v32 = vsel %vm421_vm9, %v1063_v31, %v1133_v16  ;;  %v3582_v31 = vld [vmem:[%s4336_s28 + $0x40] sm:$0xff] }
 0xf8f   :  { %3569 = vmatmul.msk.f32.vlgmr.msrb.gmra.mxu1 %vm259_vm1, %v1135_v32 }
 0xf93   :  { %v3891_v33 = vpop.eup %3890 }
 0xf94   :  { %v1238_v34 = vmul.f32 %v3891_v33, %v3889_v23 }
 0xf9f   :  { %v1240_v15 = vpop.permute.xlu0 %1239 }
 0xfa0   :  { %1260 = vmatpush.msrb.mxu0 %v1240_v15 }
 0xfa1   :  { %3563 = vmatmul.msk.f32.vlgmr.msrb.gmra.mxu0 %vm446_vm10, %v1238_v34 }
 0xfb8   :  { %v1165_v37 = vpop.xlane.xlu1 %1164 }
 0xfb9   :  { %v1166_v35 = vsub.f32 %v1161_v28, %v1165_v37 }
 0xfbb   :  { %v1167_v36 = vmul.f32 1.442695, %v1166_v35 }
 0xfbd   :  { %3892 = vpow2.f32 %v1167_v36 }
 0xfc3   :  { %v3893_v22 = vpop.eup %3892 }
 0xfc4   :  { %v1169_v40 = vsel %vm446_vm10, %v3893_v22, 0.0 }
 0xfc5   :  { %1170 = vadd.xlane.f32.xlu2 %v1169_v40 }
 0xfdd   :  { %1174 = vrot.lane.b32.xlu2 %v4412_v49, %s4047_s15 }
0x100c   :  { %v1303_v43 = vpop.f32.mrf.mxu1 }
0x100d   :  { %v1304_v44 = vadd.f32 %v3809_v41, %v1303_v43 }
0x100f   :  { %v4455_v45 = vadd.f32 %v1304_v44, %v4365_v26 }
0x1011   :  { %v1315_v46 = vsel %vm259_vm1, %v4455_v45, 0.0 }
0x1012   :  { %1316 = vadd.xlane.f32.xlu0 %v1315_v46 }
0x101e   :  { %v1262_v39 = vpop.f32.mrf.mxu0 }
0x101f   :  { %1266 = vrot.lane.b32.xlu2 %v1262_v39, %s4049_s17 }
0x1038   :  { %v1171_v48 = vpop.xlane.xlu2 %1170 }
0x1039   :  { %3894 = vrcp.f32 %v1171_v48 }
0x103f   :  { %v3895_v42 = vpop.eup %3894 }
0x1040   :  { %v1173_v55 = vmul.f32 %v3895_v42, %v3893_v22  ;;  %v1175_v49 = vpop.permute.xlu2 %1174 }
0x1041   :  { %1195 = vmatpush.msrb.mxu2 %v1175_v49 }
0x1042   :  { %3560 = vmatmul.msk.f32.vlgmr.msrb.gmra.mxu2 %vm446_vm10, %v1173_v55 }
0x1043   :  { %1397 = vmatpush.msra.mxu2 %v3576_v61 }
0x1045   :  { %1398 = vmatpush.msra.mxu2 %v3575_v62 }
0x1047   :  { %1399 = vmatpush.msra.mxu2 %v3574_v63 }
0x1049   :  { %1400 = vmatpush.msra.mxu2 %v3573_v53 }
0x1079   :  { %v1267_v54 = vpop.permute.xlu2 %1266 }
0x1085   :  { %v1317_v26 = vpop.xlane.xlu0 %1316 }
0x1086   :  { %v1321_v50 = vmul.f32 %v1317_v26, %v4131_v38 }
0x1088   :  { %v1323_v51 = vsub.f32 %v4455_v45, %v1321_v50 }
0x108a   :  { %v1325_v52 = vmul.f32 %v1323_v51, %v1323_v51 }
0x108c   :  { %v1327_v57 = vsel %vm259_vm1, %v1325_v52, 0.0 }
0x108d   :  { %1328 = vadd.xlane.f32.xlu1 %v1327_v57  ;;  %v4503_v57 = vld [vmem:[%s4353_s5 + $0x1] ss:$0 sm:$0xff]  ;;  %s4566_s5 = sld [smem:[%s5210_s0 + %s4063_s30]]  }
0x10c5   :  { %v1197_v59 = vpop.f32.mrf.mxu2 }
0x10c6   :  { %v1269_v60 = vsel %vm421_vm9, %v1197_v59, %v1267_v54 }
0x10c7   :  { %3570 = vmatmul.msk.f32.gmra.mxu1 %vm259_vm1, %v1269_v60 }
0x1100   :  { %v1329_v56 = vpop.xlane.xlu1 %1328 }
0x1101   :  { %v1333_v0 = vmul.f32 %v1329_v56, %v4131_v38 }
0x1103   :  { %v1335_v1 = vadd.f32 1e-05, %v1333_v0 }
0x1105   :  { %3896 = vrsqrt.f32 %v1335_v1  ;;  %vm1343_vm13 = vweird.f32 %v1335_v1 }
0x110b   :  { %v3897_v2 = vpop.eup %3896 }
0x110c   :  { %v1338_v3 = vmul.f32 %v3897_v2, %v1335_v1  ;;  %vm1344_vm10 = vweird.f32 %v3897_v2 }
0x110d   :  { %vm1345_vm14 = vmor %vm1343_vm13, %vm1344_vm10 }
0x110e   :  { %v1339_v4 = vmul.f32 %v3897_v2, %v1338_v3 }
0x1110   :  { %v1340_v5 = vmul.f32 0.5, %v1339_v4 }
0x1112   :  { %v1341_v6 = vsub.f32 1.5, %v1340_v5 }
0x1114   :  { %v1342_v7 = vmul.f32 %v3897_v2, %v1341_v6 }
0x1116   :  { %v1346_v9 = vsel %vm1345_vm14, %v3897_v2, %v1342_v7 }
0x1117   :  { %v1357_v10 = vmul.f32 %v1346_v9, %v1323_v51 }
0x1119   :  { %v1362_v12 = vmul.f32 %v4472_v8, %v1357_v10 }
0x111b   :  { %v1367_v13 = vadd.f32 %v4475_v11, %v1362_v12 }
0x111d   :  { %3578 = vmatmul.msk.f32.vlgmr.msra.gmra.mxu2 %vm259_vm1, %v1367_v13 }
0x1144   :  { %v1306_v14 = vpop.f32.mrf.mxu1 }
0x1145   :  { %v1307_v17 = vadd.f32 %v3809_v41, %v1306_v14 }
0x1147   :  { %v4481_v18 = vadd.f32 %v1307_v17, %v4387_v21  ;;  %v3584_v21 = vld [vmem:[%s4336_s28 + $0x50] sm:$0xff]  ;;  %s4543_s28 = sld [smem:[%s5210_s0 + %s4062_s23]]   ;;  %s4068_s23 = smov 23  }
0x1148   :  { %1483 = vmatpush.msra.mxu3 %v3584_v21  ;;  %s4600_s30 = sld [smem:[%s5210_s0 + %s4068_s23]]  }
0x1149   :  { %v1318_v23 = vsel %vm259_vm1, %v4481_v18, 0.0 }
0x114a   :  { %1319 = vadd.xlane.f32.xlu2 %v1318_v23  ;;  %1484 = vmatpush.msra.mxu3 %v3583_v29 }
0x114c   :  { %1485 = vmatpush.msra.mxu3 %v3582_v31  ;;  %v1553_v31 = vld [vmem:[%s3497_s22 + $0x10] sm:$0xff] }
0x11a0   :  { %v1402_v28 = vpop.f32.mrf.mxu2 }
0x11a1   :  { %v1403_v30 = vadd.f32 %v4491_v47, %v1402_v28 }
0x11a3   :  { %v3580_v16 = vmul.f32 -1.702, %v1403_v30 }
0x11a5   :  { %v1412_v32 = vmul.f32 1.442695, %v3580_v16  ;;  %v1552_v16 = vld [vmem:[%s3497_s22 + $0x8] sm:$0xff] }
0x11a7   :  { %3898 = vpow2.f32 %v1412_v32  ;;  %v1551_v32 = vld [vmem:[%s3497_s22] sm:$0xff] }
0x11ad   :  { %v3899_v19 = vpop.eup %3898 }
0x11ae   :  { %v1416_v33 = vadd.f32 1.0, %v3899_v19 }
0x11b0   :  { %3900 = vrcp.f32 %v1416_v33  ;;  %v1429_v35 = vand.u32 2147483648, %v1416_v33  ;;  %v1427_v22 = vand.u32 2147483647, %v1416_v33  ;;  %vm1423_vm2 = vweird.f32 %v1416_v33 }
0x11b2   :  { %v1430_v43 = vor.u32 1.1754944e-38, %v1429_v35  ;;  %vm1428_vm4 = vcmp.eq.f32.partialorder %v1427_v22, 8.507059e+37 }
0x11b6   :  { %v3901_v34 = vpop.eup %3900 }
0x11b7   :  { %v1419_v15 = vmul.f32 %v3901_v34, %v1416_v33  ;;  %vm1424_vm15 = vweird.f32 %v3901_v34 }
0x11b8   :  { %vm1425_vm3 = vmor %vm1423_vm2, %vm1424_vm15 }
0x11b9   :  { %v1420_v37 = vsub.f32 1.0, %v1419_v15 }
0x11bb   :  { %v1421_v36 = vmul.f32 %v3901_v34, %v1420_v37 }
0x11bd   :  { %v1422_v40 = vadd.f32 %v3901_v34, %v1421_v36  ;;  %v1320_v41 = vpop.xlane.xlu2 %1319 }
0x11be   :  { %v1322_v44 = vmul.f32 %v1320_v41, %v4131_v38  ;;  %v4535_v41 = vld [vmem:[%s4514_s7] ss:$0 sm:$0xff]  ;;  %s4571_s7 = sld [smem:[%s5210_s0 + %s4064_s25]]   ;;  %s4070_s25 = smov 24  }
0x11bf   :  { %v1426_v46 = vsel %vm1425_vm3, %v3901_v34, %v1422_v40 }
0x11c0   :  { %v1431_v39 = vsel %vm1428_vm4, %v1430_v43, %v1426_v46  ;;  %v1324_v48 = vsub.f32 %v4481_v18, %v1322_v44  ;;  %v3815_v46 = vld [vmem:[%s4521_s6] ss:$0 sm:$0xff]  ;;  %s4576_s6 = sld [smem:[%s5210_s0 + %s4065_s21]]   ;;  %s4071_s21 = smov 7  }
0x11c1   :  { %v1448_v42 = vmul.f32 %v1431_v39, %v1403_v30  ;;  %v1554_v30 = vld [vmem:[%s3497_s22 + $0x18] sm:$0xff]  ;;  %s4595_s22 = sld [smem:[%s5210_s0 + %s4067_s18]]   ;;  %s4073_s18 = smov 5  }
0x11c2   :  { %v1326_v55 = vmul.f32 %v1324_v48, %v1324_v48  ;;  %1577 = vmatpush.msra.mxu0 %v1554_v30  ;;  %v1704_v30 = vld [vmem:[%s4600_s30] sm:$0xff]  ;;  %s4827_s23 = sld [smem:[%s5210_s0 + %s4073_s18]]  }
0x11c3   :  { %3591 = vmatmul.msk.f32.vlgmr.msra.gmra.mxu3 %vm204_vm0, %v1448_v42 }
0x11c4   :  { %v1330_v49 = vsel %vm259_vm1, %v1326_v55, 0.0  ;;  %1578 = vmatpush.msra.mxu0 %v1553_v31 }
0x11c5   :  { %1331 = vadd.xlane.f32.xlu1 %v1330_v49 }
0x11c6   :  { %1579 = vmatpush.msra.mxu0 %v1552_v16 }
0x11c8   :  { %1580 = vmatpush.msra.mxu0 %v1551_v32 }
0x1238   :  { %v1332_v26 = vpop.xlane.xlu1 %1331 }
0x1239   :  { %v1334_v50 = vmul.f32 %v1332_v26, %v4131_v38 }
0x123b   :  { %v1336_v51 = vadd.f32 1e-05, %v1334_v50  ;;  %v1644_v50 = vld [vmem:[%s4543_s28] sm:$0xff] }
0x123d   :  { %3902 = vrsqrt.f32 %v1336_v51  ;;  %vm1353_vm6 = vweird.f32 %v1336_v51 }
0x1243   :  { %v3903_v52 = vpop.eup %3902 }
0x1244   :  { %v1348_v54 = vmul.f32 %v3903_v52, %v1336_v51  ;;  %vm1354_vm5 = vweird.f32 %v3903_v52  ;;  %v1648_v51 = vsel %vm259_vm1, %v1644_v50, 0.0 }
0x1245   :  { %vm1355_vm7 = vmor %vm1353_vm6, %vm1354_vm5 }
0x1246   :  { %v1349_v59 = vmul.f32 %v3903_v52, %v1348_v54  ;;  %v1487_v60 = vpop.f32.mrf.mxu3 }
0x1247   :  { %v1488_v61 = vadd.f32 %v4503_v57, %v1487_v60 }
0x1248   :  { %v1350_v62 = vmul.f32 0.5, %v1349_v59 }
0x1249   :  { %v1493_v63 = vadd.f32 %v1488_v61, %v4455_v45 }
0x124a   :  { %v1351_v53 = vsub.f32 1.5, %v1350_v62 }
0x124b   :  { %v1497_v56 = vsel %vm259_vm1, %v1493_v63, 0.0 }
0x124c   :  { %v1352_v0 = vmul.f32 %v3903_v52, %v1351_v53  ;;  %1498 = vadd.xlane.f32.xlu1 %v1497_v56 }
0x124e   :  { %v1356_v1 = vsel %vm1355_vm7, %v3903_v52, %v1352_v0  ;;  %v4551_v52 = vld [vmem:[%s4528_s12] ss:$0 sm:$0xff]  ;;  %s4587_s12 = sld [smem:[%s5210_s0 + %s4066_s9]]   ;;  %s4072_s9 = smov 6  }
0x124f   :  { %v1358_v2 = vmul.f32 %v1356_v1, %v1324_v48 }
0x1251   :  { %v1363_v3 = vmul.f32 %v4472_v8, %v1358_v2 }
0x1253   :  { %v1368_v4 = vadd.f32 %v4475_v11, %v1363_v3 }
0x1255   :  { %3579 = vmatmul.msk.f32.gmra.mxu2 %vm259_vm1, %v1368_v4 }
0x12bf   :  { %v1499_v45 = vpop.xlane.xlu1 %1498 }
0x12c0   :  { %v1503_v5 = vmul.f32 %v1499_v45, %v4131_v38 }
0x12c2   :  { %v1505_v6 = vsub.f32 %v1493_v63, %v1503_v5 }
0x12c4   :  { %v1507_v7 = vmul.f32 %v1505_v6, %v1505_v6 }
0x12c6   :  { %v1509_v9 = vsel %vm259_vm1, %v1507_v7, 0.0 }
0x12c7   :  { %1510 = vadd.xlane.f32.xlu1 %v1509_v9 }
0x12d8   :  { %v1405_v8 = vpop.f32.mrf.mxu2 }
0x12d9   :  { %v1406_v10 = vadd.f32 %v4491_v47, %v1405_v8 }
0x12db   :  { %v3581_v11 = vmul.f32 -1.702, %v1406_v10 }
0x12dd   :  { %v1414_v12 = vmul.f32 1.442695, %v3581_v11 }
0x12df   :  { %3904 = vpow2.f32 %v1414_v12 }
0x12e5   :  { %v3905_v13 = vpop.eup %3904 }
0x12e6   :  { %v1417_v14 = vadd.f32 1.0, %v3905_v13 }
0x12e8   :  { %3906 = vrcp.f32 %v1417_v14  ;;  %v1444_v24 = vand.u32 2147483648, %v1417_v14  ;;  %v1442_v27 = vand.u32 2147483647, %v1417_v14  ;;  %vm1438_vm11 = vweird.f32 %v1417_v14 }
0x12ea   :  { %v1445_v21 = vor.u32 1.1754944e-38, %v1444_v24  ;;  %vm1443_vm10 = vcmp.eq.f32.partialorder %v1442_v27, 8.507059e+37 }
0x12ee   :  { %v3907_v17 = vpop.eup %3906 }
0x12ef   :  { %v1434_v23 = vmul.f32 %v3907_v17, %v1417_v14  ;;  %vm1439_vm8 = vweird.f32 %v3907_v17 }
0x12f0   :  { %vm1440_vm12 = vmor %vm1438_vm11, %vm1439_vm8 }
0x12f1   :  { %v1435_v58 = vsub.f32 1.0, %v1434_v23 }
0x12f3   :  { %v1436_v25 = vmul.f32 %v3907_v17, %v1435_v58 }
0x12f5   :  { %v1437_v20 = vadd.f32 %v3907_v17, %v1436_v25 }
0x12f7   :  { %v1441_v28 = vsel %vm1440_vm12, %v3907_v17, %v1437_v20 }
0x12f8   :  { %v1446_v47 = vsel %vm1443_vm10, %v1445_v21, %v1441_v28  ;;  %v1707_v21 = vld [vmem:[%s4600_s30 + $0x18] sm:$0xff] }
0x12f9   :  { %v1449_v29 = vmul.f32 %v1446_v47, %v1406_v10  ;;  %1736 = vmatpush.msra.mxu1 %v1707_v21  ;;  %v1706_v47 = vld [vmem:[%s4600_s30 + $0x10] sm:$0xff] }
0x12fb   :  { %3592 = vmatmul.msk.f32.gmra.mxu3 %vm204_vm0, %v1449_v29  ;;  %1737 = vmatpush.msra.mxu1 %v1706_v47  ;;  %v1705_v29 = vld [vmem:[%s4600_s30 + $0x8] sm:$0xff] }
0x12fd   :  { %1738 = vmatpush.msra.mxu1 %v1705_v29 }
0x12ff   :  { %1739 = vmatpush.msra.mxu1 %v1704_v30 }
0x133a   :  { %v1511_v19 = vpop.xlane.xlu1 %1510 }
0x133b   :  { %v1515_v33 = vmul.f32 %v1511_v19, %v4131_v38 }
0x133d   :  { %v1517_v34 = vadd.f32 1e-05, %v1515_v33 }
0x133f   :  { %3908 = vrsqrt.f32 %v1517_v34  ;;  %vm1525_vm14 = vweird.f32 %v1517_v34 }
0x1345   :  { %v3909_v15 = vpop.eup %3908 }
0x1346   :  { %v1520_v37 = vmul.f32 %v3909_v15, %v1517_v34  ;;  %vm1526_vm13 = vweird.f32 %v3909_v15 }
0x1347   :  { %vm1527_vm15 = vmor %vm1525_vm14, %vm1526_vm13 }
0x1348   :  { %v1521_v35 = vmul.f32 %v3909_v15, %v1520_v37 }
0x134a   :  { %v1522_v36 = vmul.f32 0.5, %v1521_v35 }
0x134c   :  { %v1523_v22 = vsub.f32 1.5, %v1522_v36 }
0x134e   :  { %v1524_v40 = vmul.f32 %v3909_v15, %v1523_v22 }
0x1350   :  { %v1528_v43 = vsel %vm1527_vm15, %v3909_v15, %v1524_v40 }
0x1351   :  { %v1539_v44 = vmul.f32 %v1528_v43, %v1505_v6 }
0x1353   :  { %v1544_v39 = vmul.f32 %v4535_v41, %v1539_v44 }
0x1355   :  { %v1549_v48 = vadd.f32 %v3815_v46, %v1544_v39 }
0x1357   :  { %3593 = vmatmul.msk.f32.vlgmr.msra.gmra.mxu0 %vm259_vm1, %v1549_v48 }
0x137e   :  { %v1490_v42 = vpop.f32.mrf.mxu3 }
0x137f   :  { %v1491_v55 = vadd.f32 %v4503_v57, %v1490_v42  ;;  %v4613_v42 = vld [vmem:[%s4587_s12] ss:$0 sm:$0xff]  ;;  %s4812_s12 = sld [smem:[%s5210_s0 + %s4072_s9]]  }
0x1381   :  { %v1494_v49 = vadd.f32 %v1491_v55, %v4481_v18 }
0x1383   :  { %v1500_v26 = vsel %vm259_vm1, %v1494_v49, 0.0 }
0x1384   :  { %1501 = vadd.xlane.f32.xlu0 %v1500_v26 }
0x138c   :  { %1649 = vadd.xlane.f32.xlu0 %v1648_v51  ;;  %v4621_v51 = vld [vmem:[%s4566_s5] ss:$0 sm:$0xff] }
0x13d4   :  { %v1582_v54 = vpop.f32.mrf.mxu0 }
0x13d5   :  { %v1583_v59 = vadd.f32 %v4551_v52, %v1582_v54 }
0x13d7   :  { %v1590_v60 = vsel %vm259_vm1, %v1583_v59, 0.0 }
0x13d8   :  { %1591 = vadd.xlane.f32.xlu1 %v1590_v60 }
0x13f7   :  { %v1502_v61 = vpop.xlane.xlu0 %1501 }
0x13f8   :  { %v1504_v57 = vmul.f32 %v1502_v61, %v4131_v38  ;;  %v1645_v61 = vld [vmem:[%s4543_s28 + $0x8] sm:$0xff]  ;;  %s4069_s28 = smov 4  }
0x13f9   :  { %s4685_s5 = sld [smem:[%s5210_s0 + %s4069_s28]]   ;;  %s4078_s28 = smov 15  }
0x13fa   :  { %v1506_v62 = vsub.f32 %v1494_v49, %v1504_v57  ;;  %v1651_v57 = vsel %vm259_vm1, %v1645_v61, 0.0  ;;  %s4925_s29 = sld [smem:[%s5210_s0 + %s4078_s28]]  }
0x13fc   :  { %v1508_v18 = vmul.f32 %v1506_v62, %v1506_v62 }
0x13fe   :  { %v1512_v63 = vsel %vm259_vm1, %v1508_v18, 0.0 }
0x13ff   :  { %v1650_v53 = vpop.xlane.xlu0 %1649  ;;  %1513 = vadd.xlane.f32.xlu1 %v1512_v63 }
0x1400   :  { %v1654_v56 = vmul.f32 %v1650_v53, %v4131_v38  ;;  %v4639_v53 = vld [vmem:[%s4595_s22] ss:$0 sm:$0xff] }
0x1402   :  { %v4558_v0 = vsub.f32 %v1644_v50, %v1654_v56 }
0x1404   :  { %v1658_v1 = vmul.f32 %v4558_v0, %v4558_v0 }
0x1406   :  { %v1660_v2 = vsel %vm259_vm1, %v1658_v1, 0.0 }
0x1407   :  { %1661 = vadd.xlane.f32.xlu1 %v1660_v2 }
0x144b   :  { %v1592_v3 = vpop.xlane.xlu1 %1591 }
0x144c   :  { %v1596_v4 = vmul.f32 %v1592_v3, %v4131_v38 }
0x144e   :  { %v4579_v45 = vsub.f32 %v1583_v59, %v1596_v4  ;;  %v4627_v59 = vld [vmem:[%s4571_s7] ss:$0 sm:$0xff]  ;;  %s4779_s7 = sld [smem:[%s5210_s0 + %s4070_s25]]  }
0x1450   :  { %v1600_v5 = vmul.f32 %v4579_v45, %v4579_v45 }
0x1452   :  { %v1602_v6 = vsel %vm259_vm1, %v1600_v5, 0.0 }
0x1453   :  { %1603 = vadd.xlane.f32.xlu0 %v1602_v6 }
0x145b   :  { %1652 = vadd.xlane.f32.xlu0 %v1651_v57 }
0x1472   :  { %v1514_v7 = vpop.xlane.xlu1 %1513 }
0x1473   :  { %v1516_v9 = vmul.f32 %v1514_v7, %v4131_v38 }
0x1475   :  { %v1518_v8 = vadd.f32 1e-05, %v1516_v9 }
0x1477   :  { %3910 = vrsqrt.f32 %v1518_v8  ;;  %vm1535_vm3 = vweird.f32 %v1518_v8 }
0x147a   :  { %v1662_v27 = vpop.xlane.xlu1 %1661 }
0x147b   :  { %v1666_v20 = vmul.f32 %v1662_v27, %v4131_v38 }
0x147d   :  { %v3911_v10 = vpop.eup %3910  ;;  %v1668_v28 = vadd.f32 1e-12, %v1666_v20 }
0x147e   :  { %v1530_v11 = vmul.f32 %v3911_v10, %v1518_v8  ;;  %vm1536_vm2 = vweird.f32 %v3911_v10 }
0x147f   :  { %vm1537_vm4 = vmor %vm1535_vm3, %vm1536_vm2  ;;  %3912 = vrsqrt.f32 %v1668_v28  ;;  %vm1676_vm5 = vweird.f32 %v1668_v28 }
0x1480   :  { %v1531_v12 = vmul.f32 %v3911_v10, %v1530_v11 }
0x1482   :  { %v1532_v13 = vmul.f32 0.5, %v1531_v12 }
0x1484   :  { %v1533_v14 = vsub.f32 1.5, %v1532_v13 }
0x1485   :  { %v3913_v16 = vpop.eup %3912 }
0x1486   :  { %v1534_v17 = vmul.f32 %v3911_v10, %v1533_v14  ;;  %v1671_v33 = vmul.f32 %v3913_v16, %v1668_v28  ;;  %vm1677_vm6 = vweird.f32 %v3913_v16 }
0x1487   :  { %vm1678_vm8 = vmor %vm1676_vm5, %vm1677_vm6 }
0x1488   :  { %v1538_v23 = vsel %vm1537_vm4, %v3911_v10, %v1534_v17  ;;  %v1672_v34 = vmul.f32 %v3913_v16, %v1671_v33 }
0x1489   :  { %v1540_v58 = vmul.f32 %v1538_v23, %v1506_v62 }
0x148a   :  { %v1673_v37 = vmul.f32 0.5, %v1672_v34 }
0x148b   :  { %v1545_v24 = vmul.f32 %v4535_v41, %v1540_v58 }
0x148c   :  { %v1674_v22 = vsub.f32 1.5, %v1673_v37 }
0x148d   :  { %v1550_v25 = vadd.f32 %v3815_v46, %v1545_v24  ;;  %v4609_v46 = vld [vmem:[%s4576_s6] ss:$0 sm:$0xff]  ;;  %s4788_s6 = sld [smem:[%s5210_s0 + %s4071_s21]]   ;;  %s4076_s21 = smov 17  }
0x148e   :  { %v1675_v43 = vmul.f32 %v3913_v16, %v1674_v22  ;;  %s4874_s9 = sld [smem:[%s5210_s0 + %s4076_s21]]  }
0x148f   :  { %3594 = vmatmul.msk.f32.gmra.mxu0 %vm259_vm1, %v1550_v25 }
0x1490   :  { %v1679_v55 = vsel %vm1678_vm8, %v3913_v16, %v1675_v43  ;;  %v4688_v43 = vld [vmem:[%s4685_s5] sm:$0xff] }
0x1491   :  { %v1690_v50 = vmul.f32 %v1679_v55, %v4558_v0 }
0x1493   :  { %v1695_v54 = vmul.f32 %v4621_v51, %v1690_v50 }
0x1495   :  { %v4630_v60 = vadd.f32 %v4627_v59, %v1695_v54 }
0x14c6   :  { %v1604_v31 = vpop.xlane.xlu0 %1603 }
0x14c7   :  { %v1608_v32 = vmul.f32 %v1604_v31, %v4131_v38 }
0x14c9   :  { %v1610_v19 = vadd.f32 1e-12, %v1608_v32 }
0x14cb   :  { %3914 = vrsqrt.f32 %v1610_v19  ;;  %vm1618_vm11 = vweird.f32 %v1610_v19 }
0x14d1   :  { %v3915_v15 = vpop.eup %3914 }
0x14d2   :  { %v1613_v35 = vmul.f32 %v3915_v15, %v1610_v19  ;;  %vm1619_vm7 = vweird.f32 %v3915_v15 }
0x14d3   :  { %vm1620_vm12 = vmor %vm1618_vm11, %vm1619_vm7 }
0x14d4   :  { %v1614_v36 = vmul.f32 %v3915_v15, %v1613_v35 }
0x14d6   :  { %v1615_v40 = vmul.f32 0.5, %v1614_v36 }
0x14d8   :  { %v1616_v41 = vsub.f32 1.5, %v1615_v40 }
0x14da   :  { %v1617_v44 = vmul.f32 %v3915_v15, %v1616_v41 }
0x14dc   :  { %v1621_v39 = vsel %vm1620_vm12, %v3915_v15, %v1617_v44 }
0x14dd   :  { %v1632_v48 = vmul.f32 %v1621_v39, %v4579_v45 }
0x14df   :  { %v1637_v49 = vmul.f32 %v4609_v46, %v1632_v48  ;;  %v4693_v48 = vld [vmem:[%s4685_s5 + $0x8] sm:$0xff] }
0x14e1   :  { %v4617_v26 = vadd.f32 %v4613_v42, %v1637_v49 }
0x14e3   :  { %3595 = vmatmul.msk.f32.vlgmr.msra.gmra.mxu1 %vm259_vm1, %v4617_v26 }
0x14eb   :  { %3596 = vmatmul.msk.f32.gmra.mxu1 %vm259_vm1, %v4630_v60 }
0x150c   :  { %v1585_v62 = vpop.f32.mrf.mxu0 }
0x150d   :  { %v1586_v18 = vadd.f32 %v4551_v52, %v1585_v62  ;;  %v1653_v52 = vpop.xlane.xlu0 %1652 }
0x150e   :  { %v1655_v45 = vmul.f32 %v1653_v52, %v4131_v38 }
0x150f   :  { %v1593_v63 = vsel %vm259_vm1, %v1586_v18, 0.0 }
0x1510   :  { %1594 = vadd.xlane.f32.xlu2 %v1593_v63  ;;  %v1657_v6 = vsub.f32 %v1645_v61, %v1655_v45 }
0x1512   :  { %v1659_v8 = vmul.f32 %v1657_v6, %v1657_v6 }
0x1514   :  { %v1663_v10 = vsel %vm259_vm1, %v1659_v8, 0.0 }
0x1560   :  { %v1741_v56 = vpop.f32.mrf.mxu1 }
0x1561   :  { %v4642_v0 = vadd.f32 %v4639_v53, %v1741_v56 }
0x1563   :  { %1755 = vrot.lane.b32.xlu2 %v4642_v0, %s4043_s8 }
0x1568   :  { %v1744_v1 = vpop.f32.mrf.mxu1 }
0x1569   :  { %v4647_v2 = vadd.f32 %v4639_v53, %v1744_v1 }
0x156b   :  { %1757 = vrot.lane.b32.xlu1 %v4647_v2, %s4043_s8  ;;  %v4713_v61 = vpack.i.bf16 %v4642_v0, %v4647_v2 }
0x1573   :  { %1853 = vrot.lane.b32.xlu1 %v4647_v2, %s4046_s13 }
0x157b   :  { %1847 = vrot.lane.b32.xlu1 %v4642_v0, %s4045_s14 }
0x1583   :  { %v1595_v3 = vpop.xlane.xlu2 %1594  ;;  %1849 = vrot.lane.b32.xlu1 %v4647_v2, %s4045_s14 }
0x1584   :  { %v1597_v4 = vmul.f32 %v1595_v3, %v4131_v38 }
0x1586   :  { %v1599_v5 = vsub.f32 %v1586_v18, %v1597_v4 }
0x1588   :  { %v1601_v7 = vmul.f32 %v1599_v5, %v1599_v5 }
0x158a   :  { %v1605_v9 = vsel %vm259_vm1, %v1601_v7, 0.0 }
0x158b   :  { %1606 = vadd.xlane.f32.xlu0 %v1605_v9 }
0x1593   :  { %1664 = vadd.xlane.f32.xlu0 %v1663_v10 }
0x15bd   :  { %v1756_v12 = vpop.permute.xlu2 %1755 }
0x15dd   :  { %v1758_v11 = vpop.permute.xlu1 %1757 }
0x15de   :  { %3599 = vmatpush.xpose.msk.msrb.mxu2 %vm421_vm9, %v1758_v11 }
0x15e2   :  { %3600 = vmatpush.xpose.msk.msrb.mxu2 %vm421_vm9, %v1756_v12 }
0x15e5   :  { %3601 = vmatmul.msk.f32.vlgmr.msrb.gmra.mxu2 %vm421_vm9, %v4642_v0  ;;  %v1854_v13 = vpop.permute.xlu1 %1853 }
0x15e6   :  { %3605 = vmatpush.xpose.msk.msrb.mxu3 %vm421_vm9, %v1854_v13 }
0x15ed   :  { %3602 = vmatmul.msk.f32.gmra.mxu2 %vm421_vm9, %v4647_v2  ;;  %v1848_v3 = vpop.permute.xlu1 %1847 }
0x15f5   :  { %v1850_v45 = vpop.permute.xlu1 %1849 }
0x15fe   :  { %v1607_v14 = vpop.xlane.xlu0 %1606 }
0x15ff   :  { %v1609_v17 = vmul.f32 %v1607_v14, %v4131_v38 }
0x1601   :  { %v1611_v23 = vadd.f32 1e-12, %v1609_v17 }
0x1603   :  { %3916 = vrsqrt.f32 %v1611_v23  ;;  %vm1628_vm13 = vweird.f32 %v1611_v23 }
0x1606   :  { %v1665_v58 = vpop.xlane.xlu0 %1664 }
0x1607   :  { %v1667_v24 = vmul.f32 %v1665_v58, %v4131_v38 }
0x1609   :  { %v3917_v25 = vpop.eup %3916  ;;  %v1669_v27 = vadd.f32 1e-12, %v1667_v24 }
0x160a   :  { %v1623_v20 = vmul.f32 %v3917_v25, %v1611_v23  ;;  %vm1629_vm10 = vweird.f32 %v3917_v25 }
0x160b   :  { %3918 = vrsqrt.f32 %v1669_v27  ;;  %vm1630_vm14 = vmor %vm1628_vm13, %vm1629_vm10  ;;  %vm1686_vm15 = vweird.f32 %v1669_v27 }
0x160c   :  { %v1624_v21 = vmul.f32 %v3917_v25, %v1623_v20 }
0x160e   :  { %v1625_v28 = vmul.f32 0.5, %v1624_v21 }
0x1610   :  { %v1626_v47 = vsub.f32 1.5, %v1625_v28 }
0x1611   :  { %v3919_v29 = vpop.eup %3918 }
0x1612   :  { %v1627_v30 = vmul.f32 %v3917_v25, %v1626_v47  ;;  %v1681_v31 = vmul.f32 %v3919_v29, %v1669_v27  ;;  %vm1687_vm2 = vweird.f32 %v3919_v29 }
0x1613   :  { %vm1688_vm3 = vmor %vm1686_vm15, %vm1687_vm2 }
0x1614   :  { %v1631_v16 = vsel %vm1630_vm14, %v3917_v25, %v1627_v30  ;;  %v1682_v32 = vmul.f32 %v3919_v29, %v1681_v31 }
0x1615   :  { %v1633_v19 = vmul.f32 %v1631_v16, %v1599_v5 }
0x1616   :  { %v1683_v33 = vmul.f32 0.5, %v1682_v32 }
0x1617   :  { %v1638_v34 = vmul.f32 %v4609_v46, %v1633_v19 }
0x1618   :  { %v1684_v15 = vsub.f32 1.5, %v1683_v33 }
0x1619   :  { %v4672_v37 = vadd.f32 %v4613_v42, %v1638_v34 }
0x161a   :  { %v1685_v35 = vmul.f32 %v3919_v29, %v1684_v15 }
0x161b   :  { %3597 = vmatmul.msk.f32.gmra.mxu1 %vm259_vm1, %v4672_v37 }
0x161c   :  { %v1689_v36 = vsel %vm1688_vm3, %v3919_v29, %v1685_v35 }
0x161d   :  { %v1691_v22 = vmul.f32 %v1689_v36, %v1657_v6 }
0x161f   :  { %v1696_v40 = vmul.f32 %v4621_v51, %v1691_v22 }
0x1621   :  { %v4678_v41 = vadd.f32 %v4627_v59, %v1696_v40 }
0x1623   :  { %3598 = vmatmul.msk.f32.gmra.mxu1 %vm259_vm1, %v4678_v41 }
0x1668   :  { %v1784_v44 = vpop.f32.mrf.mxu2 }
0x1669   :  { %v1785_v46 = vadd.f32 %v1784_v44, %v4688_v43 }
0x166b   :  { %v1790_v39 = vsel %vm421_vm9, %v1785_v46, -inf }
0x166c   :  { %1791 = vmax.xlane.f32.xlu0 %v1790_v39 }
0x1670   :  { %v1787_v42 = vpop.f32.mrf.mxu2 }
0x1671   :  { %v1788_v55 = vadd.f32 %v1787_v42, %v4693_v48 }
0x1673   :  { %v1793_v49 = vsel %vm421_vm9, %v1788_v55, -inf }
0x1674   :  { %1794 = vmax.xlane.f32.xlu2 %v1793_v49 }
0x1680   :  { %1851 = vrot.lane.b32.xlu0 %v4642_v0, %s4046_s13 }
0x1698   :  { %v1747_v50 = vpop.f32.mrf.mxu1 }
0x1699   :  { %v4700_v51 = vadd.f32 %v4639_v53, %v1747_v50 }
0x169b   :  { %2051 = vrot.lane.b32.xlu1 %v4700_v51, %s4046_s13 }
0x16a0   :  { %v1750_v54 = vpop.f32.mrf.mxu1 }
0x16a1   :  { %v4705_v59 = vadd.f32 %v4639_v53, %v1750_v54 }
0x16a3   :  { %2049 = vrot.lane.b32.xlu1 %v4705_v59, %s4045_s14  ;;  %2053 = vrot.lane.b32.xlu0 %v4705_v59, %s4046_s13 }
0x16ab   :  { %3756 = vrot.lane.b32.xlu1 %v4713_v61, %s4047_s15  ;;  %2047 = vrot.lane.b32.xlu0 %v4700_v51, %s4045_s14 }
0x16b3   :  { %1957 = vrot.lane.b32.xlu1 %v4705_v59, %s4043_s8 }
0x16df   :  { %v1792_v57 = vpop.xlane.xlu0 %1791 }
0x16e0   :  { %v1796_v62 = vsub.f32 %v1785_v46, %v1792_v57 }
0x16e2   :  { %v1798_v18 = vmul.f32 1.442695, %v1796_v62 }
0x16e4   :  { %3920 = vpow2.f32 %v1798_v18 }
0x16e7   :  { %v1795_v63 = vpop.xlane.xlu2 %1794 }
0x16e8   :  { %v1797_v53 = vsub.f32 %v1788_v55, %v1795_v63 }
0x16ea   :  { %v3921_v56 = vpop.eup %3920  ;;  %v1800_v1 = vmul.f32 1.442695, %v1797_v53  ;;  %v3765_v53 = vpack.i.bf16 %v4700_v51, %v4705_v59 }
0x16eb   :  { %v1802_v0 = vsel %vm421_vm9, %v3921_v56, 0.0 }
0x16ec   :  { %3922 = vpow2.f32 %v1800_v1  ;;  %1803 = vadd.xlane.f32.xlu0 %v1802_v0 }
0x16f2   :  { %v3923_v2 = vpop.eup %3922  ;;  %v1852_v52 = vpop.permute.xlu0 %1851 }
0x16f3   :  { %3606 = vmatpush.xpose.msk.msrb.mxu3 %vm421_vm9, %v1852_v52  ;;  %v1805_v4 = vsel %vm421_vm9, %v3923_v2, 0.0 }
0x16f4   :  { %1806 = vadd.xlane.f32.xlu2 %v1805_v4 }
0x16f6   :  { %3607 = vmatmul.msk.f32.vlgmr.msrb.gmra.mxu3 %vm421_vm9, %v1848_v3 }
0x16fe   :  { %3608 = vmatmul.msk.f32.gmra.mxu3 %vm421_vm9, %v1850_v45 }
0x170c   :  { %1955 = vrot.lane.b32.xlu2 %v4700_v51, %s4043_s8 }
0x170d   :  { %v2052_v5 = vpop.permute.xlu1 %2051 }
0x1715   :  { %v2054_v6 = vpop.permute.xlu0 %2053  ;;  %v2050_v7 = vpop.permute.xlu1 %2049 }
0x1716   :  { %3617 = vmatpush.xpose.msk.msrb.mxu1 %vm421_vm9, %v2054_v6 }
0x171a   :  { %3618 = vmatpush.xpose.msk.msrb.mxu1 %vm421_vm9, %v2052_v5 }
0x171d   :  { %v2048_v9 = vpop.permute.xlu0 %2047  ;;  %v3757_v8 = vpop.permute.xlu1 %3756 }
0x171e   :  { %v3758_v10 = vunpack.i.l.bf16 %v3757_v8  ;;  %3619 = vmatmul.msk.f32.vlgmr.msrb.gmra.mxu1 %vm421_vm9, %v2048_v9  ;;  %v3759_v11 = vunpack.i.h.bf16 %v3757_v8 }
0x1720   :  { %1838 = vmatpush.msrb.mxu0 %v3758_v10 }
0x1722   :  { %1839 = vmatpush.msrb.mxu0 %v3759_v11 }
0x1725   :  { %v1958_v12 = vpop.permute.xlu1 %1957 }
0x1726   :  { %3611 = vmatpush.xpose.msk.msra.mxu0 %vm421_vm9, %v1958_v12  ;;  %3620 = vmatmul.msk.f32.gmra.mxu1 %vm421_vm9, %v2050_v7 }
0x175f   :  { %v1804_v13 = vpop.xlane.xlu0 %1803 }
0x1760   :  { %3924 = vrcp.f32 %v1804_v13 }
0x1766   :  { %v3925_v14 = vpop.eup %3924 }
0x1767   :  { %v1810_v17 = vmul.f32 %v3925_v14, %v3921_v56  ;;  %v1807_v23 = vpop.xlane.xlu2 %1806 }
0x1768   :  { %3926 = vrcp.f32 %v1807_v23 }
0x1769   :  { %3603 = vmatmul.msk.f32.vlgmr.msrb.gmra.mxu0 %vm421_vm9, %v1810_v17 }
0x176e   :  { %v3927_v58 = vpop.eup %3926 }
0x176f   :  { %v1956_v24 = vpop.permute.xlu2 %1955  ;;  %v1811_v25 = vmul.f32 %v3927_v58, %v3923_v2 }
0x1770   :  { %3612 = vmatpush.xpose.msk.msra.mxu0 %vm421_vm9, %v1956_v24 }
0x1771   :  { %3604 = vmatmul.msk.f32.gmra.mxu0 %vm421_vm9, %v1811_v25 }
0x1779   :  { %v1880_v27 = vpop.f32.mrf.mxu3  ;;  %3613 = vmatmul.msk.f32.vlgmr.msra.gmra.mxu0 %vm421_vm9, %v4700_v51 }
0x177a   :  { %v1881_v20 = vadd.f32 %v1880_v27, %v4688_v43 }
0x177c   :  { %v1886_v21 = vsel %vm421_vm9, %v1881_v20, -inf }
0x177d   :  { %1887 = vmax.xlane.f32.xlu1 %v1886_v21 }
0x1781   :  { %v1883_v28 = vpop.f32.mrf.mxu3  ;;  %3614 = vmatmul.msk.f32.gmra.mxu0 %vm421_vm9, %v4705_v59 }
0x1782   :  { %v1884_v47 = vadd.f32 %v1883_v28, %v4693_v48 }
0x1784   :  { %v1889_v29 = vsel %vm421_vm9, %v1884_v47, -inf }
0x1785   :  { %1890 = vmax.xlane.f32.xlu2 %v1889_v29 }
0x179b   :  { %v2080_v40 = vpop.f32.mrf.mxu1 }
0x179c   :  { %v2081_v55 = vadd.f32 %v2080_v40, %v4688_v43 }
0x179e   :  { %v2086_v54 = vsel %vm421_vm9, %v2081_v55, -inf }
0x17a3   :  { %v2083_v62 = vpop.f32.mrf.mxu1 }
0x17a4   :  { %v2084_v18 = vadd.f32 %v2083_v62, %v4693_v48 }
0x17a6   :  { %v2089_v63 = vsel %vm421_vm9, %v2084_v18, -inf }
0x17e6   :  { %v4744_v30 = vpop.f32.mrf.mxu0 }
0x17ee   :  { %v4746_v31 = vpop.f32.mrf.mxu0 }
0x17f0   :  { %v1888_v16 = vpop.xlane.xlu1 %1887 }
0x17f1   :  { %v1892_v32 = vsub.f32 %v1881_v20, %v1888_v16 }
0x17f3   :  { %v1894_v19 = vmul.f32 1.442695, %v1892_v32 }
0x17f5   :  { %3928 = vpow2.f32 %v1894_v19 }
0x17f6   :  { %v1984_v33 = vpop.f32.mrf.mxu0 }
0x17f7   :  { %v1985_v34 = vadd.f32 %v1984_v33, %v4688_v43 }
0x17f8   :  { %v1891_v15 = vpop.xlane.xlu2 %1890 }
0x17f9   :  { %v1893_v35 = vsub.f32 %v1884_v47, %v1891_v15  ;;  %v1990_v36 = vsel %vm421_vm9, %v1985_v34, -inf }
0x17fa   :  { %1991 = vmax.xlane.f32.xlu1 %v1990_v36 }
0x17fb   :  { %v3929_v22 = vpop.eup %3928  ;;  %v1896_v44 = vmul.f32 1.442695, %v1893_v35 }
0x17fc   :  { %v1898_v46 = vsel %vm421_vm9, %v3929_v22, 0.0 }
0x17fd   :  { %3930 = vpow2.f32 %v1896_v44  ;;  %1899 = vadd.xlane.f32.xlu0 %v1898_v46 }
0x17fe   :  { %v1987_v39 = vpop.f32.mrf.mxu0 }
0x17ff   :  { %v1988_v42 = vadd.f32 %v1987_v39, %v4693_v48 }
0x1801   :  { %v1993_v49 = vsel %vm421_vm9, %v1988_v42, -inf }
0x1802   :  { %1994 = vmax.xlane.f32.xlu2 %v1993_v49  ;;  %v2156_v49 = vld [vmem:[%s4779_s7 + $0x18] sm:$0xff] }
0x1803   :  { %v3931_v50 = vpop.eup %3930  ;;  %2185 = vmatpush.msrb.mxu0 %v2156_v49 }
0x1804   :  { %v1901_v57 = vsel %vm421_vm9, %v3931_v50, 0.0 }
0x1805   :  { %2087 = vmax.xlane.f32.xlu0 %v2086_v54  ;;  %1902 = vadd.xlane.f32.xlu1 %v1901_v57  ;;  %v2154_v54 = vld [vmem:[%s4779_s7 + $0x8] sm:$0xff]  ;;  %v2153_v57 = vld [vmem:[%s4779_s7] sm:$0xff] }
0x180d   :  { %2090 = vmax.xlane.f32.xlu0 %v2089_v63 }
0x181a   :  { %3766 = vrot.lane.b32.xlu2 %v3765_v53, %s4048_s16 }
0x1821   :  { %3761 = vrot.lane.b32.xlu0 %v4713_v61, %s4048_s16 }
0x186d   :  { %v1992_v43 = vpop.xlane.xlu1 %1991 }
0x186e   :  { %v1996_v56 = vsub.f32 %v1985_v34, %v1992_v43 }
0x1870   :  { %v1998_v1 = vmul.f32 1.442695, %v1996_v56  ;;  %v1900_v0 = vpop.xlane.xlu0 %1899 }
0x1872   :  { %3932 = vpow2.f32 %v1998_v1 }
0x1875   :  { %v1995_v2 = vpop.xlane.xlu2 %1994 }
0x1876   :  { %v1997_v52 = vsub.f32 %v1988_v42, %v1995_v2 }
0x1878   :  { %v3933_v3 = vpop.eup %3932  ;;  %v2000_v48 = vmul.f32 1.442695, %v1997_v52  ;;  %v2088_v4 = vpop.xlane.xlu0 %2087 }
0x1879   :  { %v2092_v45 = vsub.f32 %v2081_v55, %v2088_v4  ;;  %v2002_v5 = vsel %vm421_vm9, %v3933_v3, 0.0  ;;  %v1903_v13 = vpop.xlane.xlu1 %1902 }
0x187a   :  { %3934 = vpow2.f32 %v2000_v48  ;;  %2003 = vadd.xlane.f32.xlu0 %v2002_v5 }
0x187b   :  { %v2094_v51 = vmul.f32 1.442695, %v2092_v45 }
0x187d   :  { %3936 = vpow2.f32 %v2094_v51  ;;  %v3767_v58 = vpop.permute.xlu2 %3766 }
0x187e   :  { %v3768_v27 = vunpack.i.l.bf16 %v3767_v58  ;;  %v3769_v20 = vunpack.i.h.bf16 %v3767_v58 }
0x1880   :  { %v3935_v59 = vpop.eup %3934  ;;  %v2091_v6 = vpop.xlane.xlu0 %2090 }
0x1881   :  { %v2093_v61 = vsub.f32 %v2084_v18, %v2091_v6  ;;  %v2005_v7 = vsel %vm421_vm9, %v3935_v59, 0.0 }
0x1882   :  { %2006 = vadd.xlane.f32.xlu2 %v2005_v7 }
0x1883   :  { %v3937_v9 = vpop.eup %3936  ;;  %v2096_v8 = vmul.f32 1.442695, %v2093_v61 }
0x1884   :  { %v2098_v10 = vsel %vm421_vm9, %v3937_v9, 0.0 }
0x1885   :  { %3938 = vpow2.f32 %v2096_v8  ;;  %2099 = vadd.xlane.f32.xlu1 %v2098_v10 }
0x1886   :  { %3940 = vrcp.f32 %v1900_v0 }
0x1887   :  { %3942 = vrcp.f32 %v1903_v13 }
0x188b   :  { %v3939_v11 = vpop.eup %3938 }
0x188c   :  { %v2101_v12 = vsel %vm421_vm9, %v3939_v11, 0.0  ;;  %v3941_v17 = vpop.eup %3940 }
0x188d   :  { %2102 = vadd.xlane.f32.xlu1 %v2101_v12  ;;  %v1906_v25 = vmul.f32 %v3941_v17, %v3929_v22  ;;  %v3943_v21 = vpop.eup %3942 }
0x188e   :  { %v1907_v28 = vmul.f32 %v3943_v21, %v3931_v50  ;;  %v2155_v50 = vld [vmem:[%s4779_s7 + $0x10] sm:$0xff] }
0x188f   :  { %2186 = vmatpush.msrb.mxu0 %v2155_v50 }
0x1891   :  { %2187 = vmatpush.msrb.mxu0 %v2154_v54 }
0x1893   :  { %v3762_v14 = vpop.permute.xlu0 %3761  ;;  %2188 = vmatpush.msrb.mxu0 %v2153_v57 }
0x1894   :  { %v3763_v23 = vunpack.i.l.bf16 %v3762_v14  ;;  %v3764_v24 = vunpack.i.h.bf16 %v3762_v14 }
0x1896   :  { %1934 = vmatpush.msra.mxu2 %v3763_v23 }
0x1898   :  { %1935 = vmatpush.msra.mxu2 %v3764_v24 }
0x1899   :  { %3609 = vmatmul.msk.f32.vlgmr.msra.gmra.mxu2 %vm421_vm9, %v1906_v25 }
0x189a   :  { %2134 = vmatpush.msrb.mxu2 %v3768_v27 }
0x189c   :  { %2135 = vmatpush.msrb.mxu2 %v3769_v20 }
0x18a1   :  { %3610 = vmatmul.msk.f32.gmra.mxu2 %vm421_vm9, %v1907_v28 }
0x18a6   :  { %3771 = vrot.lane.b32.xlu1 %v3765_v53, %s4047_s15 }
0x18ed   :  { %v2004_v34 = vpop.xlane.xlu0 %2003 }
0x18f5   :  { %v2007_v15 = vpop.xlane.xlu2 %2006 }
0x18f8   :  { %v2100_v47 = vpop.xlane.xlu1 %2099 }
0x18f9   :  { %3944 = vrcp.f32 %v2100_v47 }
0x18ff   :  { %v3945_v29 = vpop.eup %3944 }
0x1900   :  { %v2106_v16 = vmul.f32 %v3945_v29, %v3937_v9  ;;  %v2103_v32 = vpop.xlane.xlu1 %2102 }
0x1901   :  { %3946 = vrcp.f32 %v2103_v32  ;;  %v2313_v32 = vld [vmem:[%s4832_s2 + $0x18] sm:$0xff] }
0x1902   :  { %3621 = vmatmul.msk.f32.vlgmr.msrb.gmra.mxu2 %vm421_vm9, %v2106_v16  ;;  %3948 = vrcp.f32 %v2004_v34 }
0x1903   :  { %3950 = vrcp.f32 %v2007_v15  ;;  %v2311_v15 = vld [vmem:[%s4832_s2 + $0x8] sm:$0xff] }
0x1907   :  { %v3947_v19 = vpop.eup %3946 }
0x1908   :  { %v2107_v33 = vmul.f32 %v3947_v19, %v3939_v11  ;;  %v3949_v36 = vpop.eup %3948 }
0x1909   :  { %v2010_v44 = vmul.f32 %v3949_v36, %v3933_v3  ;;  %v3951_v39 = vpop.eup %3950  ;;  %v2310_v36 = vld [vmem:[%s4832_s2] sm:$0xff] }
0x190a   :  { %3622 = vmatmul.msk.f32.gmra.mxu2 %vm421_vm9, %v2107_v33  ;;  %v2011_v55 = vmul.f32 %v3951_v39, %v3935_v59  ;;  %v2312_v33 = vld [vmem:[%s4832_s2 + $0x10] sm:$0xff] }
0x1918   :  { %v3772_v35 = vpop.permute.xlu1 %3771 }
0x1919   :  { %v3773_v22 = vunpack.i.l.bf16 %v3772_v35  ;;  %v3774_v40 = vunpack.i.h.bf16 %v3772_v35 }
0x191b   :  { %2038 = vmatpush.msra.mxu3 %v3773_v22 }
0x191c   :  { %v1937_v46 = vpop.f32.mrf.mxu2 }
0x191d   :  { %1945 = vrot.lane.b32.xlu1 %v1937_v46, %s4049_s17  ;;  %2039 = vmatpush.msra.mxu3 %v3774_v40 }
0x191e   :  { %3615 = vmatmul.msk.f32.vlgmr.msra.gmra.mxu3 %vm421_vm9, %v2010_v44 }
0x191f   :  { %2342 = vmatpush.msrb.mxu3 %v2313_v32  ;;  %v2401_v32 = vld [vmem:[%s4874_s9 + $0x30] sm:$0xff] }
0x1921   :  { %2343 = vmatpush.msrb.mxu3 %v2312_v33  ;;  %v2399_v33 = vld [vmem:[%s4874_s9 + $0x20] sm:$0xff] }
0x1923   :  { %2344 = vmatpush.msrb.mxu3 %v2311_v15  ;;  %v2398_v15 = vld [vmem:[%s4874_s9 + $0x18] sm:$0xff] }
0x1924   :  { %v1940_v42 = vpop.f32.mrf.mxu2 }
0x1925   :  { %1947 = vrot.lane.b32.xlu1 %v1940_v42, %s4049_s17  ;;  %2345 = vmatpush.msrb.mxu3 %v2310_v36  ;;  %v2395_v36 = vld [vmem:[%s4874_s9] sm:$0xff] }
0x1926   :  { %3616 = vmatmul.msk.f32.gmra.mxu3 %vm421_vm9, %v2011_v55 }
0x1985   :  { %v2137_v62 = vpop.f32.mrf.mxu2 }
0x1986   :  { %2145 = vrot.lane.b32.xlu0 %v2137_v62, %s4049_s17 }
0x198d   :  { %v2140_v18 = vpop.f32.mrf.mxu2 }
0x198e   :  { %2147 = vrot.lane.b32.xlu1 %v2140_v18, %s4049_s17 }
0x198f   :  { %v1946_v63 = vpop.permute.xlu1 %1945 }
0x1990   :  { %v1951_v53 = vsel %vm421_vm9, %v4744_v30, %v1946_v63  ;;  %v3822_v30 = vld [vmem:[%s4788_s6] ss:$0 sm:$0xff] }
0x1991   :  { %3623 = vmatmul.msk.f32.vlgmr.msrb.gmra.mxu0 %vm259_vm1, %v1951_v53  ;;  %v3823_v63 = vld [vmem:[%s4812_s12] ss:$0 sm:$0xff] }
0x1997   :  { %v1948_v43 = vpop.permute.xlu1 %1947 }
0x1998   :  { %v1952_v56 = vsel %vm421_vm9, %v4746_v31, %v1948_v43 }
0x1999   :  { %3624 = vmatmul.msk.f32.gmra.mxu0 %vm259_vm1, %v1952_v56 }
0x19a1   :  { %v2041_v1 = vpop.f32.mrf.mxu3 }
0x19a9   :  { %v2044_v52 = vpop.f32.mrf.mxu3 }
0x19f8   :  { %v2146_v0 = vpop.permute.xlu0 %2145 }
0x19f9   :  { %v2151_v2 = vsel %vm421_vm9, %v2041_v1, %v2146_v0 }
0x19fa   :  { %3625 = vmatmul.msk.f32.gmra.mxu0 %vm259_vm1, %v2151_v2  ;;  %v3824_v2 = vld [vmem:[%s4827_s23] ss:$0 sm:$0xff] }
0x1a00   :  { %v2148_v3 = vpop.permute.xlu1 %2147 }
0x1a01   :  { %v2152_v48 = vsel %vm421_vm9, %v2044_v52, %v2148_v3 }
0x1a02   :  { %3626 = vmatmul.msk.f32.gmra.mxu0 %vm259_vm1, %v2152_v48 }
0x1a0e   :  { %v2190_v4 = vpop.f32.mrf.mxu0 }
0x1a0f   :  { %v2191_v45 = vadd.f32 %v3822_v30, %v2190_v4 }
0x1a11   :  { %v2202_v5 = vadd.f32 %v2191_v45, %v4617_v26 }
0x1a13   :  { %v2208_v31 = vsel %vm259_vm1, %v2202_v5, 0.0 }
0x1a14   :  { %2209 = vadd.xlane.f32.xlu1 %v2208_v31 }
0x1a16   :  { %v2193_v51 = vpop.f32.mrf.mxu0 }
0x1a17   :  { %v2194_v59 = vadd.f32 %v3822_v30, %v2193_v51 }
0x1a19   :  { %v2203_v6 = vadd.f32 %v2194_v59, %v4630_v60 }
0x1a1b   :  { %v2211_v61 = vsel %vm259_vm1, %v2203_v6, 0.0 }
0x1a1c   :  { %2212 = vadd.xlane.f32.xlu2 %v2211_v61 }
0x1a77   :  { %v2196_v7 = vpop.f32.mrf.mxu0 }
0x1a78   :  { %v2197_v9 = vadd.f32 %v3822_v30, %v2196_v7 }
0x1a7a   :  { %v2204_v8 = vadd.f32 %v2197_v9, %v4672_v37 }
0x1a7c   :  { %v2214_v10 = vsel %vm259_vm1, %v2204_v8, 0.0 }
0x1a7d   :  { %2215 = vadd.xlane.f32.xlu0 %v2214_v10 }
0x1a7f   :  { %v2199_v11 = vpop.f32.mrf.mxu0 }
0x1a80   :  { %v2200_v12 = vadd.f32 %v3822_v30, %v2199_v11 }
0x1a82   :  { %v2205_v26 = vadd.f32 %v2200_v12, %v4678_v41 }
0x1a84   :  { %v2217_v60 = vsel %vm259_vm1, %v2205_v26, 0.0 }
0x1a85   :  { %2218 = vadd.xlane.f32.xlu2 %v2217_v60 }
0x1a87   :  { %v2210_v13 = vpop.xlane.xlu1 %2209 }
0x1a88   :  { %v2220_v14 = vmul.f32 %v2210_v13, %v4131_v38 }
0x1a8a   :  { %v2224_v37 = vsub.f32 %v2202_v5, %v2220_v14 }
0x1a8c   :  { %v2228_v17 = vmul.f32 %v2224_v37, %v2224_v37 }
0x1a8e   :  { %v2232_v23 = vsel %vm259_vm1, %v2228_v17, 0.0 }
0x1a8f   :  { %v2213_v58 = vpop.xlane.xlu2 %2212  ;;  %2233 = vadd.xlane.f32.xlu2 %v2232_v23 }
0x1a90   :  { %v2221_v24 = vmul.f32 %v2213_v58, %v4131_v38 }
0x1a92   :  { %v4819_v25 = vsub.f32 %v2203_v6, %v2221_v24 }
0x1a94   :  { %v2229_v27 = vmul.f32 %v4819_v25, %v4819_v25 }
0x1a96   :  { %v2235_v41 = vsel %vm259_vm1, %v2229_v27, 0.0 }
0x1a97   :  { %2236 = vadd.xlane.f32.xlu2 %v2235_v41 }
0x1af0   :  { %v2216_v20 = vpop.xlane.xlu0 %2215 }
0x1af1   :  { %v2222_v21 = vmul.f32 %v2216_v20, %v4131_v38 }
0x1af3   :  { %v4835_v28 = vsub.f32 %v2204_v8, %v2222_v21 }
0x1af5   :  { %v2230_v47 = vmul.f32 %v4835_v28, %v4835_v28 }
0x1af7   :  { %v2238_v29 = vsel %vm259_vm1, %v2230_v47, 0.0 }
0x1af8   :  { %2239 = vadd.xlane.f32.xlu2 %v2238_v29  ;;  %v2219_v16 = vpop.xlane.xlu2 %2218  ;;  %v2402_v29 = vld [vmem:[%s4874_s9 + $0x38] sm:$0xff] }
0x1af9   :  { %v2223_v19 = vmul.f32 %v2219_v16, %v4131_v38  ;;  %2427 = vmatpush.msra.mxu1 %v2402_v29 }
0x1afb   :  { %v4843_v34 = vsub.f32 %v2205_v26, %v2223_v19  ;;  %2428 = vmatpush.msra.mxu1 %v2401_v32  ;;  %v2400_v19 = vld [vmem:[%s4874_s9 + $0x28] sm:$0xff] }
0x1afd   :  { %v2231_v35 = vmul.f32 %v4843_v34, %v4843_v34  ;;  %2429 = vmatpush.msra.mxu1 %v2400_v19 }
0x1aff   :  { %v2241_v22 = vsel %vm259_vm1, %v2231_v35, 0.0  ;;  %2430 = vmatpush.msra.mxu1 %v2399_v33  ;;  %v2396_v35 = vld [vmem:[%s4874_s9 + $0x8] sm:$0xff] }
0x1b00   :  { %2242 = vadd.xlane.f32.xlu1 %v2241_v22  ;;  %v3825_v22 = vld [vmem:[%s4855_s3] ss:$0 sm:$0xff] }
0x1b01   :  { %2431 = vmatpush.msra.mxu1 %v2398_v15 }
0x1b02   :  { %v2234_v40 = vpop.xlane.xlu2 %2233 }
0x1b03   :  { %v2244_v44 = vmul.f32 %v2234_v40, %v4131_v38 }
0x1b05   :  { %v2248_v46 = vadd.f32 1e-12, %v2244_v44 }
0x1b07   :  { %3952 = vrsqrt.f32 %v2248_v46  ;;  %vm2258_vm5 = vweird.f32 %v2248_v46 }
0x1b0a   :  { %v2237_v39 = vpop.xlane.xlu2 %2236 }
0x1b0b   :  { %v2245_v42 = vmul.f32 %v2237_v39, %v4131_v38 }
0x1b0d   :  { %v3953_v55 = vpop.eup %3952  ;;  %v2249_v49 = vadd.f32 1e-12, %v2245_v42 }
0x1b0e   :  { %v2253_v50 = vmul.f32 %v3953_v55, %v2248_v46  ;;  %vm2259_vm4 = vweird.f32 %v3953_v55 }
0x1b0f   :  { %3954 = vrsqrt.f32 %v2249_v49  ;;  %vm2260_vm6 = vmor %vm2258_vm5, %vm2259_vm4  ;;  %vm2268_vm8 = vweird.f32 %v2249_v49 }
0x1b10   :  { %v2254_v54 = vmul.f32 %v3953_v55, %v2253_v50 }
0x1b12   :  { %v2255_v57 = vmul.f32 0.5, %v2254_v54 }
0x1b14   :  { %v2256_v62 = vsub.f32 1.5, %v2255_v57 }
0x1b15   :  { %v3955_v18 = vpop.eup %3954 }
0x1b16   :  { %v2257_v53 = vmul.f32 %v3953_v55, %v2256_v62  ;;  %v2263_v43 = vmul.f32 %v3955_v18, %v2249_v49  ;;  %vm2269_vm7 = vweird.f32 %v3955_v18 }
0x1b17   :  { %vm2270_vm11 = vmor %vm2268_vm8, %vm2269_vm7 }
0x1b18   :  { %v2261_v56 = vsel %vm2260_vm6, %v3953_v55, %v2257_v53  ;;  %v2264_v1 = vmul.f32 %v3955_v18, %v2263_v43 }
0x1b19   :  { %v2292_v0 = vmul.f32 %v2261_v56, %v2224_v37 }
0x1b1a   :  { %v2265_v52 = vmul.f32 0.5, %v2264_v1 }
0x1b1b   :  { %v2299_v3 = vmul.f32 %v3823_v63, %v2292_v0 }
0x1b1c   :  { %v2266_v48 = vsub.f32 1.5, %v2265_v52 }
0x1b1d   :  { %v4859_v30 = vadd.f32 %v3824_v2, %v2299_v3 }
0x1b1e   :  { %v2267_v4 = vmul.f32 %v3955_v18, %v2266_v48 }
0x1b1f   :  { %3627 = vmatmul.msk.f32.vlgmr.msrb.gmra.mxu3 %vm259_vm1, %v4859_v30 }
0x1b20   :  { %v2271_v45 = vsel %vm2270_vm11, %v3955_v18, %v2267_v4 }
0x1b21   :  { %v2293_v5 = vmul.f32 %v2271_v45, %v4819_v25 }
0x1b23   :  { %v2300_v31 = vmul.f32 %v3823_v63, %v2293_v5 }
0x1b25   :  { %v4864_v51 = vadd.f32 %v3824_v2, %v2300_v31 }
0x1b27   :  { %3628 = vmatmul.msk.f32.gmra.mxu3 %vm259_vm1, %v4864_v51 }
0x1b6b   :  { %v2240_v59 = vpop.xlane.xlu2 %2239 }
0x1b6c   :  { %v2246_v6 = vmul.f32 %v2240_v59, %v4131_v38 }
0x1b6e   :  { %v2250_v61 = vadd.f32 1e-12, %v2246_v6 }
0x1b70   :  { %3956 = vrsqrt.f32 %v2250_v61  ;;  %vm2278_vm10 = vweird.f32 %v2250_v61 }
0x1b73   :  { %v2243_v7 = vpop.xlane.xlu1 %2242 }
0x1b74   :  { %v2247_v9 = vmul.f32 %v2243_v7, %v4131_v38 }
0x1b76   :  { %v3957_v8 = vpop.eup %3956  ;;  %v2251_v10 = vadd.f32 1e-12, %v2247_v9 }
0x1b77   :  { %v2273_v11 = vmul.f32 %v3957_v8, %v2250_v61  ;;  %vm2279_vm12 = vweird.f32 %v3957_v8 }
0x1b78   :  { %3958 = vrsqrt.f32 %v2251_v10  ;;  %vm2280_vm13 = vmor %vm2278_vm10, %vm2279_vm12  ;;  %vm2288_vm15 = vweird.f32 %v2251_v10 }
0x1b79   :  { %v2274_v12 = vmul.f32 %v3957_v8, %v2273_v11 }
0x1b7b   :  { %v2275_v26 = vmul.f32 0.5, %v2274_v12 }
0x1b7d   :  { %v2276_v60 = vsub.f32 1.5, %v2275_v26 }
0x1b7e   :  { %v3959_v13 = vpop.eup %3958 }
0x1b7f   :  { %v2277_v14 = vmul.f32 %v3957_v8, %v2276_v60  ;;  %v2283_v37 = vmul.f32 %v3959_v13, %v2251_v10  ;;  %vm2289_vm14 = vweird.f32 %v3959_v13 }
0x1b80   :  { %vm2290_vm2 = vmor %vm2288_vm15, %vm2289_vm14 }
0x1b81   :  { %v2281_v17 = vsel %vm2280_vm13, %v3957_v8, %v2277_v14  ;;  %v2284_v23 = vmul.f32 %v3959_v13, %v2283_v37 }
0x1b82   :  { %v2294_v58 = vmul.f32 %v2281_v17, %v4835_v28 }
0x1b83   :  { %v2285_v24 = vmul.f32 0.5, %v2284_v23 }
0x1b84   :  { %v2301_v25 = vmul.f32 %v3823_v63, %v2294_v58 }
0x1b85   :  { %v2286_v27 = vsub.f32 1.5, %v2285_v24 }
0x1b86   :  { %v4876_v41 = vadd.f32 %v3824_v2, %v2301_v25  ;;  %v3826_v25 = vld [vmem:[%s4897_s19] ss:$0 sm:$0xff] }
0x1b87   :  { %v2287_v20 = vmul.f32 %v3959_v13, %v2286_v27 }
0x1b88   :  { %3629 = vmatmul.msk.f32.gmra.mxu3 %vm259_vm1, %v4876_v41 }
0x1b89   :  { %v2291_v21 = vsel %vm2290_vm2, %v3959_v13, %v2287_v20 }
0x1b8a   :  { %v2295_v28 = vmul.f32 %v2291_v21, %v4843_v34  ;;  %v2397_v34 = vld [vmem:[%s4874_s9 + $0x10] sm:$0xff] }
0x1b8b   :  { %2432 = vmatpush.msra.mxu1 %v2397_v34 }
0x1b8c   :  { %v2302_v47 = vmul.f32 %v3823_v63, %v2295_v28 }
0x1b8d   :  { %2433 = vmatpush.msra.mxu1 %v2396_v35 }
0x1b8e   :  { %v4882_v16 = vadd.f32 %v3824_v2, %v2302_v47 }
0x1b8f   :  { %2434 = vmatpush.msra.mxu1 %v2395_v36 }
0x1b90   :  { %3630 = vmatmul.msk.f32.gmra.mxu3 %vm259_vm1, %v4882_v16 }
0x1ba2   :  { %v2347_v40 = vpop.f32.mrf.mxu3 }
0x1ba3   :  { %v2348_v44 = vadd.f32 %v3825_v22, %v2347_v40 }
0x1ba5   :  { %v2359_v46 = vmul.f32 %v2348_v44, %v2348_v44 }
0x1ba7   :  { %v2363_v39 = vmul.f32 %v2359_v46, %v2348_v44 }
0x1ba9   :  { %v2367_v42 = vmul.f32 0.044715, %v2363_v39 }
0x1baa   :  { %v2350_v55 = vpop.f32.mrf.mxu3 }
0x1bab   :  { %v2371_v49 = vadd.f32 %v2367_v42, %v2348_v44  ;;  %v2351_v50 = vadd.f32 %v3825_v22, %v2350_v55 }
0x1bad   :  { %v2375_v54 = vmul.f32 0.7978846, %v2371_v49  ;;  %v2360_v57 = vmul.f32 %v2351_v50, %v2351_v50 }
0x1baf   :  { %3960 = vtanh.f32 %v2375_v54  ;;  %v2364_v62 = vmul.f32 %v2360_v57, %v2351_v50 }
0x1bb1   :  { %v2368_v18 = vmul.f32 0.044715, %v2364_v62 }
0x1bb3   :  { %v2372_v63 = vadd.f32 %v2368_v18, %v2351_v50 }
0x1bb5   :  { %v3961_v53 = vpop.eup %3960  ;;  %v2376_v43 = vmul.f32 0.7978846, %v2372_v63 }
0x1bb6   :  { %v2383_v56 = vadd.f32 1.0, %v3961_v53 }
0x1bb7   :  { %3962 = vtanh.f32 %v2376_v43  ;;  %v3638_v43 = vld [vmem:[%s4600_s30 + $0x38] sm:$0xff] }
0x1bb8   :  { %v2387_v1 = vmul.f32 0.5, %v2383_v56  ;;  %2590 = vmatpush.msra.mxu2 %v3638_v43 }
0x1bba   :  { %v2391_v0 = vmul.f32 %v2387_v1, %v2348_v44  ;;  %v3637_v1 = vld [vmem:[%s4600_s30 + $0x30] sm:$0xff] }
0x1bbb   :  { %2591 = vmatpush.msra.mxu2 %v3637_v1 }
0x1bbc   :  { %3631 = vmatmul.msk.f32.vlgmr.msra.gmra.mxu1 %vm204_vm0, %v2391_v0 }
0x1bbd   :  { %v3963_v2 = vpop.eup %3962 }
0x1bbe   :  { %v2384_v52 = vadd.f32 1.0, %v3963_v2  ;;  %v3636_v2 = vld [vmem:[%s4600_s30 + $0x28] sm:$0xff] }
0x1bbf   :  { %2592 = vmatpush.msra.mxu2 %v3636_v2 }
0x1bc0   :  { %v2388_v3 = vmul.f32 0.5, %v2384_v52 }
0x1bc2   :  { %v2392_v48 = vmul.f32 %v2388_v3, %v2351_v50  ;;  %v3635_v3 = vld [vmem:[%s4600_s30 + $0x20] sm:$0xff] }
0x1bc3   :  { %2593 = vmatpush.msra.mxu2 %v3635_v3 }
0x1bc4   :  { %3632 = vmatmul.msk.f32.gmra.mxu1 %vm204_vm0, %v2392_v48 }
0x1c0b   :  { %v2353_v4 = vpop.f32.mrf.mxu3 }
0x1c0c   :  { %v2354_v45 = vadd.f32 %v3825_v22, %v2353_v4 }
0x1c0e   :  { %v2361_v5 = vmul.f32 %v2354_v45, %v2354_v45 }
0x1c10   :  { %v2365_v31 = vmul.f32 %v2361_v5, %v2354_v45 }
0x1c12   :  { %v2369_v59 = vmul.f32 0.044715, %v2365_v31 }
0x1c13   :  { %v2356_v6 = vpop.f32.mrf.mxu3 }
0x1c14   :  { %v2373_v61 = vadd.f32 %v2369_v59, %v2354_v45  ;;  %v2357_v7 = vadd.f32 %v3825_v22, %v2356_v6 }
0x1c16   :  { %v2362_v9 = vmul.f32 %v2357_v7, %v2357_v7  ;;  %v2377_v8 = vmul.f32 0.7978846, %v2373_v61 }
0x1c18   :  { %v2366_v10 = vmul.f32 %v2362_v9, %v2357_v7  ;;  %3964 = vtanh.f32 %v2377_v8 }
0x1c1a   :  { %v2370_v11 = vmul.f32 0.044715, %v2366_v10 }
0x1c1c   :  { %v2374_v12 = vadd.f32 %v2370_v11, %v2357_v7 }
0x1c1e   :  { %v3965_v26 = vpop.eup %3964  ;;  %v2378_v60 = vmul.f32 0.7978846, %v2374_v12 }
0x1c1f   :  { %v2385_v13 = vadd.f32 1.0, %v3965_v26 }
0x1c20   :  { %3966 = vtanh.f32 %v2378_v60  ;;  %v3827_v60 = vld [vmem:[%s4914_s27] ss:$0 sm:$0xff] }
0x1c21   :  { %v2389_v14 = vmul.f32 0.5, %v2385_v13 }
0x1c23   :  { %v2393_v37 = vmul.f32 %v2389_v14, %v2354_v45 }
0x1c25   :  { %3633 = vmatmul.msk.f32.gmra.mxu1 %vm204_vm0, %v2393_v37 }
0x1c26   :  { %v3967_v17 = vpop.eup %3966 }
0x1c27   :  { %v2386_v23 = vadd.f32 1.0, %v3967_v17  ;;  %v3828_v17 = vld [vmem:[%s4925_s29] ss:$0 sm:$0xff] }
0x1c29   :  { %v2390_v58 = vmul.f32 0.5, %v2386_v23 }
0x1c2b   :  { %v2394_v24 = vmul.f32 %v2390_v58, %v2357_v7 }
0x1c2d   :  { %3634 = vmatmul.msk.f32.gmra.mxu1 %vm204_vm0, %v2394_v24 }
0x1c39   :  { %v2436_v27 = vpop.f32.mrf.mxu1 }
0x1c3a   :  { %v2437_v20 = vadd.f32 %v3826_v25, %v2436_v27 }
0x1c3c   :  { %v2448_v21 = vadd.f32 %v2437_v20, %v4859_v30 }
0x1c3e   :  { %v2454_v28 = vsel %vm259_vm1, %v2448_v21, 0.0 }
0x1c3f   :  { %2455 = vadd.xlane.f32.xlu2 %v2454_v28 }
0x1c41   :  { %v2439_v47 = vpop.f32.mrf.mxu1 }
0x1c42   :  { %v2440_v29 = vadd.f32 %v3826_v25, %v2439_v47 }
0x1c44   :  { %v2449_v32 = vadd.f32 %v2440_v29, %v4864_v51 }
0x1c46   :  { %v2457_v19 = vsel %vm259_vm1, %v2449_v32, 0.0 }
0x1c47   :  { %2458 = vadd.xlane.f32.xlu1 %v2457_v19 }
0x1ca2   :  { %v2442_v33 = vpop.f32.mrf.mxu1 }
0x1ca3   :  { %v2443_v15 = vadd.f32 %v3826_v25, %v2442_v33 }
0x1ca5   :  { %v2450_v34 = vadd.f32 %v2443_v15, %v4876_v41 }
0x1ca7   :  { %v2460_v35 = vsel %vm259_vm1, %v2450_v34, 0.0 }
0x1ca8   :  { %2461 = vadd.xlane.f32.xlu0 %v2460_v35 }
0x1caa   :  { %v2445_v36 = vpop.f32.mrf.mxu1 }
0x1cab   :  { %v2446_v22 = vadd.f32 %v3826_v25, %v2445_v36 }
0x1cad   :  { %v2451_v30 = vadd.f32 %v2446_v22, %v4882_v16 }
0x1caf   :  { %v2463_v51 = vsel %vm259_vm1, %v2451_v30, 0.0 }
0x1cb0   :  { %2464 = vadd.xlane.f32.xlu2 %v2463_v51 }
0x1cb2   :  { %v2456_v40 = vpop.xlane.xlu2 %2455 }
0x1cb3   :  { %v2466_v44 = vmul.f32 %v2456_v40, %v4131_v38 }
0x1cb5   :  { %v2470_v41 = vsub.f32 %v2448_v21, %v2466_v44 }
0x1cb7   :  { %v2474_v46 = vmul.f32 %v2470_v41, %v2470_v41 }
0x1cb9   :  { %v2478_v39 = vsel %vm259_vm1, %v2474_v46, 0.0 }
0x1cba   :  { %v2459_v42 = vpop.xlane.xlu1 %2458  ;;  %2479 = vadd.xlane.f32.xlu1 %v2478_v39 }
0x1cbb   :  { %v2467_v55 = vmul.f32 %v2459_v42, %v4131_v38 }
0x1cbd   :  { %v2471_v49 = vsub.f32 %v2449_v32, %v2467_v55 }
0x1cbf   :  { %v2475_v50 = vmul.f32 %v2471_v49, %v2471_v49 }
0x1cc1   :  { %v2481_v16 = vsel %vm259_vm1, %v2475_v50, 0.0 }
0x1cc2   :  { %2482 = vadd.xlane.f32.xlu0 %v2481_v16 }
0x1d1b   :  { %v2462_v54 = vpop.xlane.xlu0 %2461 }
0x1d1c   :  { %v2468_v57 = vmul.f32 %v2462_v54, %v4131_v38 }
0x1d1e   :  { %v4928_v62 = vsub.f32 %v2450_v34, %v2468_v57 }
0x1d20   :  { %v2476_v18 = vmul.f32 %v4928_v62, %v4928_v62 }
0x1d22   :  { %v2484_v63 = vsel %vm259_vm1, %v2476_v18, 0.0 }
0x1d23   :  { %2485 = vadd.xlane.f32.xlu2 %v2484_v63  ;;  %v2465_v53 = vpop.xlane.xlu2 %2464 }
0x1d24   :  { %v2469_v56 = vmul.f32 %v2465_v53, %v4131_v38 }
0x1d26   :  { %v4936_v0 = vsub.f32 %v2451_v30, %v2469_v56 }
0x1d28   :  { %v2477_v52 = vmul.f32 %v4936_v0, %v4936_v0 }
0x1d2a   :  { %v2487_v48 = vsel %vm259_vm1, %v2477_v52, 0.0 }
0x1d2b   :  { %2488 = vadd.xlane.f32.xlu1 %v2487_v48 }
0x1d2d   :  { %v2480_v4 = vpop.xlane.xlu1 %2479 }
0x1d2e   :  { %v2490_v45 = vmul.f32 %v2480_v4, %v4131_v38 }
0x1d30   :  { %v2494_v5 = vadd.f32 1e-12, %v2490_v45 }
0x1d32   :  { %3968 = vrsqrt.f32 %v2494_v5  ;;  %vm2504_vm4 = vweird.f32 %v2494_v5 }
0x1d35   :  { %v2483_v31 = vpop.xlane.xlu0 %2482 }
0x1d36   :  { %v2491_v59 = vmul.f32 %v2483_v31, %v4131_v38 }
0x1d38   :  { %v3969_v6 = vpop.eup %3968  ;;  %v2495_v61 = vadd.f32 1e-12, %v2491_v59 }
0x1d39   :  { %v2499_v7 = vmul.f32 %v3969_v6, %v2494_v5  ;;  %vm2505_vm3 = vweird.f32 %v3969_v6 }
0x1d3a   :  { %3970 = vrsqrt.f32 %v2495_v61  ;;  %vm2506_vm5 = vmor %vm2504_vm4, %vm2505_vm3  ;;  %vm2514_vm7 = vweird.f32 %v2495_v61 }
0x1d3b   :  { %v2500_v9 = vmul.f32 %v3969_v6, %v2499_v7 }
0x1d3d   :  { %v2501_v8 = vmul.f32 0.5, %v2500_v9 }
0x1d3f   :  { %v2502_v10 = vsub.f32 1.5, %v2501_v8 }
0x1d40   :  { %v3971_v11 = vpop.eup %3970 }
0x1d41   :  { %v2503_v12 = vmul.f32 %v3969_v6, %v2502_v10  ;;  %v2509_v26 = vmul.f32 %v3971_v11, %v2495_v61  ;;  %vm2515_vm6 = vweird.f32 %v3971_v11 }
0x1d42   :  { %vm2516_vm8 = vmor %vm2514_vm7, %vm2515_vm6 }
0x1d43   :  { %v2507_v13 = vsel %vm2506_vm5, %v3969_v6, %v2503_v12  ;;  %v2510_v14 = vmul.f32 %v3971_v11, %v2509_v26  ;;  %v4032_v26 = vld [vmem:[%s4685_s5] sm:$0xff] }
0x1d44   :  { %v2538_v37 = vmul.f32 %v2507_v13, %v2470_v41 }
0x1d45   :  { %v2511_v23 = vmul.f32 0.5, %v2510_v14 }
0x1d46   :  { %v2545_v58 = vmul.f32 %v3827_v60, %v2538_v37  ;;  %v4033_v37 = vld [vmem:[%s4685_s5 + $0x8] sm:$0xff]  ;;  %s4081_s5 = smov 42  }
0x1d47   :  { %v2512_v24 = vsub.f32 1.5, %v2511_v23 }
0x1d48   :  { %v4947_v25 = vadd.f32 %v3828_v17, %v2545_v58 }
0x1d49   :  { %v2513_v27 = vmul.f32 %v3971_v11, %v2512_v24 }
0x1d4a   :  { %3640 = vmatmul.msk.f32.vlgmr.msra.gmra.mxu2 %vm259_vm1, %v4947_v25 }
0x1d4b   :  { %v2517_v20 = vsel %vm2516_vm8, %v3971_v11, %v2513_v27 }
0x1d4c   :  { %v2539_v21 = vmul.f32 %v2517_v20, %v2471_v49 }
0x1d4e   :  { %v2546_v28 = vmul.f32 %v3827_v60, %v2539_v21 }
0x1d50   :  { %v4951_v47 = vadd.f32 %v3828_v17, %v2546_v28 }
0x1d52   :  { %3641 = vmatmul.msk.f32.gmra.mxu2 %vm259_vm1, %v4951_v47 }
0x1d96   :  { %v2486_v29 = vpop.xlane.xlu2 %2485 }
0x1d97   :  { %v2492_v32 = vmul.f32 %v2486_v29, %v4131_v38 }
0x1d99   :  { %v2496_v19 = vadd.f32 1e-12, %v2492_v32 }
0x1d9b   :  { %3972 = vrsqrt.f32 %v2496_v19  ;;  %vm2524_vm12 = vweird.f32 %v2496_v19 }
0x1d9e   :  { %v2489_v33 = vpop.xlane.xlu1 %2488 }
0x1d9f   :  { %v2493_v15 = vmul.f32 %v2489_v33, %v4131_v38 }
0x1da1   :  { %v3973_v34 = vpop.eup %3972  ;;  %v2497_v35 = vadd.f32 1e-12, %v2493_v15 }
0x1da2   :  { %v2519_v36 = vmul.f32 %v3973_v34, %v2496_v19  ;;  %vm2525_vm11 = vweird.f32 %v3973_v34 }
0x1da3   :  { %3974 = vrsqrt.f32 %v2497_v35  ;;  %vm2526_vm10 = vmor %vm2524_vm12, %vm2525_vm11  ;;  %vm2534_vm14 = vweird.f32 %v2497_v35 }
0x1da4   :  { %v2520_v22 = vmul.f32 %v3973_v34, %v2519_v36 }
0x1da6   :  { %v2521_v30 = vmul.f32 0.5, %v2520_v22 }
0x1da8   :  { %v2522_v51 = vsub.f32 1.5, %v2521_v30 }
0x1da9   :  { %v3975_v40 = vpop.eup %3974 }
0x1daa   :  { %v2523_v44 = vmul.f32 %v3973_v34, %v2522_v51  ;;  %v2529_v41 = vmul.f32 %v3975_v40, %v2497_v35  ;;  %vm2535_vm13 = vweird.f32 %v3975_v40 }
0x1dab   :  { %vm2536_vm15 = vmor %vm2534_vm14, %vm2535_vm13 }
0x1dac   :  { %v2527_v46 = vsel %vm2526_vm10, %v3973_v34, %v2523_v44  ;;  %v2530_v39 = vmul.f32 %v3975_v40, %v2529_v41 }
0x1dad   :  { %v2540_v42 = vmul.f32 %v2527_v46, %v4928_v62  ;;  %v3829_v62 = vld [vmem:[%s4595_s22 + $0x1] ss:$0 sm:$0xff] }
0x1dae   :  { %v2531_v55 = vmul.f32 0.5, %v2530_v39 }
0x1daf   :  { %v2547_v49 = vmul.f32 %v3827_v60, %v2540_v42 }
0x1db0   :  { %v2532_v50 = vsub.f32 1.5, %v2531_v55 }
0x1db1   :  { %v4958_v16 = vadd.f32 %v3828_v17, %v2547_v49 }
0x1db2   :  { %v2533_v54 = vmul.f32 %v3975_v40, %v2532_v50 }
0x1db3   :  { %3642 = vmatmul.msk.f32.gmra.mxu2 %vm259_vm1, %v4958_v16 }
0x1db4   :  { %v2537_v57 = vsel %vm2536_vm15, %v3975_v40, %v2533_v54 }
0x1db5   :  { %v2541_v18 = vmul.f32 %v2537_v57, %v4936_v0 }
0x1db7   :  { %v2548_v63 = vmul.f32 %v3827_v60, %v2541_v18 }
0x1db9   :  { %v4963_v53 = vadd.f32 %v3828_v17, %v2548_v63 }
0x1dbb   :  { %3643 = vmatmul.msk.f32.gmra.mxu2 %vm259_vm1, %v4963_v53 }
0x1dcd   :  { %v2595_v43 = vpop.f32.mrf.mxu2 }
0x1dce   :  { %v4968_v56 = vadd.f32 %v3829_v62, %v2595_v43 }
0x1dd0   :  { %2705 = vrot.lane.b32.xlu2 %v4968_v56, %s4046_s13  ;;  %2701 = vrot.lane.b32.xlu1 %v4968_v56, %s4045_s14 }
0x1dd5   :  { %v2598_v1 = vpop.f32.mrf.mxu2 }
0x1dd6   :  { %v4974_v2 = vadd.f32 %v3829_v62, %v2598_v1 }
0x1dd8   :  { %2707 = vrot.lane.b32.xlu0 %v4974_v2, %s4046_s13  ;;  %v5034_v42 = vpack.i.bf16 %v4968_v56, %v4974_v2 }
0x1de0   :  { %2703 = vrot.lane.b32.xlu0 %v4974_v2, %s4045_s14 }
0x1e2a   :  { %v2706_v45 = vpop.permute.xlu2 %2705 }
0x1e36   :  { %v2601_v0 = vpop.f32.mrf.mxu2 }
0x1e37   :  { %v4980_v52 = vadd.f32 %v3829_v62, %v2601_v0 }
0x1e39   :  { %2901 = vrot.lane.b32.xlu1 %v4980_v52, %s4045_s14  ;;  %2905 = vrot.lane.b32.xlu2 %v4980_v52, %s4046_s13 }
0x1e3e   :  { %v2604_v3 = vpop.f32.mrf.mxu2 }
0x1e3f   :  { %v4986_v48 = vadd.f32 %v3829_v62, %v2604_v3 }
0x1e41   :  { %2907 = vrot.lane.b32.xlu0 %v4986_v48, %s4046_s13  ;;  %2609 = vrot.lane.b32.xlu1 %v4968_v56, %s4043_s8  ;;  %v3780_v63 = vpack.i.bf16 %v4980_v52, %v4986_v48 }
0x1e42   :  { %2611 = vrot.lane.b32.xlu2 %v4974_v2, %s4043_s8  ;;  %v2702_v5 = vpop.permute.xlu1 %2701 }
0x1e49   :  { %2903 = vrot.lane.b32.xlu0 %v4986_v48, %s4045_s14 }
0x1e4a   :  { %2809 = vrot.lane.b32.xlu2 %v4980_v52, %s4043_s8  ;;  %v2708_v4 = vpop.permute.xlu0 %2707 }
0x1e4b   :  { %3650 = vmatpush.xpose.msk.msrb.mxu1 %vm421_vm9, %v2708_v4 }
0x1e4f   :  { %3651 = vmatpush.xpose.msk.msrb.mxu1 %vm421_vm9, %v2706_v45 }
0x1e51   :  { %2811 = vrot.lane.b32.xlu0 %v4986_v48, %s4043_s8  ;;  %s4079_s8 = smov 13  }
0x1e52   :  { %3652 = vmatmul.msk.f32.vlgmr.msrb.gmra.mxu1 %vm421_vm9, %v2702_v5  ;;  %v2704_v31 = vpop.permute.xlu0 %2703 }
0x1e5a   :  { %3653 = vmatmul.msk.f32.gmra.mxu1 %vm421_vm9, %v2704_v31 }
0x1e93   :  { %v2906_v59 = vpop.permute.xlu2 %2905 }
0x1e9c   :  { %v2612_v6 = vpop.permute.xlu2 %2611 }
0x1e9d   :  { %3644 = vmatpush.xpose.msk.msra.mxu0 %vm421_vm9, %v2612_v6 }
0x1ea4   :  { %v2810_v11 = vpop.permute.xlu2 %2809 }
0x1eab   :  { %v2902_v61 = vpop.permute.xlu1 %2901 }
0x1eb3   :  { %v2908_v7 = vpop.permute.xlu0 %2907  ;;  %v2610_v9 = vpop.permute.xlu1 %2609 }
0x1eb4   :  { %3645 = vmatpush.xpose.msk.msra.mxu0 %vm421_vm9, %v2610_v9  ;;  %3662 = vmatpush.xpose.msk.msra.mxu1 %vm421_vm9, %v2908_v7 }
0x1eb7   :  { %3646 = vmatmul.msk.f32.vlgmr.msra.gmra.mxu0 %vm421_vm9, %v4968_v56 }
0x1eb8   :  { %3663 = vmatpush.xpose.msk.msra.mxu1 %vm421_vm9, %v2906_v59 }
0x1ebb   :  { %v2904_v8 = vpop.permute.xlu0 %2903  ;;  %3664 = vmatmul.msk.f32.vlgmr.msra.gmra.mxu1 %vm421_vm9, %v2902_v61 }
0x1ebf   :  { %3647 = vmatmul.msk.f32.gmra.mxu0 %vm421_vm9, %v4974_v2 }
0x1ec3   :  { %v2812_v10 = vpop.permute.xlu0 %2811  ;;  %3665 = vmatmul.msk.f32.gmra.mxu1 %vm421_vm9, %v2904_v8 }
0x1ec4   :  { %3656 = vmatpush.xpose.msk.msrb.mxu0 %vm421_vm9, %v2812_v10 }
0x1ec8   :  { %3657 = vmatpush.xpose.msk.msrb.mxu0 %vm421_vm9, %v2810_v11 }
0x1ecb   :  { %3658 = vmatmul.msk.f32.vlgmr.msrb.gmra.mxu0 %vm421_vm9, %v4980_v52 }
0x1ecf   :  { %v2734_v12 = vpop.f32.mrf.mxu1 }
0x1ed0   :  { %v2735_v60 = vadd.f32 %v4032_v26, %v2734_v12 }
0x1ed2   :  { %v2740_v13 = vsel %vm421_vm9, %v2735_v60, -inf }
0x1ed3   :  { %2741 = vmax.xlane.f32.xlu1 %v2740_v13  ;;  %3659 = vmatmul.msk.f32.gmra.mxu0 %vm421_vm9, %v4986_v48 }
0x1ed7   :  { %v2737_v14 = vpop.f32.mrf.mxu1 }
0x1ed8   :  { %v2738_v17 = vadd.f32 %v4033_v37, %v2737_v14 }
0x1eda   :  { %v2743_v23 = vsel %vm421_vm9, %v2738_v17, -inf }
0x1edb   :  { %2744 = vmax.xlane.f32.xlu0 %v2743_v23 }
0x1f34   :  { %v2638_v58 = vpop.f32.mrf.mxu0 }
0x1f35   :  { %v2639_v29 = vadd.f32 %v4032_v26, %v2638_v58 }
0x1f37   :  { %v2644_v19 = vsel %vm421_vm9, %v2639_v29, -inf }
0x1f38   :  { %v2934_v24 = vpop.f32.mrf.mxu1 }
0x1f39   :  { %v2935_v27 = vadd.f32 %v4032_v26, %v2934_v24 }
0x1f3b   :  { %v2940_v20 = vsel %vm421_vm9, %v2935_v27, -inf }
0x1f3c   :  { %2941 = vmax.xlane.f32.xlu2 %v2940_v20  ;;  %v2641_v21 = vpop.f32.mrf.mxu0 }
0x1f3d   :  { %v2642_v28 = vadd.f32 %v4033_v37, %v2641_v21 }
0x1f3f   :  { %v2647_v32 = vsel %vm421_vm9, %v2642_v28, -inf }
0x1f40   :  { %2648 = vmax.xlane.f32.xlu0 %v2647_v32  ;;  %v2937_v54 = vpop.f32.mrf.mxu1 }
0x1f41   :  { %v2938_v57 = vadd.f32 %v4033_v37, %v2937_v54 }
0x1f43   :  { %v2943_v18 = vsel %vm421_vm9, %v2938_v57, -inf }
0x1f44   :  { %2645 = vmax.xlane.f32.xlu2 %v2644_v19 }
0x1f46   :  { %v2742_v33 = vpop.xlane.xlu1 %2741 }
0x1f47   :  { %v2746_v15 = vsub.f32 %v2735_v60, %v2742_v33 }
0x1f48   :  { %v2838_v34 = vpop.f32.mrf.mxu0 }
0x1f49   :  { %v2748_v35 = vmul.f32 1.442695, %v2746_v15  ;;  %v5027_v36 = vadd.f32 %v4032_v26, %v2838_v34 }
0x1f4b   :  { %3976 = vpow2.f32 %v2748_v35  ;;  %v2844_v22 = vsel %vm421_vm9, %v5027_v36, -inf }
0x1f4c   :  { %2845 = vmax.xlane.f32.xlu2 %v2844_v22 }
0x1f4e   :  { %v2745_v30 = vpop.xlane.xlu0 %2744 }
0x1f4f   :  { %v2747_v51 = vsub.f32 %v2738_v17, %v2745_v30 }
0x1f50   :  { %v2841_v40 = vpop.f32.mrf.mxu0 }
0x1f51   :  { %v3977_v44 = vpop.eup %3976  ;;  %v2750_v41 = vmul.f32 1.442695, %v2747_v51  ;;  %v2842_v46 = vadd.f32 %v4033_v37, %v2841_v40 }
0x1f52   :  { %v2752_v39 = vsel %vm421_vm9, %v3977_v44, 0.0 }
0x1f53   :  { %3978 = vpow2.f32 %v2750_v41  ;;  %2753 = vadd.xlane.f32.xlu1 %v2752_v39  ;;  %v2847_v55 = vsel %vm421_vm9, %v2842_v46, -inf }
0x1f54   :  { %3776 = vrot.lane.b32.xlu0 %v5034_v42, %s4048_s16  ;;  %2848 = vmax.xlane.f32.xlu2 %v2847_v55 }
0x1f59   :  { %v3979_v49 = vpop.eup %3978 }
0x1f5a   :  { %v2755_v50 = vsel %vm421_vm9, %v3979_v49, 0.0 }
0x1f5b   :  { %2756 = vadd.xlane.f32.xlu1 %v2755_v50 }
0x1f63   :  { %2944 = vmax.xlane.f32.xlu1 %v2943_v18 }
0x1f6c   :  { %3781 = vrot.lane.b32.xlu2 %v3780_v63, %s4048_s16  ;;  %s4080_s16 = smov 12  }
0x1f6d   :  { %s5193_s30 = sld [smem:[%s5210_s0 + %s4080_s16]]  }
0x1faf   :  { %v2942_v62 = vpop.xlane.xlu2 %2941 }
0x1fb0   :  { %v2946_v3 = vsub.f32 %v2935_v27, %v2942_v62 }
0x1fb2   :  { %v2948_v5 = vmul.f32 1.442695, %v2946_v3 }
0x1fb3   :  { %v2649_v43 = vpop.xlane.xlu0 %2648 }
0x1fb4   :  { %v2651_v56 = vsub.f32 %v2642_v28, %v2649_v43 }
0x1fb6   :  { %v2654_v1 = vmul.f32 1.442695, %v2651_v56 }
0x1fb7   :  { %v2646_v2 = vpop.xlane.xlu2 %2645 }
0x1fb8   :  { %3980 = vpow2.f32 %v2654_v1  ;;  %v2650_v0 = vsub.f32 %v2639_v29, %v2646_v2 }
0x1fba   :  { %v2652_v4 = vmul.f32 1.442695, %v2650_v0 }
0x1fbc   :  { %3982 = vpow2.f32 %v2652_v4 }
0x1fbd   :  { %3984 = vpow2.f32 %v2948_v5  ;;  %v3671_v5 = vld [vmem:[%s4779_s7 + $0x38] sm:$0xff] }
0x1fbe   :  { %v5044_v45 = vpop.eup %3980  ;;  %3041 = vmatpush.msra.mxu0 %v3671_v5 }
0x1fbf   :  { %v2846_v31 = vpop.xlane.xlu2 %2845  ;;  %v2659_v59 = vsel %vm421_vm9, %v5044_v45, 0.0 }
0x1fc0   :  { %2660 = vadd.xlane.f32.xlu2 %v2659_v59  ;;  %v2850_v33 = vsub.f32 %v5027_v36, %v2846_v31  ;;  %v3670_v31 = vld [vmem:[%s4779_s7 + $0x30] sm:$0xff]  ;;  %v3669_v59 = vld [vmem:[%s4779_s7 + $0x28] sm:$0xff] }
0x1fc1   :  { %3042 = vmatpush.msra.mxu0 %v3670_v31 }
0x1fc2   :  { %v5048_v52 = vpop.eup %3982  ;;  %v2852_v15 = vmul.f32 1.442695, %v2850_v33 }
0x1fc3   :  { %v2656_v48 = vsel %vm421_vm9, %v5048_v52, 0.0  ;;  %v3985_v8 = vpop.eup %3984  ;;  %3043 = vmatpush.msra.mxu0 %v3669_v59 }
0x1fc4   :  { %2657 = vadd.xlane.f32.xlu1 %v2656_v48  ;;  %v2952_v26 = vsel %vm421_vm9, %v3985_v8, 0.0 }
0x1fc6   :  { %v2754_v6 = vpop.xlane.xlu1 %2753  ;;  %v3777_v61 = vpop.permute.xlu0 %3776 }
0x1fc7   :  { %3986 = vrcp.f32 %v2754_v6  ;;  %v3778_v7 = vunpack.i.l.bf16 %v3777_v61  ;;  %v2849_v9 = vpop.xlane.xlu2 %2848  ;;  %v3779_v11 = vunpack.i.h.bf16 %v3777_v61 }
0x1fc8   :  { %v2851_v10 = vsub.f32 %v2842_v46, %v2849_v9 }
0x1fc9   :  { %2788 = vmatpush.msrb.mxu2 %v3778_v7 }
0x1fca   :  { %v2854_v12 = vmul.f32 1.442695, %v2851_v10 }
0x1fcb   :  { %2789 = vmatpush.msrb.mxu2 %v3779_v11 }
0x1fcc   :  { %3988 = vpow2.f32 %v2854_v12  ;;  %2953 = vadd.xlane.f32.xlu1 %v2952_v26 }
0x1fcd   :  { %v3987_v60 = vpop.eup %3986 }
0x1fce   :  { %v2760_v13 = vmul.f32 %v3987_v60, %v3977_v44  ;;  %v2757_v14 = vpop.xlane.xlu1 %2756 }
0x1fcf   :  { %3990 = vrcp.f32 %v2757_v14  ;;  %v3782_v37 = vpop.permute.xlu2 %3781 }
0x1fd0   :  { %v3783_v17 = vunpack.i.l.bf16 %v3782_v37  ;;  %3654 = vmatmul.msk.f32.vlgmr.msrb.gmra.mxu2 %vm421_vm9, %v2760_v13  ;;  %v3784_v58 = vunpack.i.h.bf16 %v3782_v37 }
0x1fd2   :  { %v5054_v23 = vpop.eup %3988  ;;  %2988 = vmatpush.msra.mxu2 %v3783_v17  ;;  %v3830_v17 = vld [vmem:[%s4788_s6 + $0x1] ss:$0 sm:$0xff] }
0x1fd3   :  { %v2859_v24 = vsel %vm421_vm9, %v5054_v23, 0.0 }
0x1fd4   :  { %2860 = vadd.xlane.f32.xlu2 %v2859_v24  ;;  %2989 = vmatpush.msra.mxu2 %v3784_v58 }
0x1fd5   :  { %v3991_v27 = vpop.eup %3990 }
0x1fd6   :  { %v2945_v20 = vpop.xlane.xlu1 %2944  ;;  %v2761_v21 = vmul.f32 %v3991_v27, %v3979_v49 }
0x1fd7   :  { %v2947_v28 = vsub.f32 %v2938_v57, %v2945_v20 }
0x1fd8   :  { %3655 = vmatmul.msk.f32.gmra.mxu2 %vm421_vm9, %v2761_v21 }
0x1fd9   :  { %v2950_v29 = vmul.f32 1.442695, %v2947_v28 }
0x1fdb   :  { %3992 = vpow2.f32 %v2950_v29 }
0x1fdc   :  { %3994 = vpow2.f32 %v2852_v15 }
0x1fe1   :  { %v3993_v32 = vpop.eup %3992 }
0x1fe2   :  { %v2955_v19 = vsel %vm421_vm9, %v3993_v32, 0.0  ;;  %v3995_v34 = vpop.eup %3994 }
0x1fe3   :  { %2956 = vadd.xlane.f32.xlu0 %v2955_v19  ;;  %v2856_v35 = vsel %vm421_vm9, %v3995_v34, 0.0 }
0x1fe5   :  { %3786 = vrot.lane.b32.xlu1 %v5034_v42, %s4047_s15 }
0x1ff7   :  { %3791 = vrot.lane.b32.xlu0 %v3780_v63, %s4047_s15  ;;  %s3489_s15 = sld [smem:[%s5210_s0 + %s4079_s8]]  }
0x200f   :  { %2857 = vadd.xlane.f32.xlu1 %v2856_v35 }
0x2033   :  { %v2661_v46 = vpop.xlane.xlu2 %2660 }
0x2037   :  { %v2658_v22 = vpop.xlane.xlu1 %2657 }
0x203f   :  { %v2954_v30 = vpop.xlane.xlu1 %2953 }
0x2040   :  { %3996 = vrcp.f32 %v2954_v30 }
0x2041   :  { %3998 = vrcp.f32 %v2658_v22 }
0x2046   :  { %v3997_v51 = vpop.eup %3996 }
0x2047   :  { %v2960_v40 = vmul.f32 %v3997_v51, %v3985_v8  ;;  %v3999_v39 = vpop.eup %3998  ;;  %v2861_v2 = vpop.xlane.xlu2 %2860 }
0x2048   :  { %v2664_v49 = vmul.f32 %v3999_v39, %v5048_v52  ;;  %v3668_v52 = vld [vmem:[%s4779_s7 + $0x20] sm:$0xff] }
0x2049   :  { %3666 = vmatmul.msk.f32.vlgmr.msra.gmra.mxu2 %vm421_vm9, %v2960_v40  ;;  %3044 = vmatpush.msra.mxu0 %v3668_v52 }
0x2053   :  { %v2791_v44 = vpop.f32.mrf.mxu2 }
0x2054   :  { %2799 = vrot.lane.b32.xlu0 %v2791_v44, %s4049_s17 }
0x2056   :  { %v2957_v41 = vpop.xlane.xlu0 %2956 }
0x2057   :  { %4000 = vrcp.f32 %v2957_v41  ;;  %v3787_v36 = vpop.permute.xlu1 %3786 }
0x2058   :  { %v3788_v42 = vunpack.i.l.bf16 %v3787_v36  ;;  %4002 = vrcp.f32 %v2661_v46  ;;  %v3789_v55 = vunpack.i.h.bf16 %v3787_v36 }
0x205a   :  { %2692 = vmatpush.msra.mxu3 %v3788_v42 }
0x205b   :  { %v2794_v50 = vpop.f32.mrf.mxu2 }
0x205c   :  { %2693 = vmatpush.msra.mxu3 %v3789_v55  ;;  %2801 = vrot.lane.b32.xlu2 %v2794_v50, %s4049_s17 }
0x205d   :  { %v4001_v54 = vpop.eup %4000  ;;  %3648 = vmatmul.msk.f32.vlgmr.msra.gmra.mxu3 %vm421_vm9, %v2664_v49 }
0x205e   :  { %v2961_v57 = vmul.f32 %v4001_v54, %v3993_v32  ;;  %v4003_v18 = vpop.eup %4002  ;;  %v3682_v54 = vld [vmem:[%s4832_s2 + $0x38] sm:$0xff] }
0x205f   :  { %v2665_v63 = vmul.f32 %v4003_v18, %v5044_v45  ;;  %v3681_v18 = vld [vmem:[%s4832_s2 + $0x30] sm:$0xff] }
0x2060   :  { %3667 = vmatmul.msk.f32.gmra.mxu2 %vm421_vm9, %v2961_v57 }
0x2065   :  { %3649 = vmatmul.msk.f32.gmra.mxu3 %vm421_vm9, %v2665_v63 }
0x2069   :  { %v3792_v62 = vpop.permute.xlu0 %3791 }
0x206a   :  { %v3793_v43 = vunpack.i.l.bf16 %v3792_v62  ;;  %v3794_v56 = vunpack.i.h.bf16 %v3792_v62  ;;  %v3680_v62 = vld [vmem:[%s4832_s2 + $0x28] sm:$0xff] }
0x206c   :  { %2892 = vmatpush.msrb.mxu3 %v3793_v43 }
0x206e   :  { %2893 = vmatpush.msrb.mxu3 %v3794_v56  ;;  %v3679_v56 = vld [vmem:[%s4832_s2 + $0x20] sm:$0xff] }
0x2070   :  { %3202 = vmatpush.msra.mxu3 %v3682_v54  ;;  %v3694_v54 = vld [vmem:[%s4874_s9 + $0x70] sm:$0xff] }
0x2072   :  { %3203 = vmatpush.msra.mxu3 %v3681_v18  ;;  %v3693_v18 = vld [vmem:[%s4874_s9 + $0x68] sm:$0xff] }
0x2074   :  { %3204 = vmatpush.msra.mxu3 %v3680_v62  ;;  %v3691_v62 = vld [vmem:[%s4874_s9 + $0x58] sm:$0xff] }
0x2076   :  { %3205 = vmatpush.msra.mxu3 %v3679_v56  ;;  %v3689_v56 = vld [vmem:[%s4874_s9 + $0x48] sm:$0xff] }
0x2082   :  { %v2858_v1 = vpop.xlane.xlu1 %2857 }
0x2083   :  { %4004 = vrcp.f32 %v2858_v1 }
0x2084   :  { %4006 = vrcp.f32 %v2861_v2 }
0x2089   :  { %v4005_v0 = vpop.eup %4004 }
0x208a   :  { %v2864_v3 = vmul.f32 %v4005_v0, %v3995_v34  ;;  %v4007_v4 = vpop.eup %4006 }
0x208b   :  { %v2865_v45 = vmul.f32 %v4007_v4, %v5054_v23 }
0x208c   :  { %3660 = vmatmul.msk.f32.vlgmr.msrb.gmra.mxu3 %vm421_vm9, %v2864_v3 }
0x2094   :  { %3661 = vmatmul.msk.f32.gmra.mxu3 %vm421_vm9, %v2865_v45 }
0x20b6   :  { %v2802_v8 = vpop.permute.xlu2 %2801 }
0x20c6   :  { %v2800_v6 = vpop.permute.xlu0 %2799 }
0x20cc   :  { %v2991_v48 = vpop.f32.mrf.mxu2 }
0x20cd   :  { %2999 = vrot.lane.b32.xlu0 %v2991_v48, %s4049_s17 }
0x20e0   :  { %v2695_v61 = vpop.f32.mrf.mxu3 }
0x20e1   :  { %v2805_v7 = vsel %vm421_vm9, %v2695_v61, %v2800_v6 }
0x20e2   :  { %3673 = vmatmul.msk.f32.vlgmr.msra.gmra.mxu0 %vm259_vm1, %v2805_v7 }
0x20e3   :  { %v2994_v9 = vpop.f32.mrf.mxu2 }
0x20e4   :  { %3001 = vrot.lane.b32.xlu1 %v2994_v9, %s4049_s17 }
0x20e8   :  { %v2698_v10 = vpop.f32.mrf.mxu3 }
0x20e9   :  { %v2806_v11 = vsel %vm421_vm9, %v2698_v10, %v2802_v8 }
0x20ea   :  { %3674 = vmatmul.msk.f32.gmra.mxu0 %vm259_vm1, %v2806_v11  ;;  %v3831_v11 = vld [vmem:[%s4812_s12 + $0x1] ss:$0 sm:$0xff]  ;;  %s3518_s12 = sld [smem:[%s5210_s0 + %s4081_s5]]  }
0x210f   :  { %v2895_v12 = vpop.f32.mrf.mxu3 }
0x2117   :  { %v2898_v13 = vpop.f32.mrf.mxu3 }
0x213f   :  { %v3000_v26 = vpop.permute.xlu0 %2999 }
0x2140   :  { %v3005_v60 = vsel %vm421_vm9, %v2895_v12, %v3000_v26 }
0x2141   :  { %3675 = vmatmul.msk.f32.gmra.mxu0 %vm259_vm1, %v3005_v60 }
0x2156   :  { %v3002_v14 = vpop.permute.xlu1 %3001 }
0x2157   :  { %v3006_v37 = vsel %vm421_vm9, %v2898_v13, %v3002_v14  ;;  %v3832_v14 = vld [vmem:[%s4827_s23 + $0x1] ss:$0 sm:$0xff] }
0x2158   :  { %3676 = vmatmul.msk.f32.gmra.mxu0 %vm259_vm1, %v3006_v37 }
0x215f   :  { %v3046_v23 = vpop.f32.mrf.mxu0 }
0x2160   :  { %v3047_v58 = vadd.f32 %v3830_v17, %v3046_v23 }
0x2162   :  { %v3058_v24 = vadd.f32 %v3047_v58, %v4947_v25 }
0x2164   :  { %v3066_v27 = vsel %vm259_vm1, %v3058_v24, 0.0 }
0x2165   :  { %3067 = vadd.xlane.f32.xlu0 %v3066_v27 }
0x2167   :  { %v3049_v20 = vpop.f32.mrf.mxu0 }
0x2168   :  { %v3050_v21 = vadd.f32 %v3830_v17, %v3049_v20 }
0x216a   :  { %v3059_v28 = vadd.f32 %v3050_v21, %v4951_v47 }
0x216c   :  { %v3069_v29 = vsel %vm259_vm1, %v3059_v28, 0.0 }
0x216d   :  { %3070 = vadd.xlane.f32.xlu2 %v3069_v29 }
0x21be   :  { %v3052_v32 = vpop.f32.mrf.mxu0 }
0x21bf   :  { %v3053_v19 = vadd.f32 %v3830_v17, %v3052_v32 }
0x21c1   :  { %v3060_v33 = vadd.f32 %v3053_v19, %v4958_v16 }
0x21c3   :  { %v3072_v15 = vsel %vm259_vm1, %v3060_v33, 0.0 }
0x21c4   :  { %3073 = vadd.xlane.f32.xlu1 %v3072_v15 }
0x21d5   :  { %v3055_v34 = vpop.f32.mrf.mxu0 }
0x21d6   :  { %v3056_v35 = vadd.f32 %v3830_v17, %v3055_v34 }
0x21d8   :  { %v3061_v25 = vadd.f32 %v3056_v35, %v4963_v53  ;;  %v3068_v22 = vpop.xlane.xlu0 %3067 }
0x21d9   :  { %v3078_v30 = vmul.f32 %v3068_v22, %v4131_v38 }
0x21da   :  { %v3075_v51 = vsel %vm259_vm1, %v3061_v25, 0.0 }
0x21db   :  { %v3082_v47 = vsub.f32 %v3058_v24, %v3078_v30  ;;  %3076 = vadd.xlane.f32.xlu0 %v3075_v51 }
0x21dd   :  { %v3086_v40 = vmul.f32 %v3082_v47, %v3082_v47 }
0x21df   :  { %v3090_v16 = vsel %vm259_vm1, %v3086_v40, 0.0 }
0x21e0   :  { %v3071_v44 = vpop.xlane.xlu2 %3070 }
0x21e1   :  { %v3079_v41 = vmul.f32 %v3071_v44, %v4131_v38 }
0x21e3   :  { %v3083_v46 = vsub.f32 %v3059_v28, %v3079_v41  ;;  %3091 = vadd.xlane.f32.xlu0 %v3090_v16 }
0x21e5   :  { %v3087_v36 = vmul.f32 %v3083_v46, %v3083_v46 }
0x21e7   :  { %v3093_v53 = vsel %vm259_vm1, %v3087_v36, 0.0 }
0x21e8   :  { %3094 = vadd.xlane.f32.xlu2 %v3093_v53 }
0x2237   :  { %v3074_v39 = vpop.xlane.xlu1 %3073 }
0x2238   :  { %v3080_v42 = vmul.f32 %v3074_v39, %v4131_v38 }
0x223a   :  { %v5104_v55 = vsub.f32 %v3060_v33, %v3080_v42 }
0x223c   :  { %v3088_v49 = vmul.f32 %v5104_v55, %v5104_v55 }
0x223e   :  { %v3096_v50 = vsel %vm259_vm1, %v3088_v49, 0.0  ;;  %v3695_v49 = vld [vmem:[%s4874_s9 + $0x78] sm:$0xff] }
0x223f   :  { %3097 = vadd.xlane.f32.xlu0 %v3096_v50  ;;  %3289 = vmatpush.msrb.mxu1 %v3695_v49 }
0x2241   :  { %3290 = vmatpush.msrb.mxu1 %v3694_v54 }
0x2243   :  { %3291 = vmatpush.msrb.mxu1 %v3693_v18 }
0x224e   :  { %v3077_v57 = vpop.xlane.xlu0 %3076 }
0x224f   :  { %v3081_v63 = vmul.f32 %v3077_v57, %v4131_v38 }
0x2251   :  { %v5113_v43 = vsub.f32 %v3061_v25, %v3081_v63  ;;  %v3692_v63 = vld [vmem:[%s4874_s9 + $0x60] sm:$0xff] }
0x2252   :  { %3292 = vmatpush.msrb.mxu1 %v3692_v63 }
0x2253   :  { %v3089_v1 = vmul.f32 %v5113_v43, %v5113_v43 }
0x2254   :  { %3293 = vmatpush.msrb.mxu1 %v3691_v62 }
0x2255   :  { %v3099_v2 = vsel %vm259_vm1, %v3089_v1, 0.0  ;;  %v3688_v1 = vld [vmem:[%s4874_s9 + $0x40] sm:$0xff] }
0x2256   :  { %3100 = vadd.xlane.f32.xlu2 %v3099_v2  ;;  %v3092_v0 = vpop.xlane.xlu0 %3091  ;;  %v3833_v2 = vld [vmem:[%s4855_s3 + $0x1] ss:$0 sm:$0xff] }
0x2257   :  { %v3102_v3 = vmul.f32 %v3092_v0, %v4131_v38 }
0x2259   :  { %v3106_v4 = vadd.f32 1e-12, %v3102_v3 }
0x225b   :  { %4008 = vrsqrt.f32 %v3106_v4  ;;  %v3095_v45 = vpop.xlane.xlu2 %3094  ;;  %vm3116_vm2 = vweird.f32 %v3106_v4 }
0x225c   :  { %v3103_v5 = vmul.f32 %v3095_v45, %v4131_v38 }
0x225e   :  { %v3107_v31 = vadd.f32 1e-12, %v3103_v5 }
0x2260   :  { %4010 = vrsqrt.f32 %v3107_v31  ;;  %vm3126_vm5 = vweird.f32 %v3107_v31 }
0x2261   :  { %v4009_v59 = vpop.eup %4008 }
0x2262   :  { %v3111_v52 = vmul.f32 %v4009_v59, %v3106_v4  ;;  %vm3117_vm9 = vweird.f32 %v4009_v59 }
0x2263   :  { %vm3118_vm3 = vmor %vm3116_vm2, %vm3117_vm9 }
0x2264   :  { %v3112_v48 = vmul.f32 %v4009_v59, %v3111_v52 }
0x2266   :  { %v4011_v6 = vpop.eup %4010  ;;  %v3113_v61 = vmul.f32 0.5, %v3112_v48 }
0x2267   :  { %v3121_v7 = vmul.f32 %v4011_v6, %v3107_v31  ;;  %vm3127_vm4 = vweird.f32 %v4011_v6 }
0x2268   :  { %v3114_v9 = vsub.f32 1.5, %v3113_v61  ;;  %vm3128_vm6 = vmor %vm3126_vm5, %vm3127_vm4 }
0x2269   :  { %v3122_v8 = vmul.f32 %v4011_v6, %v3121_v7 }
0x226a   :  { %v3115_v10 = vmul.f32 %v4009_v59, %v3114_v9 }
0x226b   :  { %v3123_v12 = vmul.f32 0.5, %v3122_v8 }
0x226c   :  { %v3119_v26 = vsel %vm3118_vm3, %v4009_v59, %v3115_v10 }
0x226d   :  { %v3150_v60 = vmul.f32 %v3119_v26, %v3082_v47  ;;  %v3124_v13 = vsub.f32 1.5, %v3123_v12 }
0x226f   :  { %v3157_v37 = vmul.f32 %v3831_v11, %v3150_v60  ;;  %v3125_v17 = vmul.f32 %v4011_v6, %v3124_v13 }
0x2271   :  { %v3129_v23 = vsel %vm3128_vm6, %v4011_v6, %v3125_v17  ;;  %v5123_v58 = vadd.f32 %v3832_v14, %v3157_v37 }
0x2272   :  { %v3151_v24 = vmul.f32 %v3129_v23, %v3083_v46 }
0x2273   :  { %3684 = vmatmul.msk.f32.vlgmr.msra.gmra.mxu3 %vm259_vm1, %v5123_v58 }
0x2274   :  { %v3158_v27 = vmul.f32 %v3831_v11, %v3151_v24 }
0x2276   :  { %v5127_v20 = vadd.f32 %v3832_v14, %v3158_v27 }
0x227b   :  { %3685 = vmatmul.msk.f32.gmra.mxu3 %vm259_vm1, %v5127_v20 }
0x22b2   :  { %v3098_v21 = vpop.xlane.xlu0 %3097 }
0x22b3   :  { %v3104_v28 = vmul.f32 %v3098_v21, %v4131_v38 }
0x22b5   :  { %v3108_v29 = vadd.f32 1e-12, %v3104_v28 }
0x22b7   :  { %4012 = vrsqrt.f32 %v3108_v29  ;;  %vm3136_vm8 = vweird.f32 %v3108_v29 }
0x22bd   :  { %v4013_v32 = vpop.eup %4012 }
0x22be   :  { %v3131_v19 = vmul.f32 %v4013_v32, %v3108_v29  ;;  %vm3137_vm7 = vweird.f32 %v4013_v32 }
0x22bf   :  { %vm3138_vm11 = vmor %vm3136_vm8, %vm3137_vm7 }
0x22c0   :  { %v3132_v33 = vmul.f32 %v4013_v32, %v3131_v19 }
0x22c2   :  { %v3133_v15 = vmul.f32 0.5, %v3132_v33 }
0x22c4   :  { %v3134_v34 = vsub.f32 1.5, %v3133_v15 }
0x22c6   :  { %v3135_v35 = vmul.f32 %v4013_v32, %v3134_v34 }
0x22c8   :  { %v3139_v25 = vsel %vm3138_vm11, %v4013_v32, %v3135_v35 }
0x22c9   :  { %v3152_v22 = vmul.f32 %v3139_v25, %v5104_v55  ;;  %v3101_v30 = vpop.xlane.xlu2 %3100 }
0x22ca   :  { %v3105_v51 = vmul.f32 %v3101_v30, %v4131_v38 }
0x22cb   :  { %v3159_v47 = vmul.f32 %v3831_v11, %v3152_v22 }
0x22cc   :  { %v3109_v40 = vadd.f32 1e-12, %v3105_v51 }
0x22cd   :  { %v5134_v44 = vadd.f32 %v3832_v14, %v3159_v47 }
0x22ce   :  { %4014 = vrsqrt.f32 %v3109_v40  ;;  %vm3146_vm10 = vweird.f32 %v3109_v40 }
0x22cf   :  { %3686 = vmatmul.msk.f32.gmra.mxu3 %vm259_vm1, %v5134_v44 }
0x22d4   :  { %v4015_v41 = vpop.eup %4014 }
0x22d5   :  { %v3141_v16 = vmul.f32 %v4015_v41, %v3109_v40  ;;  %vm3147_vm12 = vweird.f32 %v4015_v41 }
0x22d6   :  { %vm3148_vm13 = vmor %vm3146_vm10, %vm3147_vm12 }
0x22d7   :  { %v3142_v46 = vmul.f32 %v4015_v41, %v3141_v16 }
0x22d9   :  { %v3143_v36 = vmul.f32 0.5, %v3142_v46 }
0x22db   :  { %v3144_v53 = vsub.f32 1.5, %v3143_v36  ;;  %v3834_v36 = vld [vmem:[%s4897_s19 + $0x1] ss:$0 sm:$0xff] }
0x22dd   :  { %v3145_v39 = vmul.f32 %v4015_v41, %v3144_v53 }
0x22df   :  { %v3149_v42 = vsel %vm3148_vm13, %v4015_v41, %v3145_v39 }
0x22e0   :  { %v3153_v55 = vmul.f32 %v3149_v42, %v5113_v43  ;;  %v3690_v43 = vld [vmem:[%s4874_s9 + $0x50] sm:$0xff] }
0x22e1   :  { %3294 = vmatpush.msrb.mxu1 %v3690_v43 }
0x22e2   :  { %v3160_v50 = vmul.f32 %v3831_v11, %v3153_v55 }
0x22e3   :  { %3295 = vmatpush.msrb.mxu1 %v3689_v56 }
0x22e4   :  { %v5141_v57 = vadd.f32 %v3832_v14, %v3160_v50 }
0x22e5   :  { %3296 = vmatpush.msrb.mxu1 %v3688_v1 }
0x22e6   :  { %3687 = vmatmul.msk.f32.gmra.mxu3 %vm259_vm1, %v5141_v57 }
0x22f6   :  { %v3207_v0 = vpop.f32.mrf.mxu3 }
0x22f7   :  { %v3208_v3 = vadd.f32 %v3833_v2, %v3207_v0 }
0x22f9   :  { %v3219_v4 = vmul.f32 %v3208_v3, %v3208_v3 }
0x22fb   :  { %v3223_v45 = vmul.f32 %v3219_v4, %v3208_v3 }
0x22fd   :  { %v3227_v5 = vmul.f32 0.044715, %v3223_v45 }
0x22fe   :  { %v3210_v31 = vpop.f32.mrf.mxu3 }
0x22ff   :  { %v3231_v59 = vadd.f32 %v3227_v5, %v3208_v3  ;;  %v3211_v52 = vadd.f32 %v3833_v2, %v3210_v31 }
0x2301   :  { %v3235_v48 = vmul.f32 0.7978846, %v3231_v59  ;;  %v3220_v6 = vmul.f32 %v3211_v52, %v3211_v52 }
0x2303   :  { %4016 = vtanh.f32 %v3235_v48  ;;  %v3224_v61 = vmul.f32 %v3220_v6, %v3211_v52 }
0x2305   :  { %v3228_v7 = vmul.f32 0.044715, %v3224_v61 }
0x2307   :  { %v3232_v9 = vadd.f32 %v3228_v7, %v3211_v52 }
0x2309   :  { %v4017_v8 = vpop.eup %4016  ;;  %v3236_v10 = vmul.f32 0.7978846, %v3232_v9 }
0x230a   :  { %v3243_v11 = vadd.f32 1.0, %v4017_v8  ;;  %v3423_v8 = vld [vmem:[%s3489_s15 + $0x18] sm:$0xff] }
0x230b   :  { %4018 = vtanh.f32 %v3236_v10  ;;  %3452 = vmatpush.msrb.mxu2 %v3423_v8 }
0x230c   :  { %v3247_v12 = vmul.f32 0.5, %v3243_v11  ;;  %v3422_v11 = vld [vmem:[%s3489_s15 + $0x10] sm:$0xff] }
0x230d   :  { %3453 = vmatpush.msrb.mxu2 %v3422_v11 }
0x230e   :  { %v3251_v26 = vmul.f32 %v3247_v12, %v3208_v3 }
0x2310   :  { %3697 = vmatmul.msk.f32.vlgmr.msrb.gmra.mxu1 %vm204_vm0, %v3251_v26  ;;  %v3421_v26 = vld [vmem:[%s3489_s15 + $0x8] sm:$0xff] }
0x2311   :  { %v4019_v60 = vpop.eup %4018  ;;  %3454 = vmatpush.msrb.mxu2 %v3421_v26 }
0x2312   :  { %v3244_v13 = vadd.f32 1.0, %v4019_v60 }
0x2314   :  { %v3248_v14 = vmul.f32 0.5, %v3244_v13  ;;  %v3420_v13 = vld [vmem:[%s3489_s15] sm:$0xff] }
0x2315   :  { %3455 = vmatpush.msrb.mxu2 %v3420_v13 }
0x2316   :  { %v3252_v37 = vmul.f32 %v3248_v14, %v3211_v52 }
0x2318   :  { %3698 = vmatmul.msk.f32.gmra.mxu1 %vm204_vm0, %v3252_v37 }
0x2352   :  { %v3213_v17 = vpop.f32.mrf.mxu3 }
0x2353   :  { %v3214_v23 = vadd.f32 %v3833_v2, %v3213_v17 }
0x2355   :  { %v3221_v24 = vmul.f32 %v3214_v23, %v3214_v23 }
0x2357   :  { %v3225_v27 = vmul.f32 %v3221_v24, %v3214_v23 }
0x2359   :  { %v3229_v21 = vmul.f32 0.044715, %v3225_v27 }
0x235b   :  { %v3233_v28 = vadd.f32 %v3229_v21, %v3214_v23 }
0x235d   :  { %v3237_v29 = vmul.f32 0.7978846, %v3233_v28 }
0x235f   :  { %4020 = vtanh.f32 %v3237_v29 }
0x2365   :  { %v4021_v32 = vpop.eup %4020 }
0x2366   :  { %v3245_v19 = vadd.f32 1.0, %v4021_v32 }
0x2368   :  { %v3249_v33 = vmul.f32 0.5, %v3245_v19 }
0x2369   :  { %v3216_v15 = vpop.f32.mrf.mxu3 }
0x236a   :  { %v3217_v34 = vadd.f32 %v3833_v2, %v3216_v15  ;;  %v3253_v35 = vmul.f32 %v3249_v33, %v3214_v23 }
0x236c   :  { %v3222_v25 = vmul.f32 %v3217_v34, %v3217_v34  ;;  %3699 = vmatmul.msk.f32.gmra.mxu1 %vm204_vm0, %v3253_v35 }
0x236e   :  { %v3226_v22 = vmul.f32 %v3222_v25, %v3217_v34 }
0x2370   :  { %v3230_v30 = vmul.f32 0.044715, %v3226_v22  ;;  %v3835_v22 = vld [vmem:[%s4914_s27 + $0x1] ss:$0 sm:$0xff] }
0x2372   :  { %v3234_v51 = vadd.f32 %v3230_v30, %v3217_v34 }
0x2374   :  { %v3238_v47 = vmul.f32 0.7978846, %v3234_v51 }
0x2376   :  { %4022 = vtanh.f32 %v3238_v47  ;;  %v3836_v47 = vld [vmem:[%s4925_s29 + $0x1] ss:$0 sm:$0xff] }
0x237c   :  { %v4023_v40 = vpop.eup %4022 }
0x237d   :  { %v3246_v41 = vadd.f32 1.0, %v4023_v40 }
0x237f   :  { %v3250_v16 = vmul.f32 0.5, %v3246_v41 }
0x2381   :  { %v3254_v46 = vmul.f32 %v3250_v16, %v3217_v34 }
0x2383   :  { %3700 = vmatmul.msk.f32.gmra.mxu1 %vm204_vm0, %v3254_v46 }
0x238d   :  { %v3298_v53 = vpop.f32.mrf.mxu1 }
0x238e   :  { %v3299_v39 = vadd.f32 %v3834_v36, %v3298_v53 }
0x2390   :  { %v3310_v42 = vadd.f32 %v3299_v39, %v5123_v58 }
0x2392   :  { %v3318_v55 = vsel %vm259_vm1, %v3310_v42, 0.0 }
0x2393   :  { %3319 = vadd.xlane.f32.xlu1 %v3318_v55 }
0x2395   :  { %v3301_v49 = vpop.f32.mrf.mxu1 }
0x2396   :  { %v3302_v50 = vadd.f32 %v3834_v36, %v3301_v49 }
0x2398   :  { %v3311_v54 = vadd.f32 %v3302_v50, %v5127_v20 }
0x239a   :  { %v3321_v18 = vsel %vm259_vm1, %v3311_v54, 0.0 }
0x239b   :  { %3322 = vadd.xlane.f32.xlu0 %v3321_v18 }
0x23e9   :  { %v3304_v63 = vpop.f32.mrf.mxu1 }
0x23ea   :  { %v3305_v62 = vadd.f32 %v3834_v36, %v3304_v63 }
0x23ec   :  { %v3312_v43 = vadd.f32 %v3305_v62, %v5134_v44 }
0x23ee   :  { %v3324_v56 = vsel %vm259_vm1, %v3312_v43, 0.0 }
0x23ef   :  { %3325 = vadd.xlane.f32.xlu2 %v3324_v56 }
0x2400   :  { %v3307_v1 = vpop.f32.mrf.mxu1 }
0x2401   :  { %v3308_v2 = vadd.f32 %v3834_v36, %v3307_v1 }
0x2403   :  { %v3313_v58 = vadd.f32 %v3308_v2, %v5141_v57 }
0x2405   :  { %v3327_v0 = vsel %vm259_vm1, %v3313_v58, 0.0 }
0x2406   :  { %3328 = vadd.xlane.f32.xlu1 %v3327_v0  ;;  %v3320_v3 = vpop.xlane.xlu1 %3319 }
0x2407   :  { %v3330_v20 = vmul.f32 %v3320_v3, %v4131_v38 }
0x2409   :  { %v3334_v4 = vsub.f32 %v3310_v42, %v3330_v20 }
0x240b   :  { %v3338_v45 = vmul.f32 %v3334_v4, %v3334_v4 }
0x240d   :  { %v3342_v5 = vsel %vm259_vm1, %v3338_v45, 0.0 }
0x240e   :  { %v3323_v31 = vpop.xlane.xlu0 %3322  ;;  %3343 = vadd.xlane.f32.xlu0 %v3342_v5 }
0x240f   :  { %v3331_v44 = vmul.f32 %v3323_v31, %v4131_v38 }
0x2411   :  { %v5168_v59 = vsub.f32 %v3311_v54, %v3331_v44 }
0x2413   :  { %v3339_v52 = vmul.f32 %v5168_v59, %v5168_v59 }
0x2415   :  { %v3345_v57 = vsel %vm259_vm1, %v3339_v52, 0.0 }
0x2416   :  { %3346 = vadd.xlane.f32.xlu2 %v3345_v57 }
0x2462   :  { %v3326_v48 = vpop.xlane.xlu2 %3325 }
0x2463   :  { %v3332_v6 = vmul.f32 %v3326_v48, %v4131_v38 }
0x2465   :  { %v5174_v61 = vsub.f32 %v3312_v43, %v3332_v6 }
0x2467   :  { %v3340_v7 = vmul.f32 %v5174_v61, %v5174_v61 }
0x2469   :  { %v3348_v9 = vsel %vm259_vm1, %v3340_v7, 0.0 }
0x246a   :  { %3349 = vadd.xlane.f32.xlu1 %v3348_v9  ;;  %v3837_v9 = vld [vmem:[%s5193_s30] ss:$0 sm:$0xff] }
0x2479   :  { %v3329_v10 = vpop.xlane.xlu1 %3328 }
0x247a   :  { %v3333_v12 = vmul.f32 %v3329_v10, %v4131_v38 }
0x247c   :  { %v5183_v60 = vsub.f32 %v3313_v58, %v3333_v12 }
0x247e   :  { %v3341_v14 = vmul.f32 %v5183_v60, %v5183_v60 }
0x2480   :  { %v3351_v37 = vsel %vm259_vm1, %v3341_v14, 0.0 }
0x2481   :  { %v3344_v17 = vpop.xlane.xlu0 %3343  ;;  %3352 = vadd.xlane.f32.xlu0 %v3351_v37 }
0x2482   :  { %v3354_v23 = vmul.f32 %v3344_v17, %v4131_v38 }
0x2484   :  { %v3358_v24 = vadd.f32 1e-12, %v3354_v23 }
0x2486   :  { %4024 = vrsqrt.f32 %v3358_v24  ;;  %vm3368_vm14 = vweird.f32 %v3358_v24 }
0x2489   :  { %v3347_v27 = vpop.xlane.xlu2 %3346 }
0x248a   :  { %v3355_v21 = vmul.f32 %v3347_v27, %v4131_v38 }
0x248c   :  { %v4025_v28 = vpop.eup %4024  ;;  %v3359_v29 = vadd.f32 1e-12, %v3355_v21 }
0x248d   :  { %v3363_v32 = vmul.f32 %v4025_v28, %v3358_v24  ;;  %vm3369_vm0 = vweird.f32 %v4025_v28 }
0x248e   :  { %4026 = vrsqrt.f32 %v3359_v29  ;;  %vm3370_vm15 = vmor %vm3368_vm14, %vm3369_vm0  ;;  %vm3378_vm2 = vweird.f32 %v3359_v29 }
0x248f   :  { %v3364_v19 = vmul.f32 %v4025_v28, %v3363_v32 }
0x2491   :  { %v3365_v33 = vmul.f32 0.5, %v3364_v19 }
0x2493   :  { %v3366_v15 = vsub.f32 1.5, %v3365_v33 }
0x2494   :  { %v4027_v34 = vpop.eup %4026 }
0x2495   :  { %v3367_v35 = vmul.f32 %v4025_v28, %v3366_v15  ;;  %v3373_v25 = vmul.f32 %v4027_v34, %v3359_v29  ;;  %vm3379_vm9 = vweird.f32 %v4027_v34 }
0x2496   :  { %vm3380_vm3 = vmor %vm3378_vm2, %vm3379_vm9 }
0x2497   :  { %v3371_v30 = vsel %vm3370_vm15, %v4025_v28, %v3367_v35  ;;  %v3374_v51 = vmul.f32 %v4027_v34, %v3373_v25 }
0x2498   :  { %v3402_v40 = vmul.f32 %v3371_v30, %v3334_v4 }
0x2499   :  { %v3375_v41 = vmul.f32 0.5, %v3374_v51 }
0x249a   :  { %v3409_v16 = vmul.f32 %v3835_v22, %v3402_v40 }
0x249b   :  { %v3376_v46 = vsub.f32 1.5, %v3375_v41 }
0x249c   :  { %v3416_v36 = vadd.f32 %v3836_v47, %v3409_v16 }
0x249d   :  { %v3377_v53 = vmul.f32 %v4027_v34, %v3376_v46 }
0x249e   :  { %3703 = vmatmul.msk.f32.vlgmr.msrb.gmra.mxu2 %vm259_vm1, %v3416_v36 }
0x249f   :  { %v3381_v39 = vsel %vm3380_vm3, %v4027_v34, %v3377_v53 }
0x24a0   :  { %v3403_v42 = vmul.f32 %v3381_v39, %v5168_v59 }
0x24a2   :  { %v3410_v55 = vmul.f32 %v3835_v22, %v3403_v42 }
0x24a4   :  { %v3417_v49 = vadd.f32 %v3836_v47, %v3410_v55 }
0x24a6   :  { %3704 = vmatmul.msk.f32.gmra.mxu2 %vm259_vm1, %v3417_v49 }
0x24dd   :  { %v3350_v50 = vpop.xlane.xlu1 %3349 }
0x24de   :  { %v3356_v54 = vmul.f32 %v3350_v50, %v4131_v38 }
0x24e0   :  { %v3360_v18 = vadd.f32 1e-12, %v3356_v54 }
0x24e2   :  { %4028 = vrsqrt.f32 %v3360_v18  ;;  %vm3388_vm5 = vweird.f32 %v3360_v18 }
0x24e8   :  { %v4029_v63 = vpop.eup %4028 }
0x24e9   :  { %v3383_v62 = vmul.f32 %v4029_v63, %v3360_v18  ;;  %vm3389_vm4 = vweird.f32 %v4029_v63 }
0x24ea   :  { %vm3390_vm6 = vmor %vm3388_vm5, %vm3389_vm4 }
0x24eb   :  { %v3384_v43 = vmul.f32 %v4029_v63, %v3383_v62 }
0x24ed   :  { %v3385_v56 = vmul.f32 0.5, %v3384_v43 }
0x24ef   :  { %v3386_v1 = vsub.f32 1.5, %v3385_v56 }
0x24f1   :  { %v3387_v2 = vmul.f32 %v4029_v63, %v3386_v1 }
0x24f3   :  { %v3391_v58 = vsel %vm3390_vm6, %v4029_v63, %v3387_v2 }
0x24f4   :  { %v3404_v0 = vmul.f32 %v3391_v58, %v5174_v61  ;;  %v3353_v3 = vpop.xlane.xlu0 %3352 }
0x24f5   :  { %v3357_v20 = vmul.f32 %v3353_v3, %v4131_v38 }
0x24f6   :  { %v3411_v4 = vmul.f32 %v3835_v22, %v3404_v0 }
0x24f7   :  { %v3361_v45 = vadd.f32 1e-12, %v3357_v20 }
0x24f8   :  { %v3418_v5 = vadd.f32 %v3836_v47, %v3411_v4 }
0x24f9   :  { %4030 = vrsqrt.f32 %v3361_v45  ;;  %vm3398_vm8 = vweird.f32 %v3361_v45 }
0x24fa   :  { %3705 = vmatmul.msk.f32.gmra.mxu2 %vm259_vm1, %v3418_v5 }
0x24ff   :  { %v4031_v31 = vpop.eup %4030 }
0x2500   :  { %v3393_v44 = vmul.f32 %v4031_v31, %v3361_v45  ;;  %vm3399_vm7 = vweird.f32 %v4031_v31 }
0x2501   :  { %vm3400_vm11 = vmor %vm3398_vm8, %vm3399_vm7 }
0x2502   :  { %v3394_v59 = vmul.f32 %v4031_v31, %v3393_v44 }
0x2504   :  { %v3395_v52 = vmul.f32 0.5, %v3394_v59 }
0x2506   :  { %v3396_v57 = vsub.f32 1.5, %v3395_v52 }
0x2508   :  { %v3397_v48 = vmul.f32 %v4031_v31, %v3396_v57 }
0x250a   :  { %v3401_v6 = vsel %vm3400_vm11, %v4031_v31, %v3397_v48 }
0x250b   :  { %v3405_v61 = vmul.f32 %v3401_v6, %v5183_v60 }
0x250d   :  { %v3412_v38 = vmul.f32 %v3835_v22, %v3405_v61 }
0x250f   :  { %v3419_v7 = vadd.f32 %v3836_v47, %v3412_v38 }
0x2511   :  { %3706 = vmatmul.msk.f32.gmra.mxu2 %vm259_vm1, %v3419_v7 }
0x2521   :  { %v3457_v8 = vpop.f32.mrf.mxu2 }
0x2522   :  { %v3458_v10 = vadd.f32 %v3837_v9, %v3457_v8 }
0x2524   :  { %3469 = vst [vmem:[%s3518_s12] sm:$0xff] %v3458_v10 }
0x2529   :  { %v3460_v11 = vpop.f32.mrf.mxu2 }
0x252a   :  { %v3461_v12 = vadd.f32 %v3837_v9, %v3460_v11 }
0x252c   :  { %3470 = vst [vmem:[%s3518_s12 + $0x8] sm:$0xff] %v3461_v12 }
0x257d   :  { %v3463_v26 = vpop.f32.mrf.mxu2 }
0x257e   :  { %v3464_v13 = vadd.f32 %v3837_v9, %v3463_v26 }
0x2580   :  { %3471 = vst [vmem:[%s3518_s12 + $0x10] sm:$0xff] %v3464_v13 }
0x2594   :  { %v3466_v60 = vpop.f32.mrf.mxu2 }
0x2595   :  { %v3467_v14 = vadd.f32 %v3837_v9, %v3466_v60 }
0x2597   :  { %3472 = vst [vmem:[%s3518_s12 + $0x18] sm:$0xff] %v3467_v14 }

</bundles_post_ra>
